<compile_context>
chip_gen: v7x
topology: tpu7x:2x2x1
jax: 0.10.0
libtpu: 0.0.40
codegen_flags: <defaults>
</compile_context>

<pallas_src>
import functools

import jax
import jax.numpy as jnp
from jax.experimental import pallas as pl
from jax.experimental.pallas import tpu as pltpu

HIDD_DIM = 32          # d_model (must equal BERT hidden size)
NHEAD = 8              # TransformerEncoderLayer(nhead=8)
FF_DIM = 2048          # PyTorch TransformerEncoderLayer default dim_feedforward
LN_EPS = 1e-5          # PyTorch default layer_norm_eps
NUM_LAYERS = 2
NUM_WEIGHT_SETS = 2    # 0: trans_encoder / linear_cell, 1: trans_encoder_all / linear_all
STREAMS_PER_SET = 2    # set 0: (text_1, text_2); set 1: (text_all, dummy)
FF_CHUNKS = 4          # block the 2048 hidden dim into 4 x 512 chunks


def _layernorm(v, g, b):
    mu = jnp.mean(v, axis=-1, keepdims=True)
    var = jnp.mean(jnp.square(v - mu), axis=-1, keepdims=True)
    return (v - mu) * jax.lax.rsqrt(var + LN_EPS) * g + b


# ---------------------------------------------------------------------------
# Fused kernel: one weight set (two streams) per grid step
# ---------------------------------------------------------------------------
def _fused_kernel(tok_ref, xp_ref, yp_ref, blk_ref,
                  wqkv_ref, bqkv_ref, wo_ref, bo_ref, ln1g_ref, ln1b_ref,
                  w1_ref, b1_ref, w2_ref, b2_ref, ln2g_ref, ln2b_ref,
                  wh_ref, bh_ref,
                  cls_ref, *, nhead, num_layers, ff_chunks):
    """pos-add + 2 post-LN encoder layers (eval mode, ReLU FFN) + cls head.

    tok block: (1, S, B, T, D).  PyTorch's encoder is batch_first=False, so it
    attends over axis 0 (length B) of each (B, T, D) stream and treats axis 1
    (T) as the batch; we reproduce that directly inside the kernel, keeping the
    S streams of this weight set independent.
    """
    tok = tok_ref[0]                                   # (S, B, T, D)
    S, B, T, D = tok.shape
    hd = D // nhead
    scale = hd ** -0.5
    M = S * B * T
    blk = blk_ref[...]                                 # (D, D) block-diag head selector

    # tok + x_emb.unsqueeze(1) + y_emb.unsqueeze(1)
    x = tok + xp_ref[0][:, :, None, :] + yp_ref[0][:, :, None, :]
    x2 = x.reshape(M, D)                               # row order: s*B*T + i*T + t

    for l in range(num_layers):                        # static unroll (2 layers)
        # --- fused QKV projection (bf16 weights, f32 accumulation) ---
        qkv = jnp.dot(x2.astype(jnp.bfloat16), wqkv_ref[0, l],
                      preferred_element_type=jnp.float32) + bqkv_ref[0, l]
        q = (qkv[:, 0 * D:1 * D] * scale).reshape(S, B, T, D)
        k = qkv[:, 1 * D:2 * D].reshape(S, B, T, D)
        v = qkv[:, 2 * D:3 * D].reshape(S, B, T, D)

        # --- multi-head self-attention over the seq axis (axis 0 of each
        #     stream), batched over streams & batch columns.
        # blk[d, d'] = 1 iff d, d' belong to the same head, so
        # (q_i * k_j) @ blk puts each head's score on all of that head's lanes:
        # softmax and P@V stay lane-dense elementwise ops.  All S*B*B pairs go
        # through ONE MXU push.
        qk = q[:, :, None, :, :] * k[:, None, :, :, :]            # (S,B,B,T,D)
        s_all = jnp.dot(qk.reshape(S * B * B * T, D), blk,
                        preferred_element_type=jnp.float32)
        s_all = s_all.reshape(S, B, B, T, D)
        m = jnp.max(s_all, axis=2, keepdims=True)
        e = jnp.exp(s_all - m)
        denom = jnp.sum(e, axis=2, keepdims=True)
        p = e * pl.reciprocal(denom, approx=True)
        attn = jnp.sum(p * v[:, None, :, :, :], axis=2)           # (S,B,T,D)
        attn2 = (jnp.dot(attn.reshape(M, D).astype(jnp.bfloat16), wo_ref[0, l],
                         preferred_element_type=jnp.float32) + bo_ref[0, l])

        # residual + norm1 (post-LN)
        x2 = _layernorm(x2 + attn2, ln1g_ref[0, l], ln1b_ref[0, l])

        # --- feed-forward (ReLU, dropout = identity in eval), blocked over the
        #     2048 hidden dim; w2 is lane-dense (D, FF) and contracted on FF ---
        x2b = x2.astype(jnp.bfloat16)
        ff_dim = w1_ref.shape[-1]
        chunk = ff_dim // ff_chunks
        ff = jnp.zeros((M, D), jnp.float32) + b2_ref[0, l]
        for c in range(ff_chunks):
            lo = c * chunk
            h1 = jnp.maximum(
                jnp.dot(x2b, w1_ref[0, l, :, lo:lo + chunk],
                        preferred_element_type=jnp.float32)
                + b1_ref[0, l, :, lo:lo + chunk],
                0.0)
            ff = ff + jax.lax.dot_general(
                h1.astype(jnp.bfloat16), w2_ref[0, l, :, lo:lo + chunk],
                dimension_numbers=(((1,), (1,)), ((), ())),
                preferred_element_type=jnp.float32)

        # residual + norm2
        x2 = _layernorm(x2 + ff, ln2g_ref[0, l], ln2b_ref[0, l])

    # semantic[:, 0, :] (t = 0 column of each stream) -> tanh(Linear)
    cls_in = x2.reshape(S, B, T, D)[:, :, 0, :].reshape(S * B, D)
    cls = jnp.tanh(jnp.dot(cls_in.astype(jnp.bfloat16), wh_ref[0],
                           preferred_element_type=jnp.float32) + bh_ref[0])
    cls_ref[0] = cls.reshape(S, B, D)


# ---------------------------------------------------------------------------
# BlockSpec helpers and the pallas_call wrapper
# ---------------------------------------------------------------------------
def _set_spec(a):
    """Leading axis = weight-set index = grid index."""
    nd = a.ndim
    return pl.BlockSpec((1,) + a.shape[1:],
                        lambda ws, _n=nd: (ws,) + (0,) * (_n - 1))


_ENC_KEYS = ('wqkv', 'bqkv', 'wo', 'bo', 'ln1_g', 'ln1_b',
             'w1', 'b1', 'w2', 'b2', 'ln2_g', 'ln2_b')


def fused_forward(tok, xp, yp, blk, params):
    """tok: (2, S, B, T, D); xp, yp: (2, S, B, D)  ->  (2, S, B, D) cls vectors."""
    n_ws, S, B, T, D = tok.shape
    enc_args = tuple(params[k] for k in _ENC_KEYS)
    head_args = (params['wh'], params['bh'])
    in_specs = ([_set_spec(tok), _set_spec(xp), _set_spec(yp),
                 pl.BlockSpec(blk.shape, lambda ws: (0, 0))]
                + [_set_spec(a) for a in enc_args + head_args])
    return pl.pallas_call(
        functools.partial(_fused_kernel, nhead=NHEAD, num_layers=NUM_LAYERS,
                          ff_chunks=FF_CHUNKS),
        grid=(n_ws,),
        in_specs=in_specs,
        out_specs=pl.BlockSpec((1, S, B, D), lambda ws: (ws, 0, 0, 0)),
        out_shape=jax.ShapeDtypeStruct((n_ws, S, B, D), jnp.float32),
        compiler_params=pltpu.CompilerParams(
            dimension_semantics=("parallel",)),   # v7x: one weight set per TensorCore
    )(tok, xp, yp, blk, *enc_args, *head_args)


def _head_selector(d=HIDD_DIM, nhead=NHEAD):
    hd = d // nhead
    di = jnp.arange(d)[:, None] // hd
    dj = jnp.arange(d)[None, :] // hd
    return (di == dj).astype(jnp.float32)


# ---------------------------------------------------------------------------
# Parameter construction (deterministic, synthetic)
# ---------------------------------------------------------------------------
def init_params(key, d=HIDD_DIM, ff=FF_DIM, n_layers=NUM_LAYERS):
    ks = iter(jax.random.split(key, 16))

    def nrm(shape, scale=0.02, dtype=jnp.float32):
        return (scale * jax.random.normal(next(ks), shape)).astype(dtype)

    ne = NUM_WEIGHT_SETS
    bf = jnp.bfloat16
    return dict(
        # fused QKV projection, pre-transposed: x @ wqkv + bqkv, cols = [q | k | v]
        wqkv=nrm((ne, n_layers, d, 3 * d), dtype=bf),
        bqkv=nrm((ne, n_layers, 1, 3 * d)),
        wo=nrm((ne, n_layers, d, d), dtype=bf),
        bo=nrm((ne, n_layers, 1, d)),
        ln1_g=jnp.ones((ne, n_layers, 1, d), jnp.float32),
        ln1_b=jnp.zeros((ne, n_layers, 1, d), jnp.float32),
        # FFN: w1 pre-transposed (d, ff); w2 kept lane-dense in its PyTorch-native
        # (d, ff) orientation and contracted over the ff axis inside the kernel.
        w1=nrm((ne, n_layers, d, ff), dtype=bf),
        b1=nrm((ne, n_layers, 1, ff)),
        w2=nrm((ne, n_layers, d, ff), dtype=bf),
        b2=nrm((ne, n_layers, 1, d)),
        ln2_g=jnp.ones((ne, n_layers, 1, d), jnp.float32),
        ln2_b=jnp.zeros((ne, n_layers, 1, d), jnp.float32),
        # cls heads stacked: [0] = linear_cell, [1] = linear_all
        wh=nrm((ne, d, d), dtype=bf),
        bh=nrm((ne, 1, d)),
        # position embedding tables
        x_pos=nrm((3000, d), 1.0),
        y_pos=nrm((5000, d), 1.0),
    )


# ---------------------------------------------------------------------------
# Forward (mirrors TokBertConDiffer.forward, with BERT outputs as inputs)
# ---------------------------------------------------------------------------
def tok_bert_con_differ_forward(params, text_1_cls, text_2_cls,
                                text_1_tok, text_2_tok, text_all_tok,
                                x_1, y_1, x_2, y_2):
    # forward_position: embedding lookups (gather glue in plain JAX)
    x1e, y1e = params['x_pos'][x_1], params['y_pos'][y_1]
    x2e, y2e = params['x_pos'][x_2], params['y_pos'][y_2]
    xae, yae = (x1e + x2e) * 0.5, (y1e + y2e) * 0.5

    # Stream packing: weight set 0 -> (text_1, text_2); set 1 -> (text_all, dummy)
    zt = jnp.zeros_like(text_all_tok)
    ze = jnp.zeros_like(x1e)
    tok = jnp.stack([jnp.stack([text_1_tok, text_2_tok], axis=0),
                     jnp.stack([text_all_tok, zt], axis=0)], axis=0)   # (2,2,B,T,D)
    xp = jnp.stack([jnp.stack([x1e, x2e], axis=0),
                    jnp.stack([xae, ze], axis=0)], axis=0)             # (2,2,B,D)
    yp = jnp.stack([jnp.stack([y1e, y2e], axis=0),
                    jnp.stack([yae, ze], axis=0)], axis=0)             # (2,2,B,D)

    blk = _head_selector()
    cls = fused_forward(tok, xp, yp, blk, params)                      # (2,2,B,D)
    s1, s2, sall = cls[0, 0], cls[0, 1], cls[1, 0]                     # cls[1,1] = dummy, ignored

    # final difference combine: tiny fused XLA elementwise op
    f1 = s1 + (sall - s2)
    f2 = s2 + (sall - s1)
    return text_1_cls, text_2_cls, f1, f2


# ---------------------------------------------------------------------------
if __name__ == "__main__":
    B, T, D = 2, 8, HIDD_DIM
    key = jax.random.PRNGKey(0)
    kp, k1, k2, k3, k4, k5, kx1, ky1, kx2, ky2 = jax.random.split(key, 10)

    params = init_params(kp)

    # Synthetic stand-ins for the external bert_model outputs.
    text_1_tok = jax.random.normal(k1, (B, T, D), jnp.float32)
    text_2_tok = jax.random.normal(k2, (B, T, D), jnp.float32)
    text_all_tok = jax.random.normal(k3, (B, T, D), jnp.float32)
    text_1_cls = jax.random.normal(k4, (B, D), jnp.float32)
    text_2_cls = jax.random.normal(k5, (B, D), jnp.float32)

    x_1 = jax.random.randint(kx1, (B,), 0, 3000)
    y_1 = jax.random.randint(ky1, (B,), 0, 5000)
    x_2 = jax.random.randint(kx2, (B,), 0, 3000)
    y_2 = jax.random.randint(ky2, (B,), 0, 5000)

    fwd = jax.jit(tok_bert_con_differ_forward)
    outs = fwd(params, text_1_cls, text_2_cls,
               text_1_tok, text_2_tok, text_all_tok,
               x_1, y_1, x_2, y_2)
    outs = jax.block_until_ready(outs)

    t1c, t2c, f1, f2 = outs
    assert t1c.shape == (B, D) and t2c.shape == (B, D)
    assert f1.shape == (B, D) and f2.shape == (B, D)
    assert all(bool(jnp.all(jnp.isfinite(o))) for o in outs)
    print("KERNEL_OK")
</pallas_src>

<mosaic_0001>
module attributes {stable_mosaic.version = 11 : i64} {
  func.func @_fused_kernel(%arg0: i32, %arg1: memref<1x2x2x8x32xf32, #tpu.memory_space<vmem>>, %arg2: memref<1x2x2x32xf32, #tpu.memory_space<vmem>>, %arg3: memref<1x2x2x32xf32, #tpu.memory_space<vmem>>, %arg4: memref<32x32xf32, #tpu.memory_space<vmem>>, %arg5: memref<1x2x32x96xbf16, #tpu.memory_space<vmem>>, %arg6: memref<1x2x1x96xf32, #tpu.memory_space<vmem>>, %arg7: memref<1x2x32x32xbf16, #tpu.memory_space<vmem>>, %arg8: memref<1x2x1x32xf32, #tpu.memory_space<vmem>>, %arg9: memref<1x2x1x32xf32, #tpu.memory_space<vmem>>, %arg10: memref<1x2x1x32xf32, #tpu.memory_space<vmem>>, %arg11: memref<1x2x32x2048xbf16, #tpu.memory_space<vmem>>, %arg12: memref<1x2x1x2048xf32, #tpu.memory_space<vmem>>, %arg13: memref<1x2x32x2048xbf16, #tpu.memory_space<vmem>>, %arg14: memref<1x2x1x32xf32, #tpu.memory_space<vmem>>, %arg15: memref<1x2x1x32xf32, #tpu.memory_space<vmem>>, %arg16: memref<1x2x1x32xf32, #tpu.memory_space<vmem>>, %arg17: memref<1x32x32xbf16, #tpu.memory_space<vmem>>, %arg18: memref<1x1x32xf32, #tpu.memory_space<vmem>>, %arg19: memref<1x2x2x32xf32, #tpu.memory_space<vmem>>) attributes {dimension_semantics = [#tpu.dimension_semantics<parallel>], iteration_bounds = array<i64: 2>, scalar_prefetch = 0 : i64, scratch_operands = 0 : i64, tpu.core_type = #tpu.core_type<tc>, window_params = [{transform_indices = @transform_0, window_bounds = array<i64: 1, 2, 2, 8, 32>}, {transform_indices = @transform_1, window_bounds = array<i64: 1, 2, 2, 32>}, {transform_indices = @transform_2, window_bounds = array<i64: 1, 2, 2, 32>}, {pipeline_mode = #tpu.pipeline_mode<synchronous>, transform_indices = @transform_3, window_bounds = array<i64: 32, 32>}, {transform_indices = @transform_4, window_bounds = array<i64: 1, 2, 32, 96>}, {transform_indices = @transform_5, window_bounds = array<i64: 1, 2, 1, 96>}, {transform_indices = @transform_6, window_bounds = array<i64: 1, 2, 32, 32>}, {transform_indices = @transform_7, window_bounds = array<i64: 1, 2, 1, 32>}, {transform_indices = @transform_8, window_bounds = array<i64: 1, 2, 1, 32>}, {transform_indices = @transform_9, window_bounds = array<i64: 1, 2, 1, 32>}, {transform_indices = @transform_10, window_bounds = array<i64: 1, 2, 32, 2048>}, {transform_indices = @transform_11, window_bounds = array<i64: 1, 2, 1, 2048>}, {transform_indices = @transform_12, window_bounds = array<i64: 1, 2, 32, 2048>}, {transform_indices = @transform_13, window_bounds = array<i64: 1, 2, 1, 32>}, {transform_indices = @transform_14, window_bounds = array<i64: 1, 2, 1, 32>}, {transform_indices = @transform_15, window_bounds = array<i64: 1, 2, 1, 32>}, {transform_indices = @transform_16, window_bounds = array<i64: 1, 32, 32>}, {transform_indices = @transform_17, window_bounds = array<i64: 1, 1, 32>}, {transform_indices = @transform_18, window_bounds = array<i64: 1, 2, 2, 32>}]} {
    %c0 = arith.constant 0 : index
    %c0_0 = arith.constant 0 : index
    %c0_1 = arith.constant 0 : index
    %c0_2 = arith.constant 0 : index
    %c0_3 = arith.constant 0 : index
    %0 = vector.load %arg1[%c0, %c0_0, %c0_1, %c0_2, %c0_3] : memref<1x2x2x8x32xf32, #tpu.memory_space<vmem>>, vector<1x2x2x8x32xf32>
    %1 = vector.shape_cast %0 : vector<1x2x2x8x32xf32> to vector<2x2x8x32xf32>
    %c0_4 = arith.constant 0 : index
    %c0_5 = arith.constant 0 : index
    %2 = vector.load %arg4[%c0_4, %c0_5] : memref<32x32xf32, #tpu.memory_space<vmem>>, vector<32x32xf32>
    %c0_6 = arith.constant 0 : index
    %c0_7 = arith.constant 0 : index
    %c0_8 = arith.constant 0 : index
    %c0_9 = arith.constant 0 : index
    %3 = vector.load %arg2[%c0_6, %c0_7, %c0_8, %c0_9] : memref<1x2x2x32xf32, #tpu.memory_space<vmem>>, vector<1x2x2x32xf32>
    %4 = vector.shape_cast %3 : vector<1x2x2x32xf32> to vector<2x2x32xf32>
    %5 = vector.shape_cast %4 : vector<2x2x32xf32> to vector<2x2x1x32xf32>
    %6 = vector.broadcast %5 : vector<2x2x1x32xf32> to vector<2x2x8x32xf32>
    %7 = arith.addf %1, %6 : vector<2x2x8x32xf32>
    %c0_10 = arith.constant 0 : index
    %c0_11 = arith.constant 0 : index
    %c0_12 = arith.constant 0 : index
    %c0_13 = arith.constant 0 : index
    %8 = vector.load %arg3[%c0_10, %c0_11, %c0_12, %c0_13] : memref<1x2x2x32xf32, #tpu.memory_space<vmem>>, vector<1x2x2x32xf32>
    %9 = vector.shape_cast %8 : vector<1x2x2x32xf32> to vector<2x2x32xf32>
    %10 = vector.shape_cast %9 : vector<2x2x32xf32> to vector<2x2x1x32xf32>
    %11 = vector.broadcast %10 : vector<2x2x1x32xf32> to vector<2x2x8x32xf32>
    %12 = arith.addf %7, %11 : vector<2x2x8x32xf32>
    %13 = vector.shape_cast %12 : vector<2x2x8x32xf32> to vector<32x32xf32>
    %14 = arith.truncf %13 : vector<32x32xf32> to vector<32x32xbf16>
    %c0_14 = arith.constant 0 : index
    %c0_15 = arith.constant 0 : index
    %c0_16 = arith.constant 0 : index
    %c0_17 = arith.constant 0 : index
    %15 = vector.load %arg5[%c0_14, %c0_15, %c0_16, %c0_17] : memref<1x2x32x96xbf16, #tpu.memory_space<vmem>>, vector<1x1x32x96xbf16>
    %16 = vector.shape_cast %15 : vector<1x1x32x96xbf16> to vector<32x96xbf16>
    %cst = arith.constant dense<0.000000e+00> : vector<32x96xf32>
    %17 = tpu.matmul %14, %16, %cst {dimension_numbers = #tpu.dot_dimension_numbers<[1], [0], [0], [1], [0, 0, 1, 1], [], []>} : vector<32x32xbf16>, vector<32x96xbf16>, vector<32x96xf32> -> vector<32x96xf32>
    %c0_18 = arith.constant 0 : index
    %c0_19 = arith.constant 0 : index
    %c0_20 = arith.constant 0 : index
    %c0_21 = arith.constant 0 : index
    %18 = vector.load %arg6[%c0_18, %c0_19, %c0_20, %c0_21] : memref<1x2x1x96xf32, #tpu.memory_space<vmem>>, vector<1x1x1x96xf32>
    %19 = vector.shape_cast %18 : vector<1x1x1x96xf32> to vector<1x96xf32>
    %20 = vector.broadcast %19 : vector<1x96xf32> to vector<32x96xf32>
    %21 = arith.addf %17, %20 : vector<32x96xf32>
    %22 = vector.extract_strided_slice %21 {offsets = [0, 0], sizes = [32, 32], strides = [1, 1]} : vector<32x96xf32> to vector<32x32xf32>
    %cst_22 = arith.constant 5.000000e-01 : f32
    %23 = vector.broadcast %cst_22 : f32 to vector<32x32xf32>
    %24 = arith.mulf %22, %23 : vector<32x32xf32>
    %25 = vector.shape_cast %24 : vector<32x32xf32> to vector<2x2x8x32xf32>
    %26 = vector.extract_strided_slice %21 {offsets = [0, 32], sizes = [32, 32], strides = [1, 1]} : vector<32x96xf32> to vector<32x32xf32>
    %27 = vector.shape_cast %26 : vector<32x32xf32> to vector<2x2x8x32xf32>
    %28 = vector.extract_strided_slice %21 {offsets = [0, 64], sizes = [32, 32], strides = [1, 1]} : vector<32x96xf32> to vector<32x32xf32>
    %29 = vector.shape_cast %28 : vector<32x32xf32> to vector<2x2x8x32xf32>
    %30 = vector.shape_cast %25 : vector<2x2x8x32xf32> to vector<2x2x1x8x32xf32>
    %31 = vector.shape_cast %27 : vector<2x2x8x32xf32> to vector<2x1x2x8x32xf32>
    %32 = vector.broadcast %30 : vector<2x2x1x8x32xf32> to vector<2x2x2x8x32xf32>
    %33 = vector.broadcast %31 : vector<2x1x2x8x32xf32> to vector<2x2x2x8x32xf32>
    %34 = arith.mulf %32, %33 : vector<2x2x2x8x32xf32>
    %35 = vector.shape_cast %34 : vector<2x2x2x8x32xf32> to vector<64x32xf32>
    %cst_23 = arith.constant dense<0.000000e+00> : vector<64x32xf32>
    %36 = tpu.matmul %35, %2, %cst_23 {dimension_numbers = #tpu.dot_dimension_numbers<[1], [0], [0], [1], [0, 0, 1, 1], [], []>} : vector<64x32xf32>, vector<32x32xf32>, vector<64x32xf32> -> vector<64x32xf32>
    %37 = vector.shape_cast %36 : vector<64x32xf32> to vector<2x2x2x8x32xf32>
    %cst_24 = arith.constant dense<0xFF800000> : vector<2x2x8x32xf32>
    %38 = vector.multi_reduction <maximumf>, %37, %cst_24 [2] : vector<2x2x2x8x32xf32> to vector<2x2x8x32xf32>
    %39 = vector.shape_cast %38 : vector<2x2x8x32xf32> to vector<2x2x1x8x32xf32>
    %40 = vector.broadcast %39 : vector<2x2x1x8x32xf32> to vector<2x2x2x8x32xf32>
    %41 = arith.subf %37, %40 : vector<2x2x2x8x32xf32>
    %42 = math.exp %41 : vector<2x2x2x8x32xf32>
    %cst_25 = arith.constant dense<0.000000e+00> : vector<2x2x8x32xf32>
    %43 = vector.multi_reduction <add>, %42, %cst_25 [2] : vector<2x2x2x8x32xf32> to vector<2x2x8x32xf32>
    %44 = vector.shape_cast %43 : vector<2x2x8x32xf32> to vector<2x2x1x8x32xf32>
    %45 = tpu.reciprocal %44 {approx = true} : vector<2x2x1x8x32xf32> -> vector<2x2x1x8x32xf32>
    %46 = vector.broadcast %45 : vector<2x2x1x8x32xf32> to vector<2x2x2x8x32xf32>
    %47 = arith.mulf %42, %46 : vector<2x2x2x8x32xf32>
    %48 = vector.shape_cast %29 : vector<2x2x8x32xf32> to vector<2x1x2x8x32xf32>
    %49 = vector.broadcast %48 : vector<2x1x2x8x32xf32> to vector<2x2x2x8x32xf32>
    %50 = arith.mulf %47, %49 : vector<2x2x2x8x32xf32>
    %cst_26 = arith.constant dense<0.000000e+00> : vector<2x2x8x32xf32>
    %51 = vector.multi_reduction <add>, %50, %cst_26 [2] : vector<2x2x2x8x32xf32> to vector<2x2x8x32xf32>
    %52 = vector.shape_cast %51 : vector<2x2x8x32xf32> to vector<32x32xf32>
    %53 = arith.truncf %52 : vector<32x32xf32> to vector<32x32xbf16>
    %c0_27 = arith.constant 0 : index
    %c0_28 = arith.constant 0 : index
    %c0_29 = arith.constant 0 : index
    %c0_30 = arith.constant 0 : index
    %54 = vector.load %arg7[%c0_27, %c0_28, %c0_29, %c0_30] : memref<1x2x32x32xbf16, #tpu.memory_space<vmem>>, vector<1x1x32x32xbf16>
    %55 = vector.shape_cast %54 : vector<1x1x32x32xbf16> to vector<32x32xbf16>
    %cst_31 = arith.constant dense<0.000000e+00> : vector<32x32xf32>
    %56 = tpu.matmul %53, %55, %cst_31 {dimension_numbers = #tpu.dot_dimension_numbers<[1], [0], [0], [1], [0, 0, 1, 1], [], []>} : vector<32x32xbf16>, vector<32x32xbf16>, vector<32x32xf32> -> vector<32x32xf32>
    %c0_32 = arith.constant 0 : index
    %c0_33 = arith.constant 0 : index
    %c0_34 = arith.constant 0 : index
    %c0_35 = arith.constant 0 : index
    %57 = vector.load %arg8[%c0_32, %c0_33, %c0_34, %c0_35] : memref<1x2x1x32xf32, #tpu.memory_space<vmem>>, vector<1x1x1x32xf32>
    %58 = vector.shape_cast %57 : vector<1x1x1x32xf32> to vector<1x32xf32>
    %59 = vector.broadcast %58 : vector<1x32xf32> to vector<32x32xf32>
    %60 = arith.addf %56, %59 : vector<32x32xf32>
    %61 = arith.addf %13, %60 : vector<32x32xf32>
    %c0_36 = arith.constant 0 : index
    %c0_37 = arith.constant 0 : index
    %c0_38 = arith.constant 0 : index
    %c0_39 = arith.constant 0 : index
    %62 = vector.load %arg9[%c0_36, %c0_37, %c0_38, %c0_39] : memref<1x2x1x32xf32, #tpu.memory_space<vmem>>, vector<1x1x1x32xf32>
    %63 = vector.shape_cast %62 : vector<1x1x1x32xf32> to vector<1x32xf32>
    %c0_40 = arith.constant 0 : index
    %c0_41 = arith.constant 0 : index
    %c0_42 = arith.constant 0 : index
    %c0_43 = arith.constant 0 : index
    %64 = vector.load %arg10[%c0_40, %c0_41, %c0_42, %c0_43] : memref<1x2x1x32xf32, #tpu.memory_space<vmem>>, vector<1x1x1x32xf32>
    %65 = vector.shape_cast %64 : vector<1x1x1x32xf32> to vector<1x32xf32>
    %cst_44 = arith.constant dense<0.000000e+00> : vector<32xf32>
    %66 = vector.multi_reduction <add>, %61, %cst_44 [1] : vector<32x32xf32> to vector<32xf32>
    %67 = vector.shape_cast %66 : vector<32xf32> to vector<32x1xf32>
    %cst_45 = arith.constant 3.200000e+01 : f32
    %68 = vector.broadcast %cst_45 : f32 to vector<32x1xf32>
    %69 = arith.divf %67, %68 : vector<32x1xf32>
    %70 = vector.broadcast %69 : vector<32x1xf32> to vector<32x32xf32>
    %71 = arith.subf %61, %70 : vector<32x32xf32>
    %72 = arith.mulf %71, %71 : vector<32x32xf32>
    %cst_46 = arith.constant dense<0.000000e+00> : vector<32xf32>
    %73 = vector.multi_reduction <add>, %72, %cst_46 [1] : vector<32x32xf32> to vector<32xf32>
    %74 = vector.shape_cast %73 : vector<32xf32> to vector<32x1xf32>
    %cst_47 = arith.constant 3.200000e+01 : f32
    %75 = vector.broadcast %cst_47 : f32 to vector<32x1xf32>
    %76 = arith.divf %74, %75 : vector<32x1xf32>
    %77 = vector.broadcast %69 : vector<32x1xf32> to vector<32x32xf32>
    %78 = arith.subf %61, %77 : vector<32x32xf32>
    %cst_48 = arith.constant 9.99999974E-6 : f32
    %79 = vector.broadcast %cst_48 : f32 to vector<32x1xf32>
    %80 = arith.addf %76, %79 : vector<32x1xf32>
    %81 = math.rsqrt %80 : vector<32x1xf32>
    %82 = vector.broadcast %81 : vector<32x1xf32> to vector<32x32xf32>
    %83 = arith.mulf %78, %82 : vector<32x32xf32>
    %84 = vector.broadcast %63 : vector<1x32xf32> to vector<32x32xf32>
    %85 = arith.mulf %83, %84 : vector<32x32xf32>
    %86 = vector.broadcast %65 : vector<1x32xf32> to vector<32x32xf32>
    %87 = arith.addf %85, %86 : vector<32x32xf32>
    %88 = arith.truncf %87 : vector<32x32xf32> to vector<32x32xbf16>
    %cst_49 = arith.constant 0.000000e+00 : f32
    %89 = vector.broadcast %cst_49 : f32 to vector<32x32xf32>
    %c0_50 = arith.constant 0 : index
    %c0_51 = arith.constant 0 : index
    %c0_52 = arith.constant 0 : index
    %c0_53 = arith.constant 0 : index
    %90 = vector.load %arg14[%c0_50, %c0_51, %c0_52, %c0_53] : memref<1x2x1x32xf32, #tpu.memory_space<vmem>>, vector<1x1x1x32xf32>
    %91 = vector.shape_cast %90 : vector<1x1x1x32xf32> to vector<1x32xf32>
    %92 = vector.broadcast %91 : vector<1x32xf32> to vector<32x32xf32>
    %93 = arith.addf %89, %92 : vector<32x32xf32>
    %c0_54 = arith.constant 0 : index
    %c0_55 = arith.constant 0 : index
    %c0_56 = arith.constant 0 : index
    %c0_57 = arith.constant 0 : index
    %94 = vector.load %arg11[%c0_54, %c0_55, %c0_56, %c0_57] : memref<1x2x32x2048xbf16, #tpu.memory_space<vmem>>, vector<1x1x32x512xbf16>
    %95 = vector.shape_cast %94 : vector<1x1x32x512xbf16> to vector<32x512xbf16>
    %cst_58 = arith.constant dense<0.000000e+00> : vector<32x512xf32>
    %96 = tpu.matmul %88, %95, %cst_58 {dimension_numbers = #tpu.dot_dimension_numbers<[1], [0], [0], [1], [0, 0, 1, 1], [], []>} : vector<32x32xbf16>, vector<32x512xbf16>, vector<32x512xf32> -> vector<32x512xf32>
    %c0_59 = arith.constant 0 : index
    %c0_60 = arith.constant 0 : index
    %c0_61 = arith.constant 0 : index
    %c0_62 = arith.constant 0 : index
    %97 = vector.load %arg12[%c0_59, %c0_60, %c0_61, %c0_62] : memref<1x2x1x2048xf32, #tpu.memory_space<vmem>>, vector<1x1x1x512xf32>
    %98 = vector.shape_cast %97 : vector<1x1x1x512xf32> to vector<1x512xf32>
    %99 = vector.broadcast %98 : vector<1x512xf32> to vector<32x512xf32>
    %100 = arith.addf %96, %99 : vector<32x512xf32>
    %cst_63 = arith.constant 0.000000e+00 : f32
    %101 = vector.broadcast %cst_63 : f32 to vector<32x512xf32>
    %102 = arith.maximumf %100, %101 : vector<32x512xf32>
    %103 = arith.truncf %102 : vector<32x512xf32> to vector<32x512xbf16>
    %c0_64 = arith.constant 0 : index
    %c0_65 = arith.constant 0 : index
    %c0_66 = arith.constant 0 : index
    %c0_67 = arith.constant 0 : index
    %104 = vector.load %arg13[%c0_64, %c0_65, %c0_66, %c0_67] : memref<1x2x32x2048xbf16, #tpu.memory_space<vmem>>, vector<1x1x32x512xbf16>
    %105 = vector.shape_cast %104 : vector<1x1x32x512xbf16> to vector<32x512xbf16>
    %cst_68 = arith.constant dense<0.000000e+00> : vector<32x32xf32>
    %106 = tpu.matmul %103, %105, %cst_68 {dimension_numbers = #tpu.dot_dimension_numbers<[1], [1], [0], [0], [0, 0, 1, 0], [], []>} : vector<32x512xbf16>, vector<32x512xbf16>, vector<32x32xf32> -> vector<32x32xf32>
    %107 = arith.addf %93, %106 : vector<32x32xf32>
    %c0_69 = arith.constant 0 : index
    %c0_70 = arith.constant 0 : index
    %c0_71 = arith.constant 0 : index
    %c512 = arith.constant 512 : index
    %108 = vector.load %arg11[%c0_69, %c0_70, %c0_71, %c512] : memref<1x2x32x2048xbf16, #tpu.memory_space<vmem>>, vector<1x1x32x512xbf16>
    %109 = vector.shape_cast %108 : vector<1x1x32x512xbf16> to vector<32x512xbf16>
    %cst_72 = arith.constant dense<0.000000e+00> : vector<32x512xf32>
    %110 = tpu.matmul %88, %109, %cst_72 {dimension_numbers = #tpu.dot_dimension_numbers<[1], [0], [0], [1], [0, 0, 1, 1], [], []>} : vector<32x32xbf16>, vector<32x512xbf16>, vector<32x512xf32> -> vector<32x512xf32>
    %c0_73 = arith.constant 0 : index
    %c0_74 = arith.constant 0 : index
    %c0_75 = arith.constant 0 : index
    %c512_76 = arith.constant 512 : index
    %111 = vector.load %arg12[%c0_73, %c0_74, %c0_75, %c512_76] : memref<1x2x1x2048xf32, #tpu.memory_space<vmem>>, vector<1x1x1x512xf32>
    %112 = vector.shape_cast %111 : vector<1x1x1x512xf32> to vector<1x512xf32>
    %113 = vector.broadcast %112 : vector<1x512xf32> to vector<32x512xf32>
    %114 = arith.addf %110, %113 : vector<32x512xf32>
    %cst_77 = arith.constant 0.000000e+00 : f32
    %115 = vector.broadcast %cst_77 : f32 to vector<32x512xf32>
    %116 = arith.maximumf %114, %115 : vector<32x512xf32>
    %117 = arith.truncf %116 : vector<32x512xf32> to vector<32x512xbf16>
    %c0_78 = arith.constant 0 : index
    %c0_79 = arith.constant 0 : index
    %c0_80 = arith.constant 0 : index
    %c512_81 = arith.constant 512 : index
    %118 = vector.load %arg13[%c0_78, %c0_79, %c0_80, %c512_81] : memref<1x2x32x2048xbf16, #tpu.memory_space<vmem>>, vector<1x1x32x512xbf16>
    %119 = vector.shape_cast %118 : vector<1x1x32x512xbf16> to vector<32x512xbf16>
    %cst_82 = arith.constant dense<0.000000e+00> : vector<32x32xf32>
    %120 = tpu.matmul %117, %119, %cst_82 {dimension_numbers = #tpu.dot_dimension_numbers<[1], [1], [0], [0], [0, 0, 1, 0], [], []>} : vector<32x512xbf16>, vector<32x512xbf16>, vector<32x32xf32> -> vector<32x32xf32>
    %121 = arith.addf %107, %120 : vector<32x32xf32>
    %c0_83 = arith.constant 0 : index
    %c0_84 = arith.constant 0 : index
    %c0_85 = arith.constant 0 : index
    %c1024 = arith.constant 1024 : index
    %122 = vector.load %arg11[%c0_83, %c0_84, %c0_85, %c1024] : memref<1x2x32x2048xbf16, #tpu.memory_space<vmem>>, vector<1x1x32x512xbf16>
    %123 = vector.shape_cast %122 : vector<1x1x32x512xbf16> to vector<32x512xbf16>
    %cst_86 = arith.constant dense<0.000000e+00> : vector<32x512xf32>
    %124 = tpu.matmul %88, %123, %cst_86 {dimension_numbers = #tpu.dot_dimension_numbers<[1], [0], [0], [1], [0, 0, 1, 1], [], []>} : vector<32x32xbf16>, vector<32x512xbf16>, vector<32x512xf32> -> vector<32x512xf32>
    %c0_87 = arith.constant 0 : index
    %c0_88 = arith.constant 0 : index
    %c0_89 = arith.constant 0 : index
    %c1024_90 = arith.constant 1024 : index
    %125 = vector.load %arg12[%c0_87, %c0_88, %c0_89, %c1024_90] : memref<1x2x1x2048xf32, #tpu.memory_space<vmem>>, vector<1x1x1x512xf32>
    %126 = vector.shape_cast %125 : vector<1x1x1x512xf32> to vector<1x512xf32>
    %127 = vector.broadcast %126 : vector<1x512xf32> to vector<32x512xf32>
    %128 = arith.addf %124, %127 : vector<32x512xf32>
    %cst_91 = arith.constant 0.000000e+00 : f32
    %129 = vector.broadcast %cst_91 : f32 to vector<32x512xf32>
    %130 = arith.maximumf %128, %129 : vector<32x512xf32>
    %131 = arith.truncf %130 : vector<32x512xf32> to vector<32x512xbf16>
    %c0_92 = arith.constant 0 : index
    %c0_93 = arith.constant 0 : index
    %c0_94 = arith.constant 0 : index
    %c1024_95 = arith.constant 1024 : index
    %132 = vector.load %arg13[%c0_92, %c0_93, %c0_94, %c1024_95] : memref<1x2x32x2048xbf16, #tpu.memory_space<vmem>>, vector<1x1x32x512xbf16>
    %133 = vector.shape_cast %132 : vector<1x1x32x512xbf16> to vector<32x512xbf16>
    %cst_96 = arith.constant dense<0.000000e+00> : vector<32x32xf32>
    %134 = tpu.matmul %131, %133, %cst_96 {dimension_numbers = #tpu.dot_dimension_numbers<[1], [1], [0], [0], [0, 0, 1, 0], [], []>} : vector<32x512xbf16>, vector<32x512xbf16>, vector<32x32xf32> -> vector<32x32xf32>
    %135 = arith.addf %121, %134 : vector<32x32xf32>
    %c0_97 = arith.constant 0 : index
    %c0_98 = arith.constant 0 : index
    %c0_99 = arith.constant 0 : index
    %c1536 = arith.constant 1536 : index
    %136 = vector.load %arg11[%c0_97, %c0_98, %c0_99, %c1536] : memref<1x2x32x2048xbf16, #tpu.memory_space<vmem>>, vector<1x1x32x512xbf16>
    %137 = vector.shape_cast %136 : vector<1x1x32x512xbf16> to vector<32x512xbf16>
    %cst_100 = arith.constant dense<0.000000e+00> : vector<32x512xf32>
    %138 = tpu.matmul %88, %137, %cst_100 {dimension_numbers = #tpu.dot_dimension_numbers<[1], [0], [0], [1], [0, 0, 1, 1], [], []>} : vector<32x32xbf16>, vector<32x512xbf16>, vector<32x512xf32> -> vector<32x512xf32>
    %c0_101 = arith.constant 0 : index
    %c0_102 = arith.constant 0 : index
    %c0_103 = arith.constant 0 : index
    %c1536_104 = arith.constant 1536 : index
    %139 = vector.load %arg12[%c0_101, %c0_102, %c0_103, %c1536_104] : memref<1x2x1x2048xf32, #tpu.memory_space<vmem>>, vector<1x1x1x512xf32>
    %140 = vector.shape_cast %139 : vector<1x1x1x512xf32> to vector<1x512xf32>
    %141 = vector.broadcast %140 : vector<1x512xf32> to vector<32x512xf32>
    %142 = arith.addf %138, %141 : vector<32x512xf32>
    %cst_105 = arith.constant 0.000000e+00 : f32
    %143 = vector.broadcast %cst_105 : f32 to vector<32x512xf32>
    %144 = arith.maximumf %142, %143 : vector<32x512xf32>
    %145 = arith.truncf %144 : vector<32x512xf32> to vector<32x512xbf16>
    %c0_106 = arith.constant 0 : index
    %c0_107 = arith.constant 0 : index
    %c0_108 = arith.constant 0 : index
    %c1536_109 = arith.constant 1536 : index
    %146 = vector.load %arg13[%c0_106, %c0_107, %c0_108, %c1536_109] : memref<1x2x32x2048xbf16, #tpu.memory_space<vmem>>, vector<1x1x32x512xbf16>
    %147 = vector.shape_cast %146 : vector<1x1x32x512xbf16> to vector<32x512xbf16>
    %cst_110 = arith.constant dense<0.000000e+00> : vector<32x32xf32>
    %148 = tpu.matmul %145, %147, %cst_110 {dimension_numbers = #tpu.dot_dimension_numbers<[1], [1], [0], [0], [0, 0, 1, 0], [], []>} : vector<32x512xbf16>, vector<32x512xbf16>, vector<32x32xf32> -> vector<32x32xf32>
    %149 = arith.addf %135, %148 : vector<32x32xf32>
    %150 = arith.addf %87, %149 : vector<32x32xf32>
    %c0_111 = arith.constant 0 : index
    %c0_112 = arith.constant 0 : index
    %c0_113 = arith.constant 0 : index
    %c0_114 = arith.constant 0 : index
    %151 = vector.load %arg15[%c0_111, %c0_112, %c0_113, %c0_114] : memref<1x2x1x32xf32, #tpu.memory_space<vmem>>, vector<1x1x1x32xf32>
    %152 = vector.shape_cast %151 : vector<1x1x1x32xf32> to vector<1x32xf32>
    %c0_115 = arith.constant 0 : index
    %c0_116 = arith.constant 0 : index
    %c0_117 = arith.constant 0 : index
    %c0_118 = arith.constant 0 : index
    %153 = vector.load %arg16[%c0_115, %c0_116, %c0_117, %c0_118] : memref<1x2x1x32xf32, #tpu.memory_space<vmem>>, vector<1x1x1x32xf32>
    %154 = vector.shape_cast %153 : vector<1x1x1x32xf32> to vector<1x32xf32>
    %cst_119 = arith.constant dense<0.000000e+00> : vector<32xf32>
    %155 = vector.multi_reduction <add>, %150, %cst_119 [1] : vector<32x32xf32> to vector<32xf32>
    %156 = vector.shape_cast %155 : vector<32xf32> to vector<32x1xf32>
    %cst_120 = arith.constant 3.200000e+01 : f32
    %157 = vector.broadcast %cst_120 : f32 to vector<32x1xf32>
    %158 = arith.divf %156, %157 : vector<32x1xf32>
    %159 = vector.broadcast %158 : vector<32x1xf32> to vector<32x32xf32>
    %160 = arith.subf %150, %159 : vector<32x32xf32>
    %161 = arith.mulf %160, %160 : vector<32x32xf32>
    %cst_121 = arith.constant dense<0.000000e+00> : vector<32xf32>
    %162 = vector.multi_reduction <add>, %161, %cst_121 [1] : vector<32x32xf32> to vector<32xf32>
    %163 = vector.shape_cast %162 : vector<32xf32> to vector<32x1xf32>
    %cst_122 = arith.constant 3.200000e+01 : f32
    %164 = vector.broadcast %cst_122 : f32 to vector<32x1xf32>
    %165 = arith.divf %163, %164 : vector<32x1xf32>
    %166 = vector.broadcast %158 : vector<32x1xf32> to vector<32x32xf32>
    %167 = arith.subf %150, %166 : vector<32x32xf32>
    %cst_123 = arith.constant 9.99999974E-6 : f32
    %168 = vector.broadcast %cst_123 : f32 to vector<32x1xf32>
    %169 = arith.addf %165, %168 : vector<32x1xf32>
    %170 = math.rsqrt %169 : vector<32x1xf32>
    %171 = vector.broadcast %170 : vector<32x1xf32> to vector<32x32xf32>
    %172 = arith.mulf %167, %171 : vector<32x32xf32>
    %173 = vector.broadcast %152 : vector<1x32xf32> to vector<32x32xf32>
    %174 = arith.mulf %172, %173 : vector<32x32xf32>
    %175 = vector.broadcast %154 : vector<1x32xf32> to vector<32x32xf32>
    %176 = arith.addf %174, %175 : vector<32x32xf32>
    %177 = arith.truncf %176 : vector<32x32xf32> to vector<32x32xbf16>
    %c0_124 = arith.constant 0 : index
    %c1 = arith.constant 1 : index
    %c0_125 = arith.constant 0 : index
    %c0_126 = arith.constant 0 : index
    %178 = vector.load %arg5[%c0_124, %c1, %c0_125, %c0_126] : memref<1x2x32x96xbf16, #tpu.memory_space<vmem>>, vector<1x1x32x96xbf16>
    %179 = vector.shape_cast %178 : vector<1x1x32x96xbf16> to vector<32x96xbf16>
    %cst_127 = arith.constant dense<0.000000e+00> : vector<32x96xf32>
    %180 = tpu.matmul %177, %179, %cst_127 {dimension_numbers = #tpu.dot_dimension_numbers<[1], [0], [0], [1], [0, 0, 1, 1], [], []>} : vector<32x32xbf16>, vector<32x96xbf16>, vector<32x96xf32> -> vector<32x96xf32>
    %c0_128 = arith.constant 0 : index
    %c1_129 = arith.constant 1 : index
    %c0_130 = arith.constant 0 : index
    %c0_131 = arith.constant 0 : index
    %181 = vector.load %arg6[%c0_128, %c1_129, %c0_130, %c0_131] : memref<1x2x1x96xf32, #tpu.memory_space<vmem>>, vector<1x1x1x96xf32>
    %182 = vector.shape_cast %181 : vector<1x1x1x96xf32> to vector<1x96xf32>
    %183 = vector.broadcast %182 : vector<1x96xf32> to vector<32x96xf32>
    %184 = arith.addf %180, %183 : vector<32x96xf32>
    %185 = vector.extract_strided_slice %184 {offsets = [0, 0], sizes = [32, 32], strides = [1, 1]} : vector<32x96xf32> to vector<32x32xf32>
    %cst_132 = arith.constant 5.000000e-01 : f32
    %186 = vector.broadcast %cst_132 : f32 to vector<32x32xf32>
    %187 = arith.mulf %185, %186 : vector<32x32xf32>
    %188 = vector.shape_cast %187 : vector<32x32xf32> to vector<2x2x8x32xf32>
    %189 = vector.extract_strided_slice %184 {offsets = [0, 32], sizes = [32, 32], strides = [1, 1]} : vector<32x96xf32> to vector<32x32xf32>
    %190 = vector.shape_cast %189 : vector<32x32xf32> to vector<2x2x8x32xf32>
    %191 = vector.extract_strided_slice %184 {offsets = [0, 64], sizes = [32, 32], strides = [1, 1]} : vector<32x96xf32> to vector<32x32xf32>
    %192 = vector.shape_cast %191 : vector<32x32xf32> to vector<2x2x8x32xf32>
    %193 = vector.shape_cast %188 : vector<2x2x8x32xf32> to vector<2x2x1x8x32xf32>
    %194 = vector.shape_cast %190 : vector<2x2x8x32xf32> to vector<2x1x2x8x32xf32>
    %195 = vector.broadcast %193 : vector<2x2x1x8x32xf32> to vector<2x2x2x8x32xf32>
    %196 = vector.broadcast %194 : vector<2x1x2x8x32xf32> to vector<2x2x2x8x32xf32>
    %197 = arith.mulf %195, %196 : vector<2x2x2x8x32xf32>
    %198 = vector.shape_cast %197 : vector<2x2x2x8x32xf32> to vector<64x32xf32>
    %cst_133 = arith.constant dense<0.000000e+00> : vector<64x32xf32>
    %199 = tpu.matmul %198, %2, %cst_133 {dimension_numbers = #tpu.dot_dimension_numbers<[1], [0], [0], [1], [0, 0, 1, 1], [], []>} : vector<64x32xf32>, vector<32x32xf32>, vector<64x32xf32> -> vector<64x32xf32>
    %200 = vector.shape_cast %199 : vector<64x32xf32> to vector<2x2x2x8x32xf32>
    %cst_134 = arith.constant dense<0xFF800000> : vector<2x2x8x32xf32>
    %201 = vector.multi_reduction <maximumf>, %200, %cst_134 [2] : vector<2x2x2x8x32xf32> to vector<2x2x8x32xf32>
    %202 = vector.shape_cast %201 : vector<2x2x8x32xf32> to vector<2x2x1x8x32xf32>
    %203 = vector.broadcast %202 : vector<2x2x1x8x32xf32> to vector<2x2x2x8x32xf32>
    %204 = arith.subf %200, %203 : vector<2x2x2x8x32xf32>
    %205 = math.exp %204 : vector<2x2x2x8x32xf32>
    %cst_135 = arith.constant dense<0.000000e+00> : vector<2x2x8x32xf32>
    %206 = vector.multi_reduction <add>, %205, %cst_135 [2] : vector<2x2x2x8x32xf32> to vector<2x2x8x32xf32>
    %207 = vector.shape_cast %206 : vector<2x2x8x32xf32> to vector<2x2x1x8x32xf32>
    %208 = tpu.reciprocal %207 {approx = true} : vector<2x2x1x8x32xf32> -> vector<2x2x1x8x32xf32>
    %209 = vector.broadcast %208 : vector<2x2x1x8x32xf32> to vector<2x2x2x8x32xf32>
    %210 = arith.mulf %205, %209 : vector<2x2x2x8x32xf32>
    %211 = vector.shape_cast %192 : vector<2x2x8x32xf32> to vector<2x1x2x8x32xf32>
    %212 = vector.broadcast %211 : vector<2x1x2x8x32xf32> to vector<2x2x2x8x32xf32>
    %213 = arith.mulf %210, %212 : vector<2x2x2x8x32xf32>
    %cst_136 = arith.constant dense<0.000000e+00> : vector<2x2x8x32xf32>
    %214 = vector.multi_reduction <add>, %213, %cst_136 [2] : vector<2x2x2x8x32xf32> to vector<2x2x8x32xf32>
    %215 = vector.shape_cast %214 : vector<2x2x8x32xf32> to vector<32x32xf32>
    %216 = arith.truncf %215 : vector<32x32xf32> to vector<32x32xbf16>
    %c0_137 = arith.constant 0 : index
    %c1_138 = arith.constant 1 : index
    %c0_139 = arith.constant 0 : index
    %c0_140 = arith.constant 0 : index
    %217 = vector.load %arg7[%c0_137, %c1_138, %c0_139, %c0_140] : memref<1x2x32x32xbf16, #tpu.memory_space<vmem>>, vector<1x1x32x32xbf16>
    %218 = vector.shape_cast %217 : vector<1x1x32x32xbf16> to vector<32x32xbf16>
    %cst_141 = arith.constant dense<0.000000e+00> : vector<32x32xf32>
    %219 = tpu.matmul %216, %218, %cst_141 {dimension_numbers = #tpu.dot_dimension_numbers<[1], [0], [0], [1], [0, 0, 1, 1], [], []>} : vector<32x32xbf16>, vector<32x32xbf16>, vector<32x32xf32> -> vector<32x32xf32>
    %c0_142 = arith.constant 0 : index
    %c1_143 = arith.constant 1 : index
    %c0_144 = arith.constant 0 : index
    %c0_145 = arith.constant 0 : index
    %220 = vector.load %arg8[%c0_142, %c1_143, %c0_144, %c0_145] : memref<1x2x1x32xf32, #tpu.memory_space<vmem>>, vector<1x1x1x32xf32>
    %221 = vector.shape_cast %220 : vector<1x1x1x32xf32> to vector<1x32xf32>
    %222 = vector.broadcast %221 : vector<1x32xf32> to vector<32x32xf32>
    %223 = arith.addf %219, %222 : vector<32x32xf32>
    %224 = arith.addf %176, %223 : vector<32x32xf32>
    %c0_146 = arith.constant 0 : index
    %c1_147 = arith.constant 1 : index
    %c0_148 = arith.constant 0 : index
    %c0_149 = arith.constant 0 : index
    %225 = vector.load %arg9[%c0_146, %c1_147, %c0_148, %c0_149] : memref<1x2x1x32xf32, #tpu.memory_space<vmem>>, vector<1x1x1x32xf32>
    %226 = vector.shape_cast %225 : vector<1x1x1x32xf32> to vector<1x32xf32>
    %c0_150 = arith.constant 0 : index
    %c1_151 = arith.constant 1 : index
    %c0_152 = arith.constant 0 : index
    %c0_153 = arith.constant 0 : index
    %227 = vector.load %arg10[%c0_150, %c1_151, %c0_152, %c0_153] : memref<1x2x1x32xf32, #tpu.memory_space<vmem>>, vector<1x1x1x32xf32>
    %228 = vector.shape_cast %227 : vector<1x1x1x32xf32> to vector<1x32xf32>
    %cst_154 = arith.constant dense<0.000000e+00> : vector<32xf32>
    %229 = vector.multi_reduction <add>, %224, %cst_154 [1] : vector<32x32xf32> to vector<32xf32>
    %230 = vector.shape_cast %229 : vector<32xf32> to vector<32x1xf32>
    %cst_155 = arith.constant 3.200000e+01 : f32
    %231 = vector.broadcast %cst_155 : f32 to vector<32x1xf32>
    %232 = arith.divf %230, %231 : vector<32x1xf32>
    %233 = vector.broadcast %232 : vector<32x1xf32> to vector<32x32xf32>
    %234 = arith.subf %224, %233 : vector<32x32xf32>
    %235 = arith.mulf %234, %234 : vector<32x32xf32>
    %cst_156 = arith.constant dense<0.000000e+00> : vector<32xf32>
    %236 = vector.multi_reduction <add>, %235, %cst_156 [1] : vector<32x32xf32> to vector<32xf32>
    %237 = vector.shape_cast %236 : vector<32xf32> to vector<32x1xf32>
    %cst_157 = arith.constant 3.200000e+01 : f32
    %238 = vector.broadcast %cst_157 : f32 to vector<32x1xf32>
    %239 = arith.divf %237, %238 : vector<32x1xf32>
    %240 = vector.broadcast %232 : vector<32x1xf32> to vector<32x32xf32>
    %241 = arith.subf %224, %240 : vector<32x32xf32>
    %cst_158 = arith.constant 9.99999974E-6 : f32
    %242 = vector.broadcast %cst_158 : f32 to vector<32x1xf32>
    %243 = arith.addf %239, %242 : vector<32x1xf32>
    %244 = math.rsqrt %243 : vector<32x1xf32>
    %245 = vector.broadcast %244 : vector<32x1xf32> to vector<32x32xf32>
    %246 = arith.mulf %241, %245 : vector<32x32xf32>
    %247 = vector.broadcast %226 : vector<1x32xf32> to vector<32x32xf32>
    %248 = arith.mulf %246, %247 : vector<32x32xf32>
    %249 = vector.broadcast %228 : vector<1x32xf32> to vector<32x32xf32>
    %250 = arith.addf %248, %249 : vector<32x32xf32>
    %251 = arith.truncf %250 : vector<32x32xf32> to vector<32x32xbf16>
    %cst_159 = arith.constant 0.000000e+00 : f32
    %252 = vector.broadcast %cst_159 : f32 to vector<32x32xf32>
    %c0_160 = arith.constant 0 : index
    %c1_161 = arith.constant 1 : index
    %c0_162 = arith.constant 0 : index
    %c0_163 = arith.constant 0 : index
    %253 = vector.load %arg14[%c0_160, %c1_161, %c0_162, %c0_163] : memref<1x2x1x32xf32, #tpu.memory_space<vmem>>, vector<1x1x1x32xf32>
    %254 = vector.shape_cast %253 : vector<1x1x1x32xf32> to vector<1x32xf32>
    %255 = vector.broadcast %254 : vector<1x32xf32> to vector<32x32xf32>
    %256 = arith.addf %252, %255 : vector<32x32xf32>
    %c0_164 = arith.constant 0 : index
    %c1_165 = arith.constant 1 : index
    %c0_166 = arith.constant 0 : index
    %c0_167 = arith.constant 0 : index
    %257 = vector.load %arg11[%c0_164, %c1_165, %c0_166, %c0_167] : memref<1x2x32x2048xbf16, #tpu.memory_space<vmem>>, vector<1x1x32x512xbf16>
    %258 = vector.shape_cast %257 : vector<1x1x32x512xbf16> to vector<32x512xbf16>
    %cst_168 = arith.constant dense<0.000000e+00> : vector<32x512xf32>
    %259 = tpu.matmul %251, %258, %cst_168 {dimension_numbers = #tpu.dot_dimension_numbers<[1], [0], [0], [1], [0, 0, 1, 1], [], []>} : vector<32x32xbf16>, vector<32x512xbf16>, vector<32x512xf32> -> vector<32x512xf32>
    %c0_169 = arith.constant 0 : index
    %c1_170 = arith.constant 1 : index
    %c0_171 = arith.constant 0 : index
    %c0_172 = arith.constant 0 : index
    %260 = vector.load %arg12[%c0_169, %c1_170, %c0_171, %c0_172] : memref<1x2x1x2048xf32, #tpu.memory_space<vmem>>, vector<1x1x1x512xf32>
    %261 = vector.shape_cast %260 : vector<1x1x1x512xf32> to vector<1x512xf32>
    %262 = vector.broadcast %261 : vector<1x512xf32> to vector<32x512xf32>
    %263 = arith.addf %259, %262 : vector<32x512xf32>
    %cst_173 = arith.constant 0.000000e+00 : f32
    %264 = vector.broadcast %cst_173 : f32 to vector<32x512xf32>
    %265 = arith.maximumf %263, %264 : vector<32x512xf32>
    %266 = arith.truncf %265 : vector<32x512xf32> to vector<32x512xbf16>
    %c0_174 = arith.constant 0 : index
    %c1_175 = arith.constant 1 : index
    %c0_176 = arith.constant 0 : index
    %c0_177 = arith.constant 0 : index
    %267 = vector.load %arg13[%c0_174, %c1_175, %c0_176, %c0_177] : memref<1x2x32x2048xbf16, #tpu.memory_space<vmem>>, vector<1x1x32x512xbf16>
    %268 = vector.shape_cast %267 : vector<1x1x32x512xbf16> to vector<32x512xbf16>
    %cst_178 = arith.constant dense<0.000000e+00> : vector<32x32xf32>
    %269 = tpu.matmul %266, %268, %cst_178 {dimension_numbers = #tpu.dot_dimension_numbers<[1], [1], [0], [0], [0, 0, 1, 0], [], []>} : vector<32x512xbf16>, vector<32x512xbf16>, vector<32x32xf32> -> vector<32x32xf32>
    %270 = arith.addf %256, %269 : vector<32x32xf32>
    %c0_179 = arith.constant 0 : index
    %c1_180 = arith.constant 1 : index
    %c0_181 = arith.constant 0 : index
    %c512_182 = arith.constant 512 : index
    %271 = vector.load %arg11[%c0_179, %c1_180, %c0_181, %c512_182] : memref<1x2x32x2048xbf16, #tpu.memory_space<vmem>>, vector<1x1x32x512xbf16>
    %272 = vector.shape_cast %271 : vector<1x1x32x512xbf16> to vector<32x512xbf16>
    %cst_183 = arith.constant dense<0.000000e+00> : vector<32x512xf32>
    %273 = tpu.matmul %251, %272, %cst_183 {dimension_numbers = #tpu.dot_dimension_numbers<[1], [0], [0], [1], [0, 0, 1, 1], [], []>} : vector<32x32xbf16>, vector<32x512xbf16>, vector<32x512xf32> -> vector<32x512xf32>
    %c0_184 = arith.constant 0 : index
    %c1_185 = arith.constant 1 : index
    %c0_186 = arith.constant 0 : index
    %c512_187 = arith.constant 512 : index
    %274 = vector.load %arg12[%c0_184, %c1_185, %c0_186, %c512_187] : memref<1x2x1x2048xf32, #tpu.memory_space<vmem>>, vector<1x1x1x512xf32>
    %275 = vector.shape_cast %274 : vector<1x1x1x512xf32> to vector<1x512xf32>
    %276 = vector.broadcast %275 : vector<1x512xf32> to vector<32x512xf32>
    %277 = arith.addf %273, %276 : vector<32x512xf32>
    %cst_188 = arith.constant 0.000000e+00 : f32
    %278 = vector.broadcast %cst_188 : f32 to vector<32x512xf32>
    %279 = arith.maximumf %277, %278 : vector<32x512xf32>
    %280 = arith.truncf %279 : vector<32x512xf32> to vector<32x512xbf16>
    %c0_189 = arith.constant 0 : index
    %c1_190 = arith.constant 1 : index
    %c0_191 = arith.constant 0 : index
    %c512_192 = arith.constant 512 : index
    %281 = vector.load %arg13[%c0_189, %c1_190, %c0_191, %c512_192] : memref<1x2x32x2048xbf16, #tpu.memory_space<vmem>>, vector<1x1x32x512xbf16>
    %282 = vector.shape_cast %281 : vector<1x1x32x512xbf16> to vector<32x512xbf16>
    %cst_193 = arith.constant dense<0.000000e+00> : vector<32x32xf32>
    %283 = tpu.matmul %280, %282, %cst_193 {dimension_numbers = #tpu.dot_dimension_numbers<[1], [1], [0], [0], [0, 0, 1, 0], [], []>} : vector<32x512xbf16>, vector<32x512xbf16>, vector<32x32xf32> -> vector<32x32xf32>
    %284 = arith.addf %270, %283 : vector<32x32xf32>
    %c0_194 = arith.constant 0 : index
    %c1_195 = arith.constant 1 : index
    %c0_196 = arith.constant 0 : index
    %c1024_197 = arith.constant 1024 : index
    %285 = vector.load %arg11[%c0_194, %c1_195, %c0_196, %c1024_197] : memref<1x2x32x2048xbf16, #tpu.memory_space<vmem>>, vector<1x1x32x512xbf16>
    %286 = vector.shape_cast %285 : vector<1x1x32x512xbf16> to vector<32x512xbf16>
    %cst_198 = arith.constant dense<0.000000e+00> : vector<32x512xf32>
    %287 = tpu.matmul %251, %286, %cst_198 {dimension_numbers = #tpu.dot_dimension_numbers<[1], [0], [0], [1], [0, 0, 1, 1], [], []>} : vector<32x32xbf16>, vector<32x512xbf16>, vector<32x512xf32> -> vector<32x512xf32>
    %c0_199 = arith.constant 0 : index
    %c1_200 = arith.constant 1 : index
    %c0_201 = arith.constant 0 : index
    %c1024_202 = arith.constant 1024 : index
    %288 = vector.load %arg12[%c0_199, %c1_200, %c0_201, %c1024_202] : memref<1x2x1x2048xf32, #tpu.memory_space<vmem>>, vector<1x1x1x512xf32>
    %289 = vector.shape_cast %288 : vector<1x1x1x512xf32> to vector<1x512xf32>
    %290 = vector.broadcast %289 : vector<1x512xf32> to vector<32x512xf32>
    %291 = arith.addf %287, %290 : vector<32x512xf32>
    %cst_203 = arith.constant 0.000000e+00 : f32
    %292 = vector.broadcast %cst_203 : f32 to vector<32x512xf32>
    %293 = arith.maximumf %291, %292 : vector<32x512xf32>
    %294 = arith.truncf %293 : vector<32x512xf32> to vector<32x512xbf16>
    %c0_204 = arith.constant 0 : index
    %c1_205 = arith.constant 1 : index
    %c0_206 = arith.constant 0 : index
    %c1024_207 = arith.constant 1024 : index
    %295 = vector.load %arg13[%c0_204, %c1_205, %c0_206, %c1024_207] : memref<1x2x32x2048xbf16, #tpu.memory_space<vmem>>, vector<1x1x32x512xbf16>
    %296 = vector.shape_cast %295 : vector<1x1x32x512xbf16> to vector<32x512xbf16>
    %cst_208 = arith.constant dense<0.000000e+00> : vector<32x32xf32>
    %297 = tpu.matmul %294, %296, %cst_208 {dimension_numbers = #tpu.dot_dimension_numbers<[1], [1], [0], [0], [0, 0, 1, 0], [], []>} : vector<32x512xbf16>, vector<32x512xbf16>, vector<32x32xf32> -> vector<32x32xf32>
    %298 = arith.addf %284, %297 : vector<32x32xf32>
    %c0_209 = arith.constant 0 : index
    %c1_210 = arith.constant 1 : index
    %c0_211 = arith.constant 0 : index
    %c1536_212 = arith.constant 1536 : index
    %299 = vector.load %arg11[%c0_209, %c1_210, %c0_211, %c1536_212] : memref<1x2x32x2048xbf16, #tpu.memory_space<vmem>>, vector<1x1x32x512xbf16>
    %300 = vector.shape_cast %299 : vector<1x1x32x512xbf16> to vector<32x512xbf16>
    %cst_213 = arith.constant dense<0.000000e+00> : vector<32x512xf32>
    %301 = tpu.matmul %251, %300, %cst_213 {dimension_numbers = #tpu.dot_dimension_numbers<[1], [0], [0], [1], [0, 0, 1, 1], [], []>} : vector<32x32xbf16>, vector<32x512xbf16>, vector<32x512xf32> -> vector<32x512xf32>
    %c0_214 = arith.constant 0 : index
    %c1_215 = arith.constant 1 : index
    %c0_216 = arith.constant 0 : index
    %c1536_217 = arith.constant 1536 : index
    %302 = vector.load %arg12[%c0_214, %c1_215, %c0_216, %c1536_217] : memref<1x2x1x2048xf32, #tpu.memory_space<vmem>>, vector<1x1x1x512xf32>
    %303 = vector.shape_cast %302 : vector<1x1x1x512xf32> to vector<1x512xf32>
    %304 = vector.broadcast %303 : vector<1x512xf32> to vector<32x512xf32>
    %305 = arith.addf %301, %304 : vector<32x512xf32>
    %cst_218 = arith.constant 0.000000e+00 : f32
    %306 = vector.broadcast %cst_218 : f32 to vector<32x512xf32>
    %307 = arith.maximumf %305, %306 : vector<32x512xf32>
    %308 = arith.truncf %307 : vector<32x512xf32> to vector<32x512xbf16>
    %c0_219 = arith.constant 0 : index
    %c1_220 = arith.constant 1 : index
    %c0_221 = arith.constant 0 : index
    %c1536_222 = arith.constant 1536 : index
    %309 = vector.load %arg13[%c0_219, %c1_220, %c0_221, %c1536_222] : memref<1x2x32x2048xbf16, #tpu.memory_space<vmem>>, vector<1x1x32x512xbf16>
    %310 = vector.shape_cast %309 : vector<1x1x32x512xbf16> to vector<32x512xbf16>
    %cst_223 = arith.constant dense<0.000000e+00> : vector<32x32xf32>
    %311 = tpu.matmul %308, %310, %cst_223 {dimension_numbers = #tpu.dot_dimension_numbers<[1], [1], [0], [0], [0, 0, 1, 0], [], []>} : vector<32x512xbf16>, vector<32x512xbf16>, vector<32x32xf32> -> vector<32x32xf32>
    %312 = arith.addf %298, %311 : vector<32x32xf32>
    %313 = arith.addf %250, %312 : vector<32x32xf32>
    %c0_224 = arith.constant 0 : index
    %c1_225 = arith.constant 1 : index
    %c0_226 = arith.constant 0 : index
    %c0_227 = arith.constant 0 : index
    %314 = vector.load %arg15[%c0_224, %c1_225, %c0_226, %c0_227] : memref<1x2x1x32xf32, #tpu.memory_space<vmem>>, vector<1x1x1x32xf32>
    %315 = vector.shape_cast %314 : vector<1x1x1x32xf32> to vector<1x32xf32>
    %c0_228 = arith.constant 0 : index
    %c1_229 = arith.constant 1 : index
    %c0_230 = arith.constant 0 : index
    %c0_231 = arith.constant 0 : index
    %316 = vector.load %arg16[%c0_228, %c1_229, %c0_230, %c0_231] : memref<1x2x1x32xf32, #tpu.memory_space<vmem>>, vector<1x1x1x32xf32>
    %317 = vector.shape_cast %316 : vector<1x1x1x32xf32> to vector<1x32xf32>
    %cst_232 = arith.constant dense<0.000000e+00> : vector<32xf32>
    %318 = vector.multi_reduction <add>, %313, %cst_232 [1] : vector<32x32xf32> to vector<32xf32>
    %319 = vector.shape_cast %318 : vector<32xf32> to vector<32x1xf32>
    %cst_233 = arith.constant 3.200000e+01 : f32
    %320 = vector.broadcast %cst_233 : f32 to vector<32x1xf32>
    %321 = arith.divf %319, %320 : vector<32x1xf32>
    %322 = vector.broadcast %321 : vector<32x1xf32> to vector<32x32xf32>
    %323 = arith.subf %313, %322 : vector<32x32xf32>
    %324 = arith.mulf %323, %323 : vector<32x32xf32>
    %cst_234 = arith.constant dense<0.000000e+00> : vector<32xf32>
    %325 = vector.multi_reduction <add>, %324, %cst_234 [1] : vector<32x32xf32> to vector<32xf32>
    %326 = vector.shape_cast %325 : vector<32xf32> to vector<32x1xf32>
    %cst_235 = arith.constant 3.200000e+01 : f32
    %327 = vector.broadcast %cst_235 : f32 to vector<32x1xf32>
    %328 = arith.divf %326, %327 : vector<32x1xf32>
    %329 = vector.broadcast %321 : vector<32x1xf32> to vector<32x32xf32>
    %330 = arith.subf %313, %329 : vector<32x32xf32>
    %cst_236 = arith.constant 9.99999974E-6 : f32
    %331 = vector.broadcast %cst_236 : f32 to vector<32x1xf32>
    %332 = arith.addf %328, %331 : vector<32x1xf32>
    %333 = math.rsqrt %332 : vector<32x1xf32>
    %334 = vector.broadcast %333 : vector<32x1xf32> to vector<32x32xf32>
    %335 = arith.mulf %330, %334 : vector<32x32xf32>
    %336 = vector.broadcast %315 : vector<1x32xf32> to vector<32x32xf32>
    %337 = arith.mulf %335, %336 : vector<32x32xf32>
    %338 = vector.broadcast %317 : vector<1x32xf32> to vector<32x32xf32>
    %339 = arith.addf %337, %338 : vector<32x32xf32>
    %340 = vector.shape_cast %339 : vector<32x32xf32> to vector<2x2x8x32xf32>
    %341 = vector.extract_strided_slice %340 {offsets = [0, 0, 0, 0], sizes = [2, 2, 1, 32], strides = [1, 1, 1, 1]} : vector<2x2x8x32xf32> to vector<2x2x1x32xf32>
    %342 = vector.shape_cast %341 : vector<2x2x1x32xf32> to vector<2x2x32xf32>
    %343 = vector.shape_cast %342 : vector<2x2x32xf32> to vector<4x32xf32>
    %344 = arith.truncf %343 : vector<4x32xf32> to vector<4x32xbf16>
    %c0_237 = arith.constant 0 : index
    %c0_238 = arith.constant 0 : index
    %c0_239 = arith.constant 0 : index
    %345 = vector.load %arg17[%c0_237, %c0_238, %c0_239] : memref<1x32x32xbf16, #tpu.memory_space<vmem>>, vector<1x32x32xbf16>
    %346 = vector.shape_cast %345 : vector<1x32x32xbf16> to vector<32x32xbf16>
    %cst_240 = arith.constant dense<0.000000e+00> : vector<4x32xf32>
    %347 = tpu.matmul %344, %346, %cst_240 {dimension_numbers = #tpu.dot_dimension_numbers<[1], [0], [0], [1], [0, 0, 1, 1], [], []>} : vector<4x32xbf16>, vector<32x32xbf16>, vector<4x32xf32> -> vector<4x32xf32>
    %c0_241 = arith.constant 0 : index
    %c0_242 = arith.constant 0 : index
    %c0_243 = arith.constant 0 : index
    %348 = vector.load %arg18[%c0_241, %c0_242, %c0_243] : memref<1x1x32xf32, #tpu.memory_space<vmem>>, vector<1x1x32xf32>
    %349 = vector.shape_cast %348 : vector<1x1x32xf32> to vector<1x32xf32>
    %350 = vector.broadcast %349 : vector<1x32xf32> to vector<4x32xf32>
    %351 = arith.addf %347, %350 : vector<4x32xf32>
    %352 = math.tanh %351 : vector<4x32xf32>
    %353 = vector.shape_cast %352 : vector<4x32xf32> to vector<2x2x32xf32>
    %c0_244 = arith.constant 0 : index
    %c0_245 = arith.constant 0 : index
    %c0_246 = arith.constant 0 : index
    %c0_247 = arith.constant 0 : index
    %354 = vector.load %arg19[%c0_244, %c0_245, %c0_246, %c0_247] : memref<1x2x2x32xf32, #tpu.memory_space<vmem>>, vector<1x2x2x32xf32>
    %355 = vector.shape_cast %354 : vector<1x2x2x32xf32> to vector<2x2x32xf32>
    %356 = vector.shape_cast %353 : vector<2x2x32xf32> to vector<1x2x2x32xf32>
    tpu.vector_store %arg19[%c0_244, %c0_245, %c0_246, %c0_247], %356 {strides = array<i32>} : memref<1x2x2x32xf32, #tpu.memory_space<vmem>>, vector<1x2x2x32xf32>,
    return
  }
  func.func @transform_0(%arg0: i32) -> (i32, i32, i32, i32, i32) {
    %c0_i32 = arith.constant 0 : i32
    %c0_i32_0 = arith.constant 0 : i32
    %c0_i32_1 = arith.constant 0 : i32
    %c0_i32_2 = arith.constant 0 : i32
    %c0_i32_3 = arith.constant 0 : i32
    return %arg0, %c0_i32, %c0_i32_0, %c0_i32_1, %c0_i32_2 : i32, i32, i32, i32, i32
  }
  func.func @transform_1(%arg0: i32) -> (i32, i32, i32, i32) {
    %c0_i32 = arith.constant 0 : i32
    %c0_i32_0 = arith.constant 0 : i32
    %c0_i32_1 = arith.constant 0 : i32
    %c0_i32_2 = arith.constant 0 : i32
    return %arg0, %c0_i32, %c0_i32_0, %c0_i32_1 : i32, i32, i32, i32
  }
  func.func @transform_2(%arg0: i32) -> (i32, i32, i32, i32) {
    %c0_i32 = arith.constant 0 : i32
    %c0_i32_0 = arith.constant 0 : i32
    %c0_i32_1 = arith.constant 0 : i32
    %c0_i32_2 = arith.constant 0 : i32
    return %arg0, %c0_i32, %c0_i32_0, %c0_i32_1 : i32, i32, i32, i32
  }
  func.func @transform_3(%arg0: i32) -> (i32, i32) {
    %c0_i32 = arith.constant 0 : i32
    %c0_i32_0 = arith.constant 0 : i32
    %c0_i32_1 = arith.constant 0 : i32
    return %c0_i32, %c0_i32_0 : i32, i32
  }
  func.func @transform_4(%arg0: i32) -> (i32, i32, i32, i32) {
    %c0_i32 = arith.constant 0 : i32
    %c0_i32_0 = arith.constant 0 : i32
    %c0_i32_1 = arith.constant 0 : i32
    %c0_i32_2 = arith.constant 0 : i32
    return %arg0, %c0_i32, %c0_i32_0, %c0_i32_1 : i32, i32, i32, i32
  }
  func.func @transform_5(%arg0: i32) -> (i32, i32, i32, i32) {
    %c0_i32 = arith.constant 0 : i32
    %c0_i32_0 = arith.constant 0 : i32
    %c0_i32_1 = arith.constant 0 : i32
    %c0_i32_2 = arith.constant 0 : i32
    return %arg0, %c0_i32, %c0_i32_0, %c0_i32_1 : i32, i32, i32, i32
  }
  func.func @transform_6(%arg0: i32) -> (i32, i32, i32, i32) {
    %c0_i32 = arith.constant 0 : i32
    %c0_i32_0 = arith.constant 0 : i32
    %c0_i32_1 = arith.constant 0 : i32
    %c0_i32_2 = arith.constant 0 : i32
    return %arg0, %c0_i32, %c0_i32_0, %c0_i32_1 : i32, i32, i32, i32
  }
  func.func @transform_7(%arg0: i32) -> (i32, i32, i32, i32) {
    %c0_i32 = arith.constant 0 : i32
    %c0_i32_0 = arith.constant 0 : i32
    %c0_i32_1 = arith.constant 0 : i32
    %c0_i32_2 = arith.constant 0 : i32
    return %arg0, %c0_i32, %c0_i32_0, %c0_i32_1 : i32, i32, i32, i32
  }
  func.func @transform_8(%arg0: i32) -> (i32, i32, i32, i32) {
    %c0_i32 = arith.constant 0 : i32
    %c0_i32_0 = arith.constant 0 : i32
    %c0_i32_1 = arith.constant 0 : i32
    %c0_i32_2 = arith.constant 0 : i32
    return %arg0, %c0_i32, %c0_i32_0, %c0_i32_1 : i32, i32, i32, i32
  }
  func.func @transform_9(%arg0: i32) -> (i32, i32, i32, i32) {
    %c0_i32 = arith.constant 0 : i32
    %c0_i32_0 = arith.constant 0 : i32
    %c0_i32_1 = arith.constant 0 : i32
    %c0_i32_2 = arith.constant 0 : i32
    return %arg0, %c0_i32, %c0_i32_0, %c0_i32_1 : i32, i32, i32, i32
  }
  func.func @transform_10(%arg0: i32) -> (i32, i32, i32, i32) {
    %c0_i32 = arith.constant 0 : i32
    %c0_i32_0 = arith.constant 0 : i32
    %c0_i32_1 = arith.constant 0 : i32
    %c0_i32_2 = arith.constant 0 : i32
    return %arg0, %c0_i32, %c0_i32_0, %c0_i32_1 : i32, i32, i32, i32
  }
  func.func @transform_11(%arg0: i32) -> (i32, i32, i32, i32) {
    %c0_i32 = arith.constant 0 : i32
    %c0_i32_0 = arith.constant 0 : i32
    %c0_i32_1 = arith.constant 0 : i32
    %c0_i32_2 = arith.constant 0 : i32
    return %arg0, %c0_i32, %c0_i32_0, %c0_i32_1 : i32, i32, i32, i32
  }
  func.func @transform_12(%arg0: i32) -> (i32, i32, i32, i32) {
    %c0_i32 = arith.constant 0 : i32
    %c0_i32_0 = arith.constant 0 : i32
    %c0_i32_1 = arith.constant 0 : i32
    %c0_i32_2 = arith.constant 0 : i32
    return %arg0, %c0_i32, %c0_i32_0, %c0_i32_1 : i32, i32, i32, i32
  }
  func.func @transform_13(%arg0: i32) -> (i32, i32, i32, i32) {
    %c0_i32 = arith.constant 0 : i32
    %c0_i32_0 = arith.constant 0 : i32
    %c0_i32_1 = arith.constant 0 : i32
    %c0_i32_2 = arith.constant 0 : i32
    return %arg0, %c0_i32, %c0_i32_0, %c0_i32_1 : i32, i32, i32, i32
  }
  func.func @transform_14(%arg0: i32) -> (i32, i32, i32, i32) {
    %c0_i32 = arith.constant 0 : i32
    %c0_i32_0 = arith.constant 0 : i32
    %c0_i32_1 = arith.constant 0 : i32
    %c0_i32_2 = arith.constant 0 : i32
    return %arg0, %c0_i32, %c0_i32_0, %c0_i32_1 : i32, i32, i32, i32
  }
  func.func @transform_15(%arg0: i32) -> (i32, i32, i32, i32) {
    %c0_i32 = arith.constant 0 : i32
    %c0_i32_0 = arith.constant 0 : i32
    %c0_i32_1 = arith.constant 0 : i32
    %c0_i32_2 = arith.constant 0 : i32
    return %arg0, %c0_i32, %c0_i32_0, %c0_i32_1 : i32, i32, i32, i32
  }
  func.func @transform_16(%arg0: i32) -> (i32, i32, i32) {
    %c0_i32 = arith.constant 0 : i32
    %c0_i32_0 = arith.constant 0 : i32
    %c0_i32_1 = arith.constant 0 : i32
    return %arg0, %c0_i32, %c0_i32_0 : i32, i32, i32
  }
  func.func @transform_17(%arg0: i32) -> (i32, i32, i32) {
    %c0_i32 = arith.constant 0 : i32
    %c0_i32_0 = arith.constant 0 : i32
    %c0_i32_1 = arith.constant 0 : i32
    return %arg0, %c0_i32, %c0_i32_0 : i32, i32, i32
  }
  func.func @transform_18(%arg0: i32) -> (i32, i32, i32, i32) {
    %c0_i32 = arith.constant 0 : i32
    %c0_i32_0 = arith.constant 0 : i32
    %c0_i32_1 = arith.constant 0 : i32
    %c0_i32_2 = arith.constant 0 : i32
    return %arg0, %c0_i32, %c0_i32_0, %c0_i32_1 : i32, i32, i32, i32
  }
}

</mosaic_0001>

<bundles_post_ra>
// kernel: tok_bert_con_differ_forward.1
= control target key start
LH: loop header
LB: loop body
LE: loop exit
PB: predicated region body
PF: predicated region fallthrough
CT: control target
= control target key end

     0   :  { %s6037_s27 = smov 0   ;;  %s6935_s0 = inlined_call_operand.vmem [shape: f32[2,2,2,8,32], index: 0, kind: input, shape index: {}]   ;;  %s6936_s1 = inlined_call_operand.vmem [shape: f32[2,2,2,32], index: 1, kind: input, shape index: {}]   ;;  %s6937_s2 = inlined_call_operand.vmem [shape: f32[2,2,2,32], index: 2, kind: input, shape index: {}]   ;;  %s6938_s3 = inlined_call_operand.vmem [shape: f32[32,32], index: 3, kind: input, shape index: {}]   ;;  %s6939_s4 = inlined_call_operand.vmem [shape: bf16[2,2,32,96], index: 4, kind: input, shape index: {}]   ;;  %s6940_s5 = inlined_call_operand.vmem [shape: f32[2,2,1,96], index: 5, kind: input, shape index: {}]   ;;  %s6941_s6 = inlined_call_operand.vmem [shape: bf16[2,2,32,32], index: 6, kind: input, shape index: {}]   ;;  %s6942_s7 = inlined_call_operand.vmem [shape: f32[2,2,1,32], index: 7, kind: input, shape index: {}]   ;;  %s6943_s8 = inlined_call_operand.vmem [shape: f32[2,2,1,32], index: 8, kind: input, shape index: {}]   ;;  %s6944_s9 = inlined_call_operand.vmem [shape: f32[2,2,1,32], index: 9, kind: input, shape index: {}]   ;;  %s6945_s10 = inlined_call_operand.vmem [shape: bf16[2,2,32,2048], index: 10, kind: input, shape index: {}]   ;;  %s6946_s11 = inlined_call_operand.vmem [shape: f32[2,2,1,2048], index: 11, kind: input, shape index: {}]   ;;  %s6947_s12 = inlined_call_operand.vmem [shape: bf16[2,2,32,2048], index: 12, kind: input, shape index: {}]   ;;  %s6948_s13 = inlined_call_operand.vmem [shape: f32[2,2,1,32], index: 13, kind: input, shape index: {}]   ;;  %s6949_s14 = inlined_call_operand.vmem [shape: f32[2,2,1,32], index: 14, kind: input, shape index: {}]   ;;  %s6950_s15 = inlined_call_operand.vmem [shape: f32[2,2,1,32], index: 15, kind: input, shape index: {}]   ;;  %s6951_s16 = inlined_call_operand.vmem [shape: bf16[2,32,32], index: 16, kind: input, shape index: {}]   ;;  %s6952_s17 = inlined_call_operand.vmem [shape: f32[2,1,32], index: 17, kind: input, shape index: {}]   ;;  %s6953_s18 = inlined_call_operand.vmem [shape: f32[2,2,2,32], index: 18, kind: output, shape index: {}]  }
   0x1   :  { %6959 = sst [smem:[#allocation3_spill]] %s6935_s0 }
   0x2   :  { %6960 = sst [smem:[#allocation4_spill]] %s6936_s1 }
   0x3   :  { %6961 = sst [smem:[#allocation5_spill]] %s6937_s2 }
   0x4   :  { %6962 = sst [smem:[#allocation6_spill]] %s6938_s3 }
   0x5   :  { %6963 = sst [smem:[#allocation7_spill]] %s6939_s4 }
   0x6   :  { %6964 = sst [smem:[#allocation8_spill]] %s6940_s5 }
   0x7 LB: > { %6965 = sst [smem:[#allocation2_spill]] %s5933_s27  ;;  %s5342_s28 = sadd.s32 4294967295, %s5933_s27   ;;  %s5933_s27 = sphi %s6037_s27, %s28_s27  }
   0x8   : > { %p5346_p0 = scmp.ge.s32.totalorder %s5933_s27, 1  ;;  %p662_p1 = scmp.lt.s32.totalorder %s5933_s27, 3 }
   0xa   : > { %p663_p2 = pnand %p5346_p0, %p662_p1 }
   0xb   : > { %p786_p3 = scmp.lt.s32.totalorder (!%p663_p2), %s5342_s28, 1  ;;  %v890_v0 = vlaneseq (!%p663_p2)  ;;  %v5935_v1 = vmov (!%p663_p2), 1966171168   ;;  %s6966_s4 = sld [smem:[#allocation7_spill]] (!%p663_p2)  ;;  %vm1044_vm0 = vcmask (!%p663_p2), 261120   ;;  %vm5940_vm1 = vmmov (!%p663_p2), 0  }
   0xc   : > { %666 = sbr.rel (%p663_p2) target bundleno = 5510 (0x1586), region = 92  ;;  %v888_v2 = vunpack.c.l.s4 (!%p663_p2), %v5935_v1  ;;  %s6967_s21 = sld [smem:[#allocation3_spill]] (!%p663_p2)  ;;  %vm5019_vm2 = vcmask (!%p663_p2), 1041409   ;;  %vm5022_vm3 = vcmask (!%p663_p2), 1042434   ;;  %vm5025_vm4 = vcmask (!%p663_p2), 1043459  }
   0xd   : > { %v6047_v3 = vshrl.u32 (!%p663_p2), %v890_v0, 7  ;;  %s6968_s25 = sld [smem:[#allocation4_spill]] (!%p663_p2)  ;;  %s6970_s3 = sld [smem:[#allocation6_spill]] (!%p663_p2)  ;;  %vm5095_vm5 = vcmask (!%p663_p2), 254976  }
   0xe   : > { %v889_v4 = vunpack.c.0.s8 (!%p663_p2), %v888_v2  ;;  %s6971_s5 = sld [smem:[#allocation8_spill]] (!%p663_p2) }
   0xf   : > { %v6079_v8 = vsub.s32 (!%p663_p2), 0, %v6047_v3 }
  0x10   : > { %v892_v6 = vsub.s32 (!%p663_p2), %v889_v4, %v6047_v3 }
  0x13   : > { %s6976_s28 = smov (!%p786_p3, %s5342_s28), 1  ;;  %v871_v47 = vld [vmem:[%s6970_s3] sm:$0xff]  ;;  %v872_v48 = vld [vmem:[%s6970_s3 + $0x8] sm:$0xff]  ;;  %v873_v50 = vld [vmem:[%s6970_s3 + $0x10] sm:$0xff] }
  0x14   : > { %s6050_s29 = sshll.u32 %s6976_s28, 5  ;;  %s6068_s2 = sshll.u32 %s6976_s28, 2  ;;  %v6113_v49 = vpack.c.bf16 %v872_v48, %v871_v47  ;;  %v874_v51 = vld [vmem:[%s6970_s3 + $0x18] sm:$0xff] }
  0x15   : > { %s6056_s19 = scalar_lea.vmem %s6966_s4, %s6050_s29  ;;  %s6065_s22 = scalar_lea.vmem %s6967_s21, %s6050_s29  ;;  %v6123_v52 = vpack.c.bf16 %v874_v51, %v873_v50 }
  0x16   : > { %v5835_v5 = vld [vmem:[%s6056_s19] sm:$0xff]   ;;  %v5836_v7 = vld [vmem:[%s6056_s19 + $0x8] sm:$0xff]   ;;  %s795_s26 = scalar_lea.vmem %s6968_s25, %s6068_s2  ;;  %s6969_s4 = sld [smem:[#allocation5_spill]]  ;;  %v869_v14 = vld [vmem:[%s6065_s22 + $0x10] sm:$0xff]  ;;  %5805 = vmatprep.subr.bf16.mxu1 %v6113_v49 }
  0x17   : > { %5724 = vmatprep.subr.bf16.mxu0 %v5835_v5  ;;  %v867_v9 = vld [vmem:[%s6065_s22] sm:$0xff]  ;;  %v868_v23 = vld [vmem:[%s6065_s22 + $0x8] sm:$0xff]  ;;  %v870_v32 = vld [vmem:[%s6065_s22 + $0x18] sm:$0xff]  ;;  %5807 = vmatpush3.bf16.msra.mxu1 %v6113_v49  ;;  %s6126_s25 = sshll.u32 %s6976_s28, 1  ;;  %s6157_s21 = scalar_lea.vmem %s6941_s6, %s6050_s29 }
  0x18   : > { %5725 = vmatpush3.bf16.msra.mxu0 %v5835_v5  ;;  %v5373_v10 = vld.sshfl [vmem:[%s795_s26] sm:$0x11 pattern:$0x75316420]  ;;  %5809 = vmatprep.subr.bf16.mxu1 %v6123_v52  ;;  %s6134_s0 = scalar_lea.vmem %s6971_s5, %s6126_s25  ;;  %s6191_s24 = scalar_lea.vmem %s6942_s7, %s6126_s25 }
  0x19   : > { %5726 = vmatprep.subr.bf16.mxu0 %v5836_v7  ;;  %v5374_v11 = vld.sshfl [vmem:[%s795_s26 + $0x2] sm:$0x11 pattern:$0x75316420]  ;;  %v886_v12 = vcombine.high %v5373_v10, %v5373_v10  ;;  %v893_v13 = vrot.slane %v5373_v10, %v892_v6  ;;  %v5377_v53 = vld [vmem:[%s6134_s0] ss:$0 sm:$0xff]  ;;  %s6255_s22 = scalar_lea.vmem %s6943_s8, %s6126_s25  ;;  %s6323_s1 = scalar_lea.vmem %s6946_s11, %s6050_s29 }
  0x1a   : > { %v908_v15 = vcombine.high %v5374_v11, %v5374_v11  ;;  %v915_v16 = vrot.slane %v5374_v11, %v892_v6  ;;  %s5677_s26 = sshll.u32 %s6976_s28, 9  ;;  %s6556_s5 = scalar_lea.vmem %s6950_s15, %s6126_s25 }
  0x1b   : > { %v900_v18 = vrot.slane %v886_v12, %v892_v6  ;;  %v926_v19 = vrot.slane %v893_v13, %v6079_v8  ;;  %5811 = vmatpush3.bf16.msra.mxu1 %v6123_v52  ;;  %s6228_s20 = scalar_lea.vmem %s6945_s10, %s5677_s26  ;;  %s6245_s30 = scalar_lea.vmem %s6947_s12, %s5677_s26 }
  0x1c   : > { %s800_s27 = scalar_lea.vmem %s6969_s4, %s6068_s2  ;;  %5727 = vmatpush3.bf16.msra.mxu0 %v5836_v7  ;;  %v922_v26 = vrot.slane %v908_v15, %v892_v6  ;;  %v934_v27 = vrot.slane %v915_v16, %v6079_v8  ;;  %s6957_s4 = smov 96   ;;  %v5837_v16 = vld [vmem:[%s6157_s21] sm:$0xff]  }
  0x1d   : > { %v5375_v17 = vld.sshfl [vmem:[%s800_s27] sm:$0x11 pattern:$0x75316420]  ;;  %v930_v28 = vrot.slane %v900_v18, %v6079_v8  ;;  %v943_v29 = vadd.f32 %v926_v19, %v867_v9  ;;  %5752 = vmatprep.subr.bf16.mxu0 %v5837_v16  ;;  %s6972_s3 = smov 96  }
  0x1e   : > { %v5376_v20 = vld.sshfl [vmem:[%s800_s27 + $0x2] sm:$0x11 pattern:$0x75316420]  ;;  %v958_v21 = vcombine.high %v5375_v17, %v5375_v17  ;;  %v965_v22 = vrot.slane %v5375_v17, %v892_v6  ;;  %v938_v33 = vrot.slane %v922_v26, %v6079_v8  ;;  %v945_v34 = vadd.f32 %v934_v27, %v869_v14  ;;  %s6955_s27 = smov 64   ;;  %v5838_v17 = vld [vmem:[%s6157_s21 + $0x8] sm:$0xff]  }
  0x1f   : > { %v980_v24 = vcombine.high %v5376_v20, %v5376_v20  ;;  %v987_v25 = vrot.slane %v5376_v20, %v892_v6  ;;  %v944_v37 = vadd.f32 %v930_v28, %v868_v23 }
  0x20   : > { %v972_v30 = vrot.slane %v958_v21, %v892_v6  ;;  %v998_v31 = vrot.slane %v965_v22, %v6079_v8  ;;  %v946_v40 = vadd.f32 %v938_v33, %v870_v32 }
  0x21   : > { %v994_v35 = vrot.slane %v980_v24, %v892_v6  ;;  %v1006_v36 = vrot.slane %v987_v25, %v6079_v8 }
  0x22   : > { %v1002_v38 = vrot.slane %v972_v30, %v6079_v8  ;;  %v6092_v39 = vadd.f32 %v998_v31, %v943_v29 }
  0x23   : > { %v1010_v41 = vrot.slane %v994_v35, %v6079_v8  ;;  %v6095_v42 = vadd.f32 %v1006_v36, %v945_v34 }
  0x24   : > { %v6097_v43 = vadd.f32 %v1002_v38, %v944_v37 }
  0x25   : > { %v6099_v44 = vadd.f32 %v1010_v41, %v946_v40 }
  0x26   : > { %v1019_v45 = vpack.c.bf16 %v6097_v43, %v6092_v39 }
  0x27   : > { %v1020_v46 = vpack.c.bf16 %v6099_v44, %v6095_v42 }
  0x28   : > { %5728 = vmatprep.mubr.msk.bf16.mxu0 %vm1044_vm0, %v1019_v45 }
  0x29   : > { %5729 = vmatmul.mubr.msk.bf16.vlgmr.msra.gmra.mrb[0].mxu0 %vm1044_vm0, %v1020_v46 }
  0x2a   : > { %5753 = vmatpush3.bf16.msra.mxu0 %v5837_v16 }
  0x2b   : > { %5754 = vmatprep.subr.bf16.mxu0 %v5838_v17 }
  0x2e   : > { %5755 = vmatpush3.bf16.msra.mxu0 %v5838_v17 }
  0xfc   : > { %v5730_v54 = vpop.f32.mrb[0].mxu0 }
  0xfd   : > { %v1094_v55 = vadd.f32 %v5730_v54, %v5377_v53  ;;  %v1085_v56 = vpop.f32.mrb[1].mxu0 }
  0xfe   : > { %v1086_v57 = vadd.f32 %v5377_v53, %v1085_v56  ;;  %v5731_v58 = vpop.f32.mrb[2].mxu0 }
  0xff   : > { %1112 = vrot.lane.b32.xlu1 %v1094_v55, %s6957_s4  ;;  %v1088_v59 = vpop.f32.mrb[3].mxu0  ;;  %v1097_v60 = vadd.f32 %v5731_v58, %v5377_v53  ;;  %v1102_v7 = vmul.f32 0.5, %v1094_v55 }
 0x100   : > { %1108 = vrot.lane.b32.xlu0 %v1086_v57, %s6957_s4  ;;  %v1089_v61 = vadd.f32 %v5377_v53, %v1088_v59  ;;  %v1100_v62 = vmul.f32 0.5, %v1086_v57 }
 0x101   : > { %v1103_v12 = vmul.f32 0.5, %v1097_v60 }
 0x102   : > { %v1101_v2 = vmul.f32 0.5, %v1089_v61 }
 0x103   : > { %1114 = vrot.lane.b32.xlu1 %v1097_v60, %s6957_s4 }
 0x104   : > { %1110 = vrot.lane.b32.xlu0 %v1089_v61, %s6957_s4  ;;  %s6262_s4 = scalar_lea.vmem %s6944_s9, %s6126_s25 }
 0x107   : > { %1319 = vrot.lane.b32.xlu1 %v1089_v61, %s6955_s27 }
 0x108   : > { %1317 = vrot.lane.b32.xlu0 %v1086_v57, %s6955_s27 }
 0x10b   : > { %1323 = vrot.lane.b32.xlu1 %v1097_v60, %s6955_s27 }
 0x10c   : > { %1321 = vrot.lane.b32.xlu0 %v1094_v55, %s6955_s27  ;;  %s6456_s27 = scalar_lea.vmem %s6948_s13, %s6126_s25 }
 0x171   : > { %v1113_v1 = vpop.permute.xlu1 %1112 }
 0x172   : > { %v1109_v63 = vpop.permute.xlu0 %1108  ;;  %v1124_v10 = vmul.f32 %v1113_v1, %v1102_v7  ;;  %v1126_v14 = vmul.f32 %v1113_v1, %v1103_v12 }
 0x173   : > { %v1120_v0 = vmul.f32 %v1109_v63, %v1100_v62  ;;  %v1122_v6 = vmul.f32 %v1109_v63, %v1101_v2 }
 0x175   : > { %5740 = vmatprep.mubr.msk.f32.mxu1 %vm1044_vm0, %v1120_v0  ;;  %v1115_v11 = vpop.permute.xlu1 %1114 }
 0x176   : > { %v1111_v4 = vpop.permute.xlu0 %1110  ;;  %v1125_v13 = vmul.f32 %v1115_v11, %v1102_v7  ;;  %v1127_v15 = vmul.f32 %v1115_v11, %v1103_v12 }
 0x177   : > { %v1121_v5 = vmul.f32 %v1111_v4, %v1100_v62  ;;  %v1123_v9 = vmul.f32 %v1111_v4, %v1101_v2 }
 0x179   : > { %5741 = vmatmul.mubr.msk.f32.vlgmr.msra.gmra.mrb[0].mxu1 %vm1044_vm0, %v1121_v5 }
 0x17a   : > { %5743 = vmatprep.mubr.msk.f32.mxu1 %vm1044_vm0, %v1122_v6 }
 0x17d   : > { %5744 = vmatmul.mubr.msk.f32.gmra.mrb[2].mxu1 %vm1044_vm0, %v1123_v9 }
 0x17e   : > { %5746 = vmatprep.mubr.msk.f32.mxu1 %vm1044_vm0, %v1124_v10 }
 0x181   : > { %5747 = vmatmul.mubr.msk.f32.gmra.mrb[4].mxu1 %vm1044_vm0, %v1125_v13 }
 0x182   : > { %5749 = vmatprep.mubr.msk.f32.mxu1 %vm1044_vm0, %v1126_v14 }
 0x185   : > { %5750 = vmatmul.mubr.msk.f32.gmra.mrb[6].mxu1 %vm1044_vm0, %v1127_v15 }
 0x24c   : > { %v5742_v18 = vpop.f32.mrb[0].mxu1 }
 0x24d   : > { %v1258_v19 = vsel %vm1044_vm0, %v5742_v18, -inf  ;;  %v1218_v20 = vpop.f32.mrb[1].mxu1 }
 0x24e   : > { %v1257_v21 = vsel %vm1044_vm0, %v1218_v20, -inf }
 0x24f   : > { %v1259_v22 = vmax.f32 %v1257_v21, %v1258_v19  ;;  %v1320_v21 = vpop.permute.xlu1 %1319 }
 0x250   : > { %v5745_v23 = vpop.f32.mrb[2].mxu1 }
 0x251   : > { %v1269_v24 = vsub.f32 %v1218_v20, %v1259_v22  ;;  %v1270_v25 = vsub.f32 %v5742_v18, %v1259_v22  ;;  %v1261_v26 = vsel %vm1044_vm0, %v5745_v23, -inf  ;;  %v1228_v27 = vpop.f32.mrb[3].mxu1  ;;  %v1318_v22 = vpop.permute.xlu0 %1317 }
 0x252   : > { %v1260_v28 = vsel %vm1044_vm0, %v1228_v27, -inf }
 0x253   : > { %v1277_v29 = vmul.f32 1.442695, %v1269_v24  ;;  %v1279_v30 = vmul.f32 1.442695, %v1270_v25  ;;  %v1262_v31 = vmax.f32 %v1260_v28, %v1261_v26 }
 0x254   : > { %v5748_v32 = vpop.f32.mrb[4].mxu1 }
 0x255   : > { %5845 = vpow2.f32 %v1277_v29  ;;  %v1271_v33 = vsub.f32 %v1228_v27, %v1262_v31  ;;  %v1272_v34 = vsub.f32 %v5745_v23, %v1262_v31  ;;  %v1264_v35 = vsel %vm1044_vm0, %v5748_v32, -inf  ;;  %v1238_v36 = vpop.f32.mrb[5].mxu1 }
 0x256   : > { %5847 = vpow2.f32 %v1279_v30  ;;  %v1263_v37 = vsel %vm1044_vm0, %v1238_v36, -inf }
 0x257   : > { %v1281_v38 = vmul.f32 1.442695, %v1271_v33  ;;  %v1283_v40 = vmul.f32 1.442695, %v1272_v34  ;;  %v1265_v41 = vmax.f32 %v1263_v37, %v1264_v35 }
 0x258   : > { %v5751_v45 = vpop.f32.mrb[6].mxu1 }
 0x259   : > { %5849 = vpow2.f32 %v1281_v38  ;;  %v1273_v46 = vsub.f32 %v1238_v36, %v1265_v41  ;;  %v1274_v47 = vsub.f32 %v5748_v32, %v1265_v41  ;;  %v1267_v48 = vsel %vm1044_vm0, %v5751_v45, -inf  ;;  %v1248_v50 = vpop.f32.mrb[7].mxu1  ;;  %v1324_v38 = vpop.permute.xlu1 %1323 }
 0x25a   : > { %5851 = vpow2.f32 %v1283_v40  ;;  %v1266_v51 = vsel %vm1044_vm0, %v1248_v50, -inf  ;;  %v1322_v40 = vpop.permute.xlu0 %1321 }
 0x25b   : > { %v1285_v53 = vmul.f32 1.442695, %v1273_v46  ;;  %v1287_v54 = vmul.f32 1.442695, %v1274_v47  ;;  %v1268_v55 = vmax.f32 %v1266_v51, %v1267_v48 }
 0x25d   : > { %5853 = vpow2.f32 %v1285_v53  ;;  %v1275_v56 = vsub.f32 %v1248_v50, %v1268_v55  ;;  %v1276_v57 = vsub.f32 %v5751_v45, %v1268_v55 }
 0x25e   : > { %5855 = vpow2.f32 %v1287_v54 }
 0x25f   : > { %v5846_v58 = vpop.eup %5845  ;;  %v1289_v59 = vmul.f32 1.442695, %v1275_v56  ;;  %v1291_v60 = vmul.f32 1.442695, %v1276_v57 }
 0x260   : > { %v5848_v61 = vpop.eup %5847  ;;  %v1293_v62 = vsel %vm1044_vm0, %v5846_v58, 0.0 }
 0x261   : > { %v1294_v63 = vsel %vm1044_vm0, %v5848_v61, 0.0  ;;  %5857 = vpow2.f32 %v1289_v59 }
 0x262   : > { %v1295_v0 = vadd.f32 %v1294_v63, %v1293_v62  ;;  %5859 = vpow2.f32 %v1291_v60  ;;  %v5390_v62 = vld [vmem:[%s6191_s24] ss:$0 sm:$0xff] }
 0x263   : > { %v5850_v1 = vpop.eup %5849 }
 0x264   : > { %v5852_v2 = vpop.eup %5851  ;;  %5861 = vrcp.f32 %v1295_v0  ;;  %v1296_v4 = vsel %vm1044_vm0, %v5850_v1, 0.0 }
 0x265   : > { %v1297_v5 = vsel %vm1044_vm0, %v5852_v2, 0.0 }
 0x266   : > { %v1298_v6 = vadd.f32 %v1297_v5, %v1296_v4 }
 0x267   : > { %v5854_v7 = vpop.eup %5853 }
 0x268   : > { %v5856_v9 = vpop.eup %5855  ;;  %5863 = vrcp.f32 %v1298_v6  ;;  %v1299_v10 = vsel %vm1044_vm0, %v5854_v7, 0.0 }
 0x269   : > { %v1300_v11 = vsel %vm1044_vm0, %v5856_v9, 0.0 }
 0x26a   : > { %v1301_v12 = vadd.f32 %v1300_v11, %v1299_v10 }
 0x26b   : > { %v5858_v13 = vpop.eup %5857 }
 0x26c   : > { %v5860_v14 = vpop.eup %5859  ;;  %5865 = vrcp.f32 %v1301_v12  ;;  %v1302_v15 = vsel %vm1044_vm0, %v5858_v13, 0.0 }
 0x26d   : > { %v1303_v16 = vsel %vm1044_vm0, %v5860_v14, 0.0 }
 0x26e   : > { %v5862_v17 = vpop.eup %5861  ;;  %v1304_v18 = vadd.f32 %v1303_v16, %v1302_v15 }
 0x26f   : > { %v1309_v19 = vmul.f32 %v5862_v17, %v5846_v58  ;;  %v1310_v20 = vmul.f32 %v5862_v17, %v5848_v61 }
 0x270   : > { %5867 = vrcp.f32 %v1304_v18 }
 0x271   : > { %v1329_v23 = vmul.f32 %v1318_v22, %v1309_v19  ;;  %v1330_v24 = vmul.f32 %v1320_v21, %v1310_v20 }
 0x272   : > { %v5864_v25 = vpop.eup %5863 }
 0x273   : > { %v1311_v26 = vmul.f32 %v5864_v25, %v5850_v1  ;;  %v1312_v27 = vmul.f32 %v5864_v25, %v5852_v2  ;;  %v1337_v28 = vsel %vm1044_vm0, %v1329_v23, 0.0  ;;  %v1338_v29 = vsel %vm1044_vm0, %v1330_v24, 0.0 }
 0x274   : > { %v1339_v30 = vadd.f32 %v1338_v29, %v1337_v28 }
 0x275   : > { %v1331_v31 = vmul.f32 %v1318_v22, %v1311_v26  ;;  %v1332_v32 = vmul.f32 %v1320_v21, %v1312_v27 }
 0x276   : > { %v5866_v33 = vpop.eup %5865 }
 0x277   : > { %v1313_v34 = vmul.f32 %v5866_v33, %v5854_v7  ;;  %v1314_v35 = vmul.f32 %v5866_v33, %v5856_v9  ;;  %v1340_v36 = vsel %vm1044_vm0, %v1331_v31, 0.0  ;;  %v1341_v37 = vsel %vm1044_vm0, %v1332_v32, 0.0  ;;  %v1519_v33 = vld [vmem:[%s6228_s20 + $0x8] sm:$0xff] }
 0x278   : > { %v1342_v41 = vadd.f32 %v1341_v37, %v1340_v36  ;;  %v1520_v37 = vld [vmem:[%s6228_s20 + $0x40] sm:$0xff] }
 0x279   : > { %v1333_v45 = vmul.f32 %v1322_v40, %v1313_v34  ;;  %v1334_v46 = vmul.f32 %v1324_v38, %v1314_v35  ;;  %v1521_v34 = vld [vmem:[%s6228_s20 + $0x48] sm:$0xff]  ;;  %v1518_v35 = vld [vmem:[%s6228_s20] sm:$0xff] }
 0x27a   : > { %v5868_v47 = vpop.eup %5867  ;;  %v1349_v48 = vpack.c.bf16 %v1342_v41, %v1339_v30  ;;  %v5401_v36 = vcombine.high %v1519_v33, %v1521_v34  ;;  %v5399_v41 = vcombine.high %v1518_v35, %v1520_v37 }
 0x27b   : > { %v1315_v50 = vmul.f32 %v5868_v47, %v5858_v13  ;;  %v1316_v51 = vmul.f32 %v5868_v47, %v5860_v14  ;;  %v1343_v53 = vsel %vm1044_vm0, %v1333_v45, 0.0  ;;  %v1344_v54 = vsel %vm1044_vm0, %v1334_v46, 0.0  ;;  %v1523_v45 = vld [vmem:[%s6228_s20 + $0x88] sm:$0xff]  ;;  %v1522_v47 = vld [vmem:[%s6228_s20 + $0x80] sm:$0xff] }
 0x27c   : > { %5756 = vmatprep.mubr.msk.bf16.mxu0 %vm1044_vm0, %v1349_v48  ;;  %v1345_v55 = vadd.f32 %v1344_v54, %v1343_v53  ;;  %1647 = vmatprep.subr.bf16.mxu1 %v5401_v36  ;;  %v1525_v46 = vld [vmem:[%s6228_s20 + $0xc8] sm:$0xff] }
 0x27d   : > { %v1335_v56 = vmul.f32 %v1322_v40, %v1315_v50  ;;  %v1336_v57 = vmul.f32 %v1324_v38, %v1316_v51  ;;  %v5400_v38 = vcombine.low %v1519_v33, %v1521_v34  ;;  %v5398_v40 = vcombine.low %v1518_v35, %v1520_v37  ;;  %1594 = vmatprep.subr.bf16.mxu0 %v5399_v41  ;;  %v1524_v50 = vld [vmem:[%s6228_s20 + $0xc0] sm:$0xff]  ;;  %v1731_v34 = vld [vmem:[%s6245_s30 + $0xc8] sm:$0xff]  ;;  %v6306_v41 = vld [vmem:[%s6228_s20 + $0x18] sm:$0xff] }
 0x27e   : > { %v5405_v48 = vcombine.high %v1523_v45, %v1525_v46  ;;  %v5404_v51 = vcombine.low %v1523_v45, %v1525_v46  ;;  %v5402_v53 = vcombine.low %v1522_v47, %v1524_v50  ;;  %v5403_v54 = vcombine.high %v1522_v47, %v1524_v50  ;;  %v6313_v47 = vld [vmem:[%s6228_s20 + $0x58] sm:$0xff] }
 0x27f   : > { %v1346_v58 = vsel %vm1044_vm0, %v1335_v56, 0.0  ;;  %v1347_v59 = vsel %vm1044_vm0, %v1336_v57, 0.0  ;;  %1648 = vmatpush1.bf16.msra.mxu1 %v5400_v38  ;;  %v1724_v56 = vld [vmem:[%s6245_s30] sm:$0xff]  ;;  %v6300_v38 = vld [vmem:[%s6228_s20 + $0x10] sm:$0xff]  ;;  %v5421_v50 = vcombine.high %v6306_v41, %v6313_v47 }
 0x280   : > { %v1348_v60 = vadd.f32 %v1347_v59, %v1346_v58  ;;  %1649 = vmatprep.subr.bf16.mxu1 %v5405_v48  ;;  %v1726_v57 = vld [vmem:[%s6245_s30 + $0x40] sm:$0xff]  ;;  %v1725_v58 = vld [vmem:[%s6245_s30 + $0x8] sm:$0xff]  ;;  %v5420_v48 = vcombine.low %v6306_v41, %v6313_v47  ;;  %v2076_v41 = vld [vmem:[%s6245_s30 + $0x50] sm:$0xff] }
 0x281   : > { %v5410_v59 = vcombine.low %v1724_v56, %v1726_v57 }
 0x282   : > { %v1350_v61 = vpack.c.bf16 %v1348_v60, %v1345_v55  ;;  %v5938_v55 = vmov 0   ;;  %v5411_v60 = vcombine.high %v1724_v56, %v1726_v57  ;;  %v6333_v56 = vsub.s32 3, %v6047_v3 }
 0x283   : > { %1650 = vmatpush1.bf16.msra.mxu1 %v5404_v51  ;;  %1679 = vmatprep.mubr.bf16.mxu1 %v5938_v55  ;;  %v6326_v51 = vsub.s32 2, %v6047_v3 }
 0x284   : > { %5757 = vmatmul.mubr.msk.bf16.vlgmr.msra.gmra.mrb[4].mxu0 %vm1044_vm0, %v1350_v61  ;;  %v1727_v61 = vld [vmem:[%s6245_s30 + $0x48] sm:$0xff] }
 0x285   : > { %1595 = vmatpush1.bf16.msra.mxu0 %v5398_v40  ;;  %1626 = vmatprep.mubr.bf16.mxu0 %v5938_v55  ;;  %v6303_v40 = vld [vmem:[%s6228_s20 + $0x50] sm:$0xff] }
 0x286   : > { %1596 = vmatprep.subr.bf16.mxu0 %v5403_v54  ;;  %v5418_v45 = vcombine.low %v6300_v38, %v6303_v40  ;;  %v5419_v46 = vcombine.high %v6300_v38, %v6303_v40  ;;  %v6330_v54 = vsub.s32 1, %v6047_v3  ;;  %v2074_v40 = vld [vmem:[%s6245_s30 + $0x10] sm:$0xff] }
 0x287   : > { %v5431_v47 = vcombine.high %v2074_v40, %v2076_v41 }
 0x289   : > { %1597 = vmatpush1.bf16.msra.mxu0 %v5402_v53  ;;  %v1526_v53 = vld [vmem:[%s6323_s1] sm:$0xf] }
 0x28a   : > { %1772 = vmatprep.subr.bf16.mxu0 %v5411_v60  ;;  %v1531_v57 = vrot.slane %v1526_v53, %v6079_v8  ;;  %v1543_v60 = vrot.slane %v1526_v53, %v6333_v56 }
 0x357   : > { %v5758_v63 = vpop.f32.mrb[4].mxu0 }
 0x358   : > { %v1414_v0 = vpop.f32.mrb[5].mxu0  ;;  %v1423_v1 = vadd.f32 %v5758_v63, %v5390_v62  ;;  %v5413_v63 = vcombine.high %v1725_v58, %v1727_v61 }
 0x359   : > { %v1415_v2 = vadd.f32 %v5390_v62, %v1414_v0  ;;  %v5759_v4 = vpop.f32.mrb[6].mxu0 }
 0x35a   : > { %v1417_v5 = vpop.f32.mrb[7].mxu0  ;;  %v1426_v9 = vadd.f32 %v5759_v4, %v5390_v62  ;;  %v1431_v12 = vadd.f32 %v1423_v1, %v6095_v42  ;;  %1821 = vmatprep.subr.bf16.mxu1 %v5413_v63 }
 0x35b   : > { %v1418_v6 = vadd.f32 %v5390_v62, %v1417_v5  ;;  %v1429_v7 = vadd.f32 %v1415_v2, %v6092_v39  ;;  %v5412_v62 = vcombine.low %v1725_v58, %v1727_v61  ;;  %v1539_v58 = vrot.slane %v1526_v53, %v6326_v51 }
 0x35c   : > { %v1441_v14 = vsel %vm1044_vm0, %v1431_v12, 0.0  ;;  %v1432_v15 = vadd.f32 %v1426_v9, %v6099_v44 }
 0x35d   : > { %v1435_v10 = vsel %vm1044_vm0, %v1429_v7, 0.0  ;;  %v1430_v11 = vadd.f32 %v1418_v6, %v6097_v43 }
 0x35e   : > { %1436 = vadd.xlane.f32.xlu0 %v1435_v10  ;;  %v1444_v16 = vsel %vm1044_vm0, %v1432_v15, 0.0 }
 0x35f   : > { %v1438_v13 = vsel %vm1044_vm0, %v1430_v11, 0.0 }
 0x360   : > { %1439 = vadd.xlane.f32.xlu1 %v1438_v13 }
 0x362   : > { %1442 = vadd.xlane.f32.xlu0 %v1441_v14 }
 0x366   : > { %1445 = vadd.xlane.f32.xlu0 %v1444_v16 }
 0x3eb   : > { %v1437_v39 = vpop.xlane.xlu0 %1436 }
 0x3ec   : > { %v1448_v17 = vmul.f32 0.03125, %v1437_v39 }
 0x3ed   : > { %v1440_v18 = vpop.xlane.xlu1 %1439 }
 0x3ee   : > { %v6202_v19 = vsub.f32 %v1429_v7, %v1448_v17  ;;  %v1449_v43 = vmul.f32 0.03125, %v1440_v18 }
 0x3ef   : > { %v1443_v20 = vpop.xlane.xlu0 %1442 }
 0x3f0   : > { %v6204_v42 = vsub.f32 %v1430_v11, %v1449_v43  ;;  %v1450_v21 = vmul.f32 0.03125, %v1443_v20  ;;  %v1456_v22 = vmul.f32 %v6202_v19, %v6202_v19  ;;  %v5396_v20 = vld [vmem:[%s6262_s4] ss:$0 sm:$0xff] }
 0x3f2   : > { %v6208_v23 = vsub.f32 %v1431_v12, %v1450_v21  ;;  %v1460_v44 = vsel %vm1044_vm0, %v1456_v22, 0.0  ;;  %v1457_v24 = vmul.f32 %v6204_v42, %v6204_v42 }
 0x3f3   : > { %1461 = vadd.xlane.f32.xlu1 %v1460_v44  ;;  %v1446_v25 = vpop.xlane.xlu0 %1445 }
 0x3f4   : > { %v1451_v26 = vmul.f32 0.03125, %v1446_v25  ;;  %v1463_v27 = vsel %vm1044_vm0, %v1457_v24, 0.0  ;;  %v1458_v28 = vmul.f32 %v6208_v23, %v6208_v23 }
 0x3f5   : > { %1464 = vadd.xlane.f32.xlu0 %v1463_v27 }
 0x3f6   : > { %v6216_v29 = vsub.f32 %v1432_v15, %v1451_v26  ;;  %v1466_v30 = vsel %vm1044_vm0, %v1458_v28, 0.0  ;;  %v5395_v15 = vld [vmem:[%s6255_s22] ss:$0 sm:$0xff] }
 0x3f7   : > { %1467 = vadd.xlane.f32.xlu1 %v1466_v30  ;;  %v1728_v30 = vld [vmem:[%s6245_s30 + $0x80] sm:$0xff] }
 0x3f8   : > { %v1459_v31 = vmul.f32 %v6216_v29, %v6216_v29 }
 0x3fa   : > { %v1469_v32 = vsel %vm1044_vm0, %v1459_v31, 0.0  ;;  %v1730_v31 = vld [vmem:[%s6245_s30 + $0xc0] sm:$0xff] }
 0x3fb   : > { %1470 = vadd.xlane.f32.xlu0 %v1469_v32  ;;  %v1729_v32 = vld [vmem:[%s6245_s30 + $0x88] sm:$0xff]  ;;  %v5415_v33 = vcombine.high %v1728_v30, %v1730_v31  ;;  %v5414_v35 = vcombine.low %v1728_v30, %v1730_v31 }
 0x3fc   : > { %v5416_v36 = vcombine.low %v1729_v32, %v1731_v34  ;;  %v5417_v37 = vcombine.high %v1729_v32, %v1731_v34 }
 0x480   : > { %v1462_v0 = vpop.xlane.xlu1 %1461 }
 0x481   : > { %v1472_v1 = vmul.f32 0.03125, %v1462_v0 }
 0x482   : > { %v1465_v2 = vpop.xlane.xlu0 %1464 }
 0x483   : > { %v1476_v4 = vadd.f32 1e-05, %v1472_v1  ;;  %v1473_v5 = vmul.f32 0.03125, %v1465_v2 }
 0x484   : > { %v1468_v6 = vpop.xlane.xlu1 %1467 }
 0x485   : > { %5869 = vrsqrt.f32 %v1476_v4  ;;  %v1477_v7 = vadd.f32 1e-05, %v1473_v5  ;;  %v1474_v9 = vmul.f32 0.03125, %v1468_v6 }
 0x487   : > { %5871 = vrsqrt.f32 %v1477_v7  ;;  %v1478_v10 = vadd.f32 1e-05, %v1474_v9 }
 0x488   : > { %v1471_v11 = vpop.xlane.xlu0 %1470 }
 0x489   : > { %5873 = vrsqrt.f32 %v1478_v10  ;;  %v1475_v12 = vmul.f32 0.03125, %v1471_v11 }
 0x48b   : > { %v1479_v13 = vadd.f32 1e-05, %v1475_v12 }
 0x48d   : > { %5875 = vrsqrt.f32 %v1479_v13 }
 0x48f   : > { %v5870_v14 = vpop.eup %5869 }
 0x490   : > { %v1484_v16 = vmul.f32 %v5870_v14, %v6202_v19 }
 0x491   : > { %v5872_v39 = vpop.eup %5871 }
 0x492   : > { %v1494_v17 = vmul.f32 %v5395_v15, %v1484_v16  ;;  %v1485_v18 = vmul.f32 %v5872_v39, %v6204_v42 }
 0x493   : > { %v5874_v43 = vpop.eup %5873 }
 0x494   : > { %v1495_v21 = vmul.f32 %v5395_v15, %v1485_v18  ;;  %v6267_v22 = vadd.f32 %v5396_v20, %v1494_v17  ;;  %v1486_v24 = vmul.f32 %v5874_v43, %v6208_v23  ;;  %v1878_v18 = vld [vmem:[%s6228_s20 + $0x90] sm:$0xff] }
 0x495   : > { %v1880_v43 = vld [vmem:[%s6228_s20 + $0xd0] sm:$0xff] }
 0x496   : > { %v6269_v44 = vadd.f32 %v5396_v20, %v1495_v21  ;;  %v1496_v42 = vmul.f32 %v5395_v15, %v1486_v24 }
 0x497   : > { %v5876_v25 = vpop.eup %5875 }
 0x498   : > { %v6274_v26 = vpack.c.bf16 %v6269_v44, %v6267_v22  ;;  %v1487_v19 = vmul.f32 %v5876_v25, %v6216_v29  ;;  %v6285_v28 = vadd.f32 %v5396_v20, %v1496_v42  ;;  %v1881_v42 = vld [vmem:[%s6228_s20 + $0xd8] sm:$0xff] }
 0x49a   : > { %v1497_v27 = vmul.f32 %v5395_v15, %v1487_v19  ;;  %5406 = vmatmul.mubr.msk.bf16.vlgmr.msra.gmra.mrb[8].mxu0 %vm1044_vm0, %v6274_v26  ;;  %5408 = vmatmul.mubr.msk.bf16.vlgmr.msra.gmra.mrb[8].mxu1 %vm1044_vm0, %v6274_v26  ;;  %v1879_v19 = vld [vmem:[%s6228_s20 + $0x98] sm:$0xff] }
 0x49b   : > { %1636 = vmatprep.mubr.bf16.mxu0 %v5938_v55  ;;  %1689 = vmatprep.mubr.bf16.mxu1 %v5938_v55 }
 0x49c   : > { %v6283_v23 = vadd.f32 %v5396_v20, %v1497_v27  ;;  %1773 = vmatpush1.bf16.xpose.msra.mxu0 %v5410_v59  ;;  %1822 = vmatpush1.bf16.xpose.msra.mxu1 %v5412_v62  ;;  %v1535_v59 = vrot.slane %v1526_v53, %v6330_v54  ;;  %v5425_v53 = vcombine.high %v1879_v19, %v1881_v42 }
 0x49d   : > { %1774 = vmatprep.subr.bf16.mxu0 %v5415_v33  ;;  %1823 = vmatprep.subr.bf16.mxu1 %v5417_v37 }
 0x49e   : > { %v6289_v29 = vpack.c.bf16 %v6283_v23, %v6285_v28 }
 0x4a2   : > { %5407 = vmatmul.mubr.msk.bf16.gmra.mrb[12].mxu0 %vm1044_vm0, %v6289_v29  ;;  %5409 = vmatmul.mubr.msk.bf16.gmra.mrb[12].mxu1 %vm1044_vm0, %v6289_v29 }
 0x4a4   : > { %1775 = vmatpush1.bf16.xpose.msra.mxu0 %v5414_v35  ;;  %1824 = vmatpush1.bf16.xpose.msra.mxu1 %v5416_v36 }
 0x4a5   : > { %1944 = vmatprep.subr.bf16.mxu0 %v5419_v46  ;;  %1997 = vmatprep.subr.bf16.mxu1 %v5421_v50  ;;  %v5423_v50 = vcombine.high %v1878_v18, %v1880_v43 }
 0x56d   : > { %v1628_v61 = vpop.f32.mrb[8].mxu0  ;;  %v1681_v62 = vpop.f32.mrb[8].mxu1 }
 0x56e   : > { %v1629_v63 = vadd.f32 %v1628_v61, %v1531_v57  ;;  %v1682_v0 = vadd.f32 %v1681_v62, %v1539_v58  ;;  %v1630_v1 = vpop.f32.mrb[9].mxu0  ;;  %v1683_v2 = vpop.f32.mrb[9].mxu1 }
 0x56f   : > { %v1631_v4 = vadd.f32 %v1630_v1, %v1535_v59  ;;  %v1684_v5 = vadd.f32 %v1683_v2, %v1543_v60  ;;  %v1632_v6 = vpop.f32.mrb[10].mxu0  ;;  %v1685_v7 = vpop.f32.mrb[10].mxu1 }
 0x570   : > { %v1633_v9 = vadd.f32 %v1632_v6, %v1531_v57  ;;  %v1686_v10 = vadd.f32 %v1685_v7, %v1539_v58  ;;  %v1634_v11 = vpop.f32.mrb[11].mxu0  ;;  %v1687_v12 = vpop.f32.mrb[11].mxu1  ;;  %v1700_v15 = vmax.f32 %v1629_v63, 0.0  ;;  %v1702_v16 = vmax.f32 %v1682_v0, 0.0 }
 0x571   : > { %v1635_v13 = vadd.f32 %v1634_v11, %v1535_v59  ;;  %v1688_v14 = vadd.f32 %v1687_v12, %v1543_v60  ;;  %v1701_v20 = vmax.f32 %v1631_v4, 0.0  ;;  %v1703_v21 = vmax.f32 %v1684_v5, 0.0 }
 0x572   : > { %v1704_v39 = vmax.f32 %v1633_v9, 0.0  ;;  %v1706_v17 = vmax.f32 %v1686_v10, 0.0  ;;  %v5422_v6 = vcombine.low %v1878_v18, %v1880_v43  ;;  %v5424_v10 = vcombine.low %v1879_v19, %v1881_v42  ;;  %v2081_v19 = vld [vmem:[%s6245_s30 + $0xd8] sm:$0xff] }
 0x573   : > { %v1705_v24 = vmax.f32 %v1635_v13, 0.0  ;;  %v1707_v25 = vmax.f32 %v1688_v14, 0.0 }
 0x574   : > { %v1716_v27 = vpack.c.bf16 %v1704_v39, %v1700_v15  ;;  %v1718_v30 = vpack.c.bf16 %v1706_v17, %v1702_v16  ;;  %v5430_v17 = vcombine.low %v2074_v40, %v2076_v41 }
 0x575   : > { %v1717_v31 = vpack.c.bf16 %v1705_v24, %v1701_v20  ;;  %v1719_v32 = vpack.c.bf16 %v1707_v25, %v1703_v21  ;;  %v1638_v33 = vpop.f32.mrb[12].mxu0  ;;  %v1691_v34 = vpop.f32.mrb[12].mxu1  ;;  %v2078_v20 = vld [vmem:[%s6245_s30 + $0x90] sm:$0xff]  ;;  %v2079_v24 = vld [vmem:[%s6245_s30 + $0x98] sm:$0xff] }
 0x576   : > { %v1639_v35 = vadd.f32 %v1638_v33, %v1531_v57  ;;  %v1692_v36 = vadd.f32 %v1691_v34, %v1539_v58  ;;  %v1640_v37 = vpop.f32.mrb[13].mxu0  ;;  %v1693_v46 = vpop.f32.mrb[13].mxu1  ;;  %v2080_v21 = vld [vmem:[%s6245_s30 + $0xd0] sm:$0xff]  ;;  %v6376_v33 = vld [vmem:[%s6228_s20 + $0x28] sm:$0xff] }
 0x577   : > { %v1641_v61 = vadd.f32 %v1640_v37, %v1535_v59  ;;  %v1694_v62 = vadd.f32 %v1693_v46, %v1543_v60  ;;  %v1642_v63 = vpop.f32.mrb[14].mxu0  ;;  %v1695_v0 = vpop.f32.mrb[14].mxu1  ;;  %1804 = vmatprep.mubr.bf16.mxu0 %v1717_v31  ;;  %1853 = vmatprep.mubr.bf16.mxu1 %v1719_v32  ;;  %v5435_v25 = vcombine.high %v2078_v20, %v2080_v21  ;;  %v6370_v31 = vld [vmem:[%s6228_s20 + $0x20] sm:$0xff] }
 0x578   : > { %v1643_v1 = vadd.f32 %v1642_v63, %v1531_v57  ;;  %v1696_v2 = vadd.f32 %v1695_v0, %v1539_v58  ;;  %v1644_v4 = vpop.f32.mrb[15].mxu0  ;;  %v1697_v5 = vpop.f32.mrb[15].mxu1  ;;  %1805 = vmatmul.mubr.bf16.vlgmr.msra.gmra.mrb[16].mxu0 %v1716_v27  ;;  %1854 = vmatmul.mubr.bf16.vlgmr.msra.gmra.mrb[16].mxu1 %v1718_v30  ;;  %v1708_v11 = vmax.f32 %v1639_v35, 0.0  ;;  %v1710_v12 = vmax.f32 %v1692_v36, 0.0  ;;  %v6373_v32 = vld [vmem:[%s6228_s20 + $0x60] sm:$0xff]  ;;  %v6383_v36 = vld [vmem:[%s6228_s20 + $0x68] sm:$0xff] }
 0x579   : > { %v1645_v7 = vadd.f32 %v1644_v4, %v1535_v59  ;;  %v1698_v9 = vadd.f32 %v1697_v5, %v1543_v60  ;;  %1945 = vmatpush1.bf16.msra.mxu0 %v5418_v45  ;;  %1998 = vmatpush1.bf16.msra.mxu1 %v5420_v48  ;;  %v1709_v13 = vmax.f32 %v1641_v61, 0.0  ;;  %v1711_v14 = vmax.f32 %v1694_v62, 0.0  ;;  %v2075_v45 = vld [vmem:[%s6245_s30 + $0x18] sm:$0xff] }
 0x57a   : > { %v1712_v57 = vmax.f32 %v1643_v1, 0.0  ;;  %v1714_v58 = vmax.f32 %v1696_v2, 0.0  ;;  %1946 = vmatprep.subr.bf16.mxu0 %v5423_v50  ;;  %1999 = vmatprep.subr.bf16.mxu1 %v5425_v53  ;;  %v2077_v48 = vld [vmem:[%s6245_s30 + $0x58] sm:$0xff]  ;;  %v5434_v42 = vcombine.low %v2078_v20, %v2080_v21  ;;  %v5436_v27 = vcombine.low %v2079_v24, %v2081_v19 }
 0x57b   : > { %v1713_v15 = vmax.f32 %v1645_v7, 0.0  ;;  %v1715_v59 = vmax.f32 %v1698_v9, 0.0  ;;  %v5432_v18 = vcombine.low %v2075_v45, %v2077_v48  ;;  %v5433_v43 = vcombine.high %v2075_v45, %v2077_v48 }
 0x57c   : > { %v1720_v60 = vpack.c.bf16 %v1712_v57, %v1708_v11  ;;  %v1722_v16 = vpack.c.bf16 %v1714_v58, %v1710_v12  ;;  %v5437_v30 = vcombine.high %v2079_v24, %v2081_v19  ;;  %v5438_v34 = vcombine.low %v6370_v31, %v6373_v32  ;;  %v1882_v58 = vld [vmem:[%s6323_s1 + $0x4] sm:$0xf] }
 0x57d   : > { %v1721_v39 = vpack.c.bf16 %v1713_v15, %v1709_v13  ;;  %v1723_v38 = vpack.c.bf16 %v1715_v59, %v1711_v14  ;;  %1947 = vmatpush1.bf16.msra.mxu0 %v5422_v6  ;;  %2000 = vmatpush1.bf16.msra.mxu1 %v5424_v10  ;;  %v5439_v35 = vcombine.high %v6370_v31, %v6373_v32  ;;  %v2424_v32 = vld [vmem:[%s6245_s30 + $0x20] sm:$0xff] }
 0x57e   : > { %2122 = vmatprep.subr.bf16.mxu0 %v5431_v47  ;;  %2171 = vmatprep.subr.bf16.mxu1 %v5433_v43  ;;  %v5440_v37 = vcombine.low %v6376_v33, %v6383_v36  ;;  %v5441_v46 = vcombine.high %v6376_v33, %v6383_v36  ;;  %v1887_v59 = vrot.slane %v1882_v58, %v6079_v8  ;;  %v2426_v33 = vld [vmem:[%s6245_s30 + $0x60] sm:$0xff] }
 0x57f   : > { %1812 = vmatprep.mubr.bf16.mxu0 %v1721_v39  ;;  %1861 = vmatprep.mubr.bf16.mxu1 %v1723_v38  ;;  %v1899_v39 = vrot.slane %v1882_v58, %v6333_v56  ;;  %v5451_v36 = vcombine.high %v2424_v32, %v2426_v33 }
 0x580   : > { %1813 = vmatmul.mubr.bf16.gmra.mrb[20].mxu0 %v1720_v60  ;;  %1862 = vmatmul.mubr.bf16.gmra.mrb[20].mxu1 %v1722_v16  ;;  %v1895_v60 = vrot.slane %v1882_v58, %v6326_v51  ;;  %v1891_v16 = vrot.slane %v1882_v58, %v6330_v54 }
 0x581   : > { %1976 = vmatprep.mubr.bf16.mxu0 %v5938_v55  ;;  %2029 = vmatprep.mubr.bf16.mxu1 %v5938_v55 }
 0x588   : > { %5426 = vmatmul.mubr.msk.bf16.vlgmr.msra.gmra.mrb[24].mxu0 %vm1044_vm0, %v6274_v26  ;;  %5428 = vmatmul.mubr.msk.bf16.vlgmr.msra.gmra.mrb[24].mxu1 %vm1044_vm0, %v6274_v26 }
 0x589   : > { %1986 = vmatprep.mubr.bf16.mxu0 %v5938_v55  ;;  %2039 = vmatprep.mubr.bf16.mxu1 %v5938_v55 }
 0x58a   : > { %2123 = vmatpush1.bf16.xpose.msra.mxu0 %v5430_v17  ;;  %2172 = vmatpush1.bf16.xpose.msra.mxu1 %v5432_v18 }
 0x58b   : > { %2124 = vmatprep.subr.bf16.mxu0 %v5435_v25  ;;  %2173 = vmatprep.subr.bf16.mxu1 %v5437_v30 }
 0x590   : > { %5427 = vmatmul.mubr.msk.bf16.gmra.mrb[28].mxu0 %vm1044_vm0, %v6289_v29  ;;  %5429 = vmatmul.mubr.msk.bf16.gmra.mrb[28].mxu1 %vm1044_vm0, %v6289_v29 }
 0x592   : > { %2125 = vmatpush1.bf16.xpose.msra.mxu0 %v5434_v42  ;;  %2174 = vmatpush1.bf16.xpose.msra.mxu1 %v5436_v27 }
 0x593   : > { %2294 = vmatprep.subr.bf16.mxu0 %v5439_v35  ;;  %2347 = vmatprep.subr.bf16.mxu1 %v5441_v46 }
 0x64b   : > { %v1806_v50 = vpop.f32.mrb[16].mxu0  ;;  %v1855_v53 = vpop.f32.mrb[16].mxu1 }
 0x64c   : > { %v6389_v61 = vadd.f32 %v1855_v53, %v1806_v50  ;;  %v1808_v62 = vpop.f32.mrb[17].mxu0  ;;  %v1857_v63 = vpop.f32.mrb[17].mxu1  ;;  %v2228_v53 = vld [vmem:[%s6228_s20 + $0xa0] sm:$0xff] }
 0x64d   : > { %v1809_v0 = vpop.f32.mrb[18].mxu0  ;;  %v1858_v1 = vpop.f32.mrb[18].mxu1  ;;  %v2230_v62 = vld [vmem:[%s6228_s20 + $0xe0] sm:$0xff] }
 0x64e   : > { %v6391_v2 = vadd.f32 %v1858_v1, %v1809_v0  ;;  %v1811_v4 = vpop.f32.mrb[19].mxu0  ;;  %v1860_v5 = vpop.f32.mrb[19].mxu1 }
 0x64f   : > { %v2229_v5 = vld [vmem:[%s6228_s20 + $0xa8] sm:$0xff] }
 0x653   : > { %v1814_v6 = vpop.f32.mrb[20].mxu0  ;;  %v1863_v7 = vpop.f32.mrb[20].mxu1 }
 0x654   : > { %v6393_v9 = vadd.f32 %v1863_v7, %v1814_v6  ;;  %v1816_v10 = vpop.f32.mrb[21].mxu0  ;;  %v1865_v11 = vpop.f32.mrb[21].mxu1  ;;  %v2231_v6 = vld [vmem:[%s6228_s20 + $0xe8] sm:$0xff] }
 0x655   : > { %v1817_v12 = vpop.f32.mrb[22].mxu0  ;;  %v1866_v57 = vpop.f32.mrb[22].mxu1 }
 0x656   : > { %v6396_v13 = vadd.f32 %v1866_v57, %v1817_v12  ;;  %v1819_v14 = vpop.f32.mrb[23].mxu0  ;;  %v1868_v15 = vpop.f32.mrb[23].mxu1 }
 0x65b   : > { %v1978_v38 = vpop.f32.mrb[24].mxu0  ;;  %v2031_v40 = vpop.f32.mrb[24].mxu1 }
 0x65c   : > { %v1979_v41 = vadd.f32 %v1978_v38, %v1887_v59  ;;  %v2032_v45 = vadd.f32 %v2031_v40, %v1895_v60  ;;  %v1980_v47 = vpop.f32.mrb[25].mxu0  ;;  %v2033_v48 = vpop.f32.mrb[25].mxu1 }
 0x65d   : > { %v1981_v17 = vadd.f32 %v1980_v47, %v1891_v16  ;;  %v2034_v18 = vadd.f32 %v2033_v48, %v1899_v39  ;;  %v1982_v43 = vpop.f32.mrb[26].mxu0  ;;  %v2035_v20 = vpop.f32.mrb[26].mxu1 }
 0x65e   : > { %v1983_v21 = vadd.f32 %v1982_v43, %v1887_v59  ;;  %v2036_v24 = vadd.f32 %v2035_v20, %v1895_v60  ;;  %v1984_v25 = vpop.f32.mrb[27].mxu0  ;;  %v2037_v19 = vpop.f32.mrb[27].mxu1  ;;  %v2050_v30 = vmax.f32 %v1979_v41, 0.0  ;;  %v2052_v35 = vmax.f32 %v2032_v45, 0.0 }
 0x65f   : > { %v1985_v42 = vadd.f32 %v1984_v25, %v1891_v16  ;;  %v2038_v27 = vadd.f32 %v2037_v19, %v1899_v39  ;;  %v2051_v63 = vmax.f32 %v1981_v17, 0.0  ;;  %v2053_v0 = vmax.f32 %v2034_v18, 0.0 }
 0x660   : > { %v2054_v46 = vmax.f32 %v1983_v21, 0.0  ;;  %v2056_v50 = vmax.f32 %v2036_v24, 0.0  ;;  %v5443_v41 = vcombine.high %v2228_v53, %v2230_v62  ;;  %v5445_v45 = vcombine.high %v2229_v5, %v2231_v6 }
 0x661   : > { %v2055_v1 = vmax.f32 %v1985_v42, 0.0  ;;  %v2057_v4 = vmax.f32 %v2038_v27, 0.0  ;;  %v5442_v25 = vcombine.low %v2228_v53, %v2230_v62  ;;  %v5444_v27 = vcombine.low %v2229_v5, %v2231_v6  ;;  %v2428_v5 = vld [vmem:[%s6245_s30 + $0xa0] sm:$0xff] }
 0x662   : > { %v2066_v7 = vpack.c.bf16 %v2054_v46, %v2050_v30  ;;  %v2068_v10 = vpack.c.bf16 %v2056_v50, %v2052_v35  ;;  %v2430_v6 = vld [vmem:[%s6245_s30 + $0xe0] sm:$0xff] }
 0x663   : > { %v2067_v11 = vpack.c.bf16 %v2055_v1, %v2051_v63  ;;  %v2069_v12 = vpack.c.bf16 %v2057_v4, %v2053_v0  ;;  %v1988_v57 = vpop.f32.mrb[28].mxu0  ;;  %v2041_v58 = vpop.f32.mrb[28].mxu1  ;;  %v5450_v0 = vcombine.low %v2424_v32, %v2426_v33  ;;  %v2232_v32 = vld [vmem:[%s6323_s1 + $0x8] sm:$0xf] }
 0x664   : > { %v1989_v14 = vadd.f32 %v1988_v57, %v1887_v59  ;;  %v2042_v15 = vadd.f32 %v2041_v58, %v1895_v60  ;;  %v1990_v38 = vpop.f32.mrb[29].mxu0  ;;  %v2043_v40 = vpop.f32.mrb[29].mxu1 }
 0x665   : > { %v1991_v47 = vadd.f32 %v1990_v38, %v1891_v16  ;;  %v2044_v48 = vadd.f32 %v2043_v40, %v1899_v39  ;;  %v1992_v17 = vpop.f32.mrb[30].mxu0  ;;  %v2045_v18 = vpop.f32.mrb[30].mxu1  ;;  %2154 = vmatprep.mubr.bf16.mxu0 %v2067_v11  ;;  %2203 = vmatprep.mubr.bf16.mxu1 %v2069_v12  ;;  %v2431_v11 = vld [vmem:[%s6245_s30 + $0xe8] sm:$0xff]  ;;  %v5454_v12 = vcombine.low %v2428_v5, %v2430_v6  ;;  %v6439_v38 = vld [vmem:[%s6228_s20 + $0x38] sm:$0xff] }
 0x666   : > { %v1993_v43 = vadd.f32 %v1992_v17, %v1887_v59  ;;  %v2046_v20 = vadd.f32 %v2045_v18, %v1895_v60  ;;  %v1994_v21 = vpop.f32.mrb[31].mxu0  ;;  %v2047_v24 = vpop.f32.mrb[31].mxu1  ;;  %2155 = vmatmul.mubr.bf16.vlgmr.msra.gmra.mrb[32].mxu0 %v2066_v7  ;;  %2204 = vmatmul.mubr.bf16.vlgmr.msra.gmra.mrb[32].mxu1 %v2068_v10  ;;  %v2058_v30 = vmax.f32 %v1989_v14, 0.0  ;;  %v2060_v35 = vmax.f32 %v2042_v15, 0.0  ;;  %v2429_v7 = vld [vmem:[%s6245_s30 + $0xa8] sm:$0xff]  ;;  %v6433_v14 = vld [vmem:[%s6228_s20 + $0x30] sm:$0xff] }
 0x667   : > { %v1995_v19 = vadd.f32 %v1994_v21, %v1891_v16  ;;  %v2048_v42 = vadd.f32 %v2047_v24, %v1899_v39  ;;  %2295 = vmatpush1.bf16.msra.mxu0 %v5438_v34  ;;  %2348 = vmatpush1.bf16.msra.mxu1 %v5440_v37  ;;  %v2059_v46 = vmax.f32 %v1991_v47, 0.0  ;;  %v2061_v50 = vmax.f32 %v2044_v48, 0.0  ;;  %v2425_v34 = vld [vmem:[%s6245_s30 + $0x28] sm:$0xff]  ;;  %v6436_v15 = vld [vmem:[%s6228_s20 + $0x70] sm:$0xff]  ;;  %v5397_v17 = vld [vmem:[%s6456_s27] ss:$0 sm:$0xff] }
 0x668   : > { %v2062_v59 = vmax.f32 %v1993_v43, 0.0  ;;  %v2064_v60 = vmax.f32 %v2046_v20, 0.0  ;;  %2296 = vmatprep.subr.bf16.mxu0 %v5443_v41  ;;  %2349 = vmatprep.subr.bf16.mxu1 %v5445_v45  ;;  %v2427_v37 = vld [vmem:[%s6245_s30 + $0x68] sm:$0xff]  ;;  %v5455_v10 = vcombine.high %v2428_v5, %v2430_v6  ;;  %v5456_v57 = vcombine.low %v2429_v7, %v2431_v11  ;;  %v6446_v45 = vld [vmem:[%s6228_s20 + $0x78] sm:$0xff] }
 0x669   : > { %v2063_v53 = vmax.f32 %v1995_v19, 0.0  ;;  %v2065_v16 = vmax.f32 %v2048_v42, 0.0  ;;  %v5452_v1 = vcombine.low %v2425_v34, %v2427_v37  ;;  %v5453_v4 = vcombine.high %v2425_v34, %v2427_v37 }
 0x66a   : > { %v2070_v39 = vpack.c.bf16 %v2062_v59, %v2058_v30  ;;  %v2072_v62 = vpack.c.bf16 %v2064_v60, %v2060_v35  ;;  %v5457_v58 = vcombine.high %v2429_v7, %v2431_v11  ;;  %v5458_v40 = vcombine.low %v6433_v14, %v6436_v15 }
 0x66b   : > { %v2071_v63 = vpack.c.bf16 %v2063_v53, %v2059_v46  ;;  %v2073_v31 = vpack.c.bf16 %v2065_v16, %v2061_v50  ;;  %2297 = vmatpush1.bf16.msra.mxu0 %v5442_v25  ;;  %2350 = vmatpush1.bf16.msra.mxu1 %v5444_v27  ;;  %v5459_v41 = vcombine.high %v6433_v14, %v6436_v15  ;;  %v2774_v15 = vld [vmem:[%s6245_s30 + $0x30] sm:$0xff] }
 0x66c   : > { %2472 = vmatprep.subr.bf16.mxu0 %v5451_v36  ;;  %2521 = vmatprep.subr.bf16.mxu1 %v5453_v4  ;;  %v5460_v47 = vcombine.low %v6439_v38, %v6446_v45  ;;  %v5461_v48 = vcombine.high %v6439_v38, %v6446_v45  ;;  %v1870_v20 = vadd.f32 %v5397_v17, %v6389_v61  ;;  %v2776_v38 = vld [vmem:[%s6245_s30 + $0x70] sm:$0xff] }
 0x66d   : > { %2162 = vmatprep.mubr.bf16.mxu0 %v2071_v63  ;;  %2211 = vmatprep.mubr.bf16.mxu1 %v2073_v31  ;;  %v1871_v27 = vadd.f32 %v5397_v17, %v6391_v2  ;;  %v1872_v16 = vadd.f32 %v5397_v17, %v6393_v9  ;;  %v1873_v33 = vadd.f32 %v5397_v17, %v6396_v13 }
 0x66e   : > { %2163 = vmatmul.mubr.bf16.gmra.mrb[36].mxu0 %v2070_v39  ;;  %2212 = vmatmul.mubr.bf16.gmra.mrb[36].mxu1 %v2072_v62  ;;  %v2245_v4 = vrot.slane %v2232_v32, %v6326_v51  ;;  %v2241_v9 = vrot.slane %v2232_v32, %v6330_v54  ;;  %v2249_v5 = vrot.slane %v2232_v32, %v6333_v56 }
 0x66f   : > { %2326 = vmatprep.mubr.bf16.mxu0 %v5938_v55  ;;  %2379 = vmatprep.mubr.bf16.mxu1 %v5938_v55  ;;  %v5471_v45 = vcombine.high %v2774_v15, %v2776_v38 }
 0x676   : > { %5446 = vmatmul.mubr.msk.bf16.vlgmr.msra.gmra.mrb[40].mxu0 %vm1044_vm0, %v6274_v26  ;;  %5448 = vmatmul.mubr.msk.bf16.vlgmr.msra.gmra.mrb[40].mxu1 %vm1044_vm0, %v6274_v26 }
 0x677   : > { %2336 = vmatprep.mubr.bf16.mxu0 %v5938_v55  ;;  %2389 = vmatprep.mubr.bf16.mxu1 %v5938_v55 }
 0x678   : > { %2473 = vmatpush1.bf16.xpose.msra.mxu0 %v5450_v0  ;;  %2522 = vmatpush1.bf16.xpose.msra.mxu1 %v5452_v1  ;;  %v2237_v1 = vrot.slane %v2232_v32, %v6079_v8 }
 0x679   : > { %2474 = vmatprep.subr.bf16.mxu0 %v5455_v10  ;;  %2523 = vmatprep.subr.bf16.mxu1 %v5457_v58 }
 0x67e   : > { %5447 = vmatmul.mubr.msk.bf16.gmra.mrb[44].mxu0 %vm1044_vm0, %v6289_v29  ;;  %5449 = vmatmul.mubr.msk.bf16.gmra.mrb[44].mxu1 %vm1044_vm0, %v6289_v29 }
 0x680   : > { %2475 = vmatpush1.bf16.xpose.msra.mxu0 %v5454_v12  ;;  %2524 = vmatpush1.bf16.xpose.msra.mxu1 %v5456_v57 }
 0x681   : > { %2644 = vmatprep.subr.bf16.mxu0 %v5459_v41  ;;  %2697 = vmatprep.subr.bf16.mxu1 %v5461_v48 }
 0x739   : > { %v2156_v18 = vpop.f32.mrb[32].mxu0  ;;  %v2205_v43 = vpop.f32.mrb[32].mxu1 }
 0x73a   : > { %v2206_v21 = vadd.f32 %v2205_v43, %v2156_v18  ;;  %v2158_v24 = vpop.f32.mrb[33].mxu0  ;;  %v2207_v25 = vpop.f32.mrb[33].mxu1 }
 0x73b   : > { %v2159_v19 = vpop.f32.mrb[34].mxu0  ;;  %v2208_v42 = vpop.f32.mrb[34].mxu1 }
 0x73c   : > { %v6461_v30 = vadd.f32 %v2206_v21, %v1870_v20  ;;  %v2209_v35 = vadd.f32 %v2208_v42, %v2159_v19  ;;  %v2161_v59 = vpop.f32.mrb[35].mxu0  ;;  %v2210_v60 = vpop.f32.mrb[35].mxu1 }
 0x73d   : > { %v2580_v59 = vld [vmem:[%s6228_s20 + $0xf0] sm:$0xff] }
 0x73e   : > { %v6463_v46 = vadd.f32 %v2209_v35, %v1871_v27  ;;  %v2578_v35 = vld [vmem:[%s6228_s20 + $0xb0] sm:$0xff] }
 0x741   : > { %v2164_v50 = vpop.f32.mrb[36].mxu0  ;;  %v2213_v53 = vpop.f32.mrb[36].mxu1 }
 0x742   : > { %v2214_v61 = vadd.f32 %v2213_v53, %v2164_v50  ;;  %v2166_v39 = vpop.f32.mrb[37].mxu0  ;;  %v2215_v62 = vpop.f32.mrb[37].mxu1 }
 0x743   : > { %v2167_v63 = vpop.f32.mrb[38].mxu0  ;;  %v2216_v31 = vpop.f32.mrb[38].mxu1  ;;  %v2581_v39 = vld [vmem:[%s6228_s20 + $0xf8] sm:$0xff] }
 0x744   : > { %v6468_v2 = vadd.f32 %v2214_v61, %v1872_v16  ;;  %v2217_v34 = vadd.f32 %v2216_v31, %v2167_v63  ;;  %v2169_v36 = vpop.f32.mrb[39].mxu0  ;;  %v2218_v37 = vpop.f32.mrb[39].mxu1  ;;  %v2579_v61 = vld [vmem:[%s6228_s20 + $0xb8] sm:$0xff] }
 0x746   : > { %v6470_v0 = vadd.f32 %v2217_v34, %v1873_v33 }
 0x749   : > { %v2328_v6 = vpop.f32.mrb[40].mxu0  ;;  %v2381_v7 = vpop.f32.mrb[40].mxu1 }
 0x74a   : > { %v2329_v10 = vadd.f32 %v2328_v6, %v2237_v1  ;;  %v2382_v11 = vadd.f32 %v2381_v7, %v2245_v4  ;;  %v2330_v13 = vpop.f32.mrb[41].mxu0  ;;  %v2383_v12 = vpop.f32.mrb[41].mxu1 }
 0x74b   : > { %v2331_v57 = vadd.f32 %v2330_v13, %v2241_v9  ;;  %v2384_v58 = vadd.f32 %v2383_v12, %v2249_v5  ;;  %v2332_v41 = vpop.f32.mrb[42].mxu0  ;;  %v2385_v48 = vpop.f32.mrb[42].mxu1 }
 0x74c   : > { %v2333_v17 = vadd.f32 %v2332_v41, %v2237_v1  ;;  %v2386_v18 = vadd.f32 %v2385_v48, %v2245_v4  ;;  %v2334_v43 = vpop.f32.mrb[43].mxu0  ;;  %v2387_v20 = vpop.f32.mrb[43].mxu1  ;;  %v2400_v25 = vmax.f32 %v2329_v10, 0.0  ;;  %v2402_v19 = vmax.f32 %v2382_v11, 0.0 }
 0x74d   : > { %v2335_v21 = vadd.f32 %v2334_v43, %v2241_v9  ;;  %v2388_v24 = vadd.f32 %v2387_v20, %v2249_v5  ;;  %v2401_v60 = vmax.f32 %v2331_v57, 0.0  ;;  %v2403_v50 = vmax.f32 %v2384_v58, 0.0 }
 0x74e   : > { %v2404_v42 = vmax.f32 %v2333_v17, 0.0  ;;  %v2406_v27 = vmax.f32 %v2386_v18, 0.0  ;;  %v5463_v10 = vcombine.high %v2578_v35, %v2580_v59  ;;  %v5465_v11 = vcombine.high %v2579_v61, %v2581_v39 }
 0x74f   : > { %v2405_v53 = vmax.f32 %v2335_v21, 0.0  ;;  %v2407_v16 = vmax.f32 %v2388_v24, 0.0  ;;  %v5462_v43 = vcombine.low %v2578_v35, %v2580_v59  ;;  %v5464_v24 = vcombine.low %v2579_v61, %v2581_v39  ;;  %v2780_v61 = vld [vmem:[%s6245_s30 + $0xf0] sm:$0xff]  ;;  %v2779_v39 = vld [vmem:[%s6245_s30 + $0xb8] sm:$0xff] }
 0x750   : > { %v2416_v62 = vpack.c.bf16 %v2404_v42, %v2400_v25  ;;  %v2418_v63 = vpack.c.bf16 %v2406_v27, %v2402_v19 }
 0x751   : > { %v2417_v31 = vpack.c.bf16 %v2405_v53, %v2401_v60  ;;  %v2419_v32 = vpack.c.bf16 %v2407_v16, %v2403_v50  ;;  %v2338_v33 = vpop.f32.mrb[44].mxu0  ;;  %v2391_v34 = vpop.f32.mrb[44].mxu1  ;;  %v2778_v16 = vld [vmem:[%s6245_s30 + $0xb0] sm:$0xff] }
 0x752   : > { %v2339_v36 = vadd.f32 %v2338_v33, %v2237_v1  ;;  %v2392_v37 = vadd.f32 %v2391_v34, %v2245_v4  ;;  %v2340_v6 = vpop.f32.mrb[45].mxu0  ;;  %v2393_v7 = vpop.f32.mrb[45].mxu1 }
 0x753   : > { %v2341_v13 = vadd.f32 %v2340_v6, %v2241_v9  ;;  %v2394_v12 = vadd.f32 %v2393_v7, %v2249_v5  ;;  %v2342_v57 = vpop.f32.mrb[46].mxu0  ;;  %v2395_v58 = vpop.f32.mrb[46].mxu1  ;;  %2504 = vmatprep.mubr.bf16.mxu0 %v2417_v31  ;;  %2553 = vmatprep.mubr.bf16.mxu1 %v2419_v32  ;;  %v5474_v31 = vcombine.low %v2778_v16, %v2780_v61 }
 0x754   : > { %v2343_v41 = vadd.f32 %v2342_v57, %v2237_v1  ;;  %v2396_v48 = vadd.f32 %v2395_v58, %v2245_v4  ;;  %v2344_v17 = vpop.f32.mrb[47].mxu0  ;;  %v2397_v18 = vpop.f32.mrb[47].mxu1  ;;  %2505 = vmatmul.mubr.bf16.vlgmr.msra.gmra.mrb[48].mxu0 %v2416_v62  ;;  %2554 = vmatmul.mubr.bf16.vlgmr.msra.gmra.mrb[48].mxu1 %v2418_v63  ;;  %v2408_v25 = vmax.f32 %v2339_v36, 0.0  ;;  %v2410_v19 = vmax.f32 %v2392_v37, 0.0  ;;  %v2781_v63 = vld [vmem:[%s6245_s30 + $0xf8] sm:$0xff] }
 0x755   : > { %v2345_v20 = vadd.f32 %v2344_v17, %v2241_v9  ;;  %v2398_v21 = vadd.f32 %v2397_v18, %v2249_v5  ;;  %2645 = vmatpush1.bf16.msra.mxu0 %v5458_v40  ;;  %2698 = vmatpush1.bf16.msra.mxu1 %v5460_v47  ;;  %v2409_v42 = vmax.f32 %v2341_v13, 0.0  ;;  %v2411_v27 = vmax.f32 %v2394_v12, 0.0  ;;  %v2775_v40 = vld [vmem:[%s6245_s30 + $0x38] sm:$0xff] }
 0x756   : > { %v2412_v1 = vmax.f32 %v2343_v41, 0.0  ;;  %v2414_v4 = vmax.f32 %v2396_v48, 0.0  ;;  %2646 = vmatprep.subr.bf16.mxu0 %v5463_v10  ;;  %2699 = vmatprep.subr.bf16.mxu1 %v5465_v11  ;;  %v2777_v47 = vld [vmem:[%s6245_s30 + $0x78] sm:$0xff]  ;;  %v5475_v62 = vcombine.high %v2778_v16, %v2780_v61  ;;  %v5477_v32 = vcombine.high %v2779_v39, %v2781_v63 }
 0x757   : > { %v2413_v35 = vmax.f32 %v2345_v20, 0.0  ;;  %v2415_v9 = vmax.f32 %v2398_v21, 0.0  ;;  %v5472_v50 = vcombine.low %v2775_v40, %v2777_v47  ;;  %v5473_v53 = vcombine.high %v2775_v40, %v2777_v47 }
 0x758   : > { %v2420_v5 = vpack.c.bf16 %v2412_v1, %v2408_v25  ;;  %v2422_v59 = vpack.c.bf16 %v2414_v4, %v2410_v19 }
 0x759   : > { %v2421_v60 = vpack.c.bf16 %v2413_v35, %v2409_v42  ;;  %v2423_v14 = vpack.c.bf16 %v2415_v9, %v2411_v27  ;;  %2647 = vmatpush1.bf16.msra.mxu0 %v5462_v43  ;;  %2700 = vmatpush1.bf16.msra.mxu1 %v5464_v24  ;;  %v2582_v24 = vld [vmem:[%s6323_s1 + $0xc] sm:$0xf] }
 0x75a   : > { %2822 = vmatprep.subr.bf16.mxu0 %v5471_v45  ;;  %2871 = vmatprep.subr.bf16.mxu1 %v5473_v53  ;;  %v2595_v42 = vrot.slane %v2582_v24, %v6326_v51  ;;  %v2591_v27 = vrot.slane %v2582_v24, %v6330_v54  ;;  %v2599_v35 = vrot.slane %v2582_v24, %v6333_v56 }
 0x75b   : > { %2512 = vmatprep.mubr.bf16.mxu0 %v2421_v60  ;;  %2561 = vmatprep.mubr.bf16.mxu1 %v2423_v14 }
 0x75c   : > { %2513 = vmatmul.mubr.bf16.gmra.mrb[52].mxu0 %v2420_v5  ;;  %2562 = vmatmul.mubr.bf16.gmra.mrb[52].mxu1 %v2422_v59 }
 0x75d   : > { %2676 = vmatprep.mubr.bf16.mxu0 %v5938_v55  ;;  %2729 = vmatprep.mubr.bf16.mxu1 %v5938_v55 }
 0x764   : > { %5466 = vmatmul.mubr.msk.bf16.vlgmr.msra.gmra.mrb[56].mxu0 %vm1044_vm0, %v6274_v26  ;;  %5468 = vmatmul.mubr.msk.bf16.vlgmr.msra.gmra.mrb[56].mxu1 %vm1044_vm0, %v6274_v26  ;;  %v5470_v26 = vcombine.low %v2774_v15, %v2776_v38 }
 0x765   : > { %2686 = vmatprep.mubr.bf16.mxu0 %v5938_v55  ;;  %2739 = vmatprep.mubr.bf16.mxu1 %v5938_v55 }
 0x766   : > { %2823 = vmatpush1.bf16.xpose.msra.mxu0 %v5470_v26  ;;  %2872 = vmatpush1.bf16.xpose.msra.mxu1 %v5472_v50 }
 0x767   : > { %2824 = vmatprep.subr.bf16.mxu0 %v5475_v62  ;;  %2873 = vmatprep.subr.bf16.mxu1 %v5477_v32 }
 0x76c   : > { %5467 = vmatmul.mubr.msk.bf16.gmra.mrb[60].mxu0 %vm1044_vm0, %v6289_v29  ;;  %5469 = vmatmul.mubr.msk.bf16.gmra.mrb[60].mxu1 %vm1044_vm0, %v6289_v29  ;;  %v5476_v29 = vcombine.low %v2779_v39, %v2781_v63 }
 0x76e   : > { %2825 = vmatpush1.bf16.xpose.msra.mxu0 %v5474_v31  ;;  %2874 = vmatpush1.bf16.xpose.msra.mxu1 %v5476_v29 }
 0x76f   : > { %5813 = vmatprep.subr.bf16.mxu1 %v6113_v49 }
 0x827   : > { %v2506_v33 = vpop.f32.mrb[48].mxu0  ;;  %v2555_v34 = vpop.f32.mrb[48].mxu1 }
 0x828   : > { %v2556_v36 = vadd.f32 %v2555_v34, %v2506_v33  ;;  %v2508_v37 = vpop.f32.mrb[49].mxu0  ;;  %v2557_v6 = vpop.f32.mrb[49].mxu1 }
 0x829   : > { %v2509_v7 = vpop.f32.mrb[50].mxu0  ;;  %v2558_v10 = vpop.f32.mrb[50].mxu1 }
 0x82a   : > { %v6508_v11 = vadd.f32 %v2556_v36, %v6461_v30  ;;  %v2559_v13 = vadd.f32 %v2558_v10, %v2509_v7  ;;  %v2511_v12 = vpop.f32.mrb[51].mxu0  ;;  %v2560_v57 = vpop.f32.mrb[51].mxu1 }
 0x82c   : > { %v6511_v58 = vadd.f32 %v2559_v13, %v6463_v46  ;;  %v2587_v46 = vrot.slane %v2582_v24, %v6079_v8 }
 0x82f   : > { %v2514_v41 = vpop.f32.mrb[52].mxu0  ;;  %v2563_v48 = vpop.f32.mrb[52].mxu1 }
 0x830   : > { %v2564_v17 = vadd.f32 %v2563_v48, %v2514_v41  ;;  %v2516_v18 = vpop.f32.mrb[53].mxu0  ;;  %v2565_v43 = vpop.f32.mrb[53].mxu1 }
 0x831   : > { %v2517_v20 = vpop.f32.mrb[54].mxu0  ;;  %v2566_v21 = vpop.f32.mrb[54].mxu1 }
 0x832   : > { %v6515_v25 = vadd.f32 %v2564_v17, %v6468_v2  ;;  %v2567_v19 = vadd.f32 %v2566_v21, %v2517_v20  ;;  %v2519_v30 = vpop.f32.mrb[55].mxu0  ;;  %v2568_v1 = vpop.f32.mrb[55].mxu1 }
 0x834   : > { %v6518_v4 = vadd.f32 %v2567_v19, %v6470_v0 }
 0x837   : > { %v2678_v9 = vpop.f32.mrb[56].mxu0  ;;  %v2731_v5 = vpop.f32.mrb[56].mxu1 }
 0x838   : > { %v2679_v59 = vadd.f32 %v2678_v9, %v2587_v46  ;;  %v2732_v60 = vadd.f32 %v2731_v5, %v2595_v42  ;;  %v2680_v2 = vpop.f32.mrb[57].mxu0  ;;  %v2733_v14 = vpop.f32.mrb[57].mxu1 }
 0x839   : > { %v2681_v15 = vadd.f32 %v2680_v2, %v2591_v27  ;;  %v2734_v38 = vadd.f32 %v2733_v14, %v2599_v35  ;;  %v2682_v40 = vpop.f32.mrb[58].mxu0  ;;  %v2735_v45 = vpop.f32.mrb[58].mxu1 }
 0x83a   : > { %v2683_v0 = vadd.f32 %v2682_v40, %v2587_v46  ;;  %v2736_v47 = vadd.f32 %v2735_v45, %v2595_v42  ;;  %v2684_v26 = vpop.f32.mrb[59].mxu0  ;;  %v2737_v50 = vpop.f32.mrb[59].mxu1  ;;  %v2750_v61 = vmax.f32 %v2679_v59, 0.0  ;;  %v2752_v39 = vmax.f32 %v2732_v60, 0.0 }
 0x83b   : > { %v2685_v53 = vadd.f32 %v2684_v26, %v2591_v27  ;;  %v2738_v16 = vadd.f32 %v2737_v50, %v2599_v35  ;;  %v2751_v31 = vmax.f32 %v2681_v15, 0.0  ;;  %v2753_v29 = vmax.f32 %v2734_v38, 0.0 }
 0x83c   : > { %v2754_v62 = vmax.f32 %v2683_v0, 0.0  ;;  %v2756_v63 = vmax.f32 %v2736_v47, 0.0 }
 0x83d   : > { %v2755_v32 = vmax.f32 %v2685_v53, 0.0  ;;  %v2757_v33 = vmax.f32 %v2738_v16, 0.0 }
 0x83e   : > { %v2766_v34 = vpack.c.bf16 %v2754_v62, %v2750_v61  ;;  %v2768_v36 = vpack.c.bf16 %v2756_v63, %v2752_v39 }
 0x83f   : > { %v2767_v37 = vpack.c.bf16 %v2755_v32, %v2751_v31  ;;  %v2769_v6 = vpack.c.bf16 %v2757_v33, %v2753_v29  ;;  %v2688_v7 = vpop.f32.mrb[60].mxu0  ;;  %v2741_v10 = vpop.f32.mrb[60].mxu1 }
 0x840   : > { %v2689_v13 = vadd.f32 %v2688_v7, %v2587_v46  ;;  %v2742_v12 = vadd.f32 %v2741_v10, %v2595_v42  ;;  %v2690_v57 = vpop.f32.mrb[61].mxu0  ;;  %v2743_v41 = vpop.f32.mrb[61].mxu1 }
 0x841   : > { %v2691_v48 = vadd.f32 %v2690_v57, %v2591_v27  ;;  %v2744_v17 = vadd.f32 %v2743_v41, %v2599_v35  ;;  %v2692_v18 = vpop.f32.mrb[62].mxu0  ;;  %v2745_v43 = vpop.f32.mrb[62].mxu1  ;;  %2854 = vmatprep.mubr.bf16.mxu0 %v2767_v37  ;;  %2903 = vmatprep.mubr.bf16.mxu1 %v2769_v6 }
 0x842   : > { %v2693_v20 = vadd.f32 %v2692_v18, %v2587_v46  ;;  %v2746_v21 = vadd.f32 %v2745_v43, %v2595_v42  ;;  %v2694_v24 = vpop.f32.mrb[63].mxu0  ;;  %v2747_v19 = vpop.f32.mrb[63].mxu1  ;;  %2855 = vmatmul.mubr.bf16.vlgmr.msra.gmra.mrb[64].mxu0 %v2766_v34  ;;  %2904 = vmatmul.mubr.bf16.vlgmr.msra.gmra.mrb[64].mxu1 %v2768_v36  ;;  %v2758_v9 = vmax.f32 %v2689_v13, 0.0  ;;  %v2760_v5 = vmax.f32 %v2742_v12, 0.0 }
 0x843   : > { %v2695_v30 = vadd.f32 %v2694_v24, %v2591_v27  ;;  %v2748_v1 = vadd.f32 %v2747_v19, %v2599_v35  ;;  %5815 = vmatpush3.bf16.msra.mxu1 %v6113_v49  ;;  %v2759_v2 = vmax.f32 %v2691_v48, 0.0  ;;  %v2761_v14 = vmax.f32 %v2744_v17, 0.0 }
 0x844   : > { %v2762_v59 = vmax.f32 %v2693_v20, 0.0  ;;  %v2764_v60 = vmax.f32 %v2746_v21, 0.0  ;;  %5817 = vmatprep.subr.bf16.mxu1 %v6123_v52 }
 0x845   : > { %v2763_v15 = vmax.f32 %v2695_v30, 0.0  ;;  %v2765_v38 = vmax.f32 %v2748_v1, 0.0 }
 0x846   : > { %v2770_v46 = vpack.c.bf16 %v2762_v59, %v2758_v9  ;;  %v2772_v42 = vpack.c.bf16 %v2764_v60, %v2760_v5 }
 0x847   : > { %v2771_v40 = vpack.c.bf16 %v2763_v15, %v2759_v2  ;;  %v2773_v45 = vpack.c.bf16 %v2765_v38, %v2761_v14  ;;  %5819 = vmatpush3.bf16.msra.mxu1 %v6123_v52  ;;  %v5839_v15 = vld [vmem:[%s6056_s19 + $0x10] sm:$0xff]   ;;  %v5840_v38 = vld [vmem:[%s6056_s19 + $0x18] sm:$0xff]   ;;  %s6549_s19 = scalar_lea.vmem %s6949_s14, %s6126_s25  ;;  %s6973_s25 = smov 64  }
 0x848   : > { %5760 = vmatprep.subr.bf16.mxu0 %v5839_v15 }
 0x849   : > { %2862 = vmatprep.mubr.bf16.mxu0 %v2771_v40  ;;  %2911 = vmatprep.mubr.bf16.mxu1 %v2773_v45 }
 0x84a   : > { %2863 = vmatmul.mubr.bf16.gmra.mrb[68].mxu0 %v2770_v46  ;;  %2912 = vmatmul.mubr.bf16.gmra.mrb[68].mxu1 %v2772_v42 }
 0x84b   : > { %5761 = vmatpush3.bf16.msra.mxu0 %v5839_v15 }
 0x84c   : > { %5762 = vmatprep.subr.bf16.mxu0 %v5840_v38 }
 0x84f   : > { %5763 = vmatpush3.bf16.msra.mxu0 %v5840_v38  ;;  %v5841_v38 = vld [vmem:[%s6157_s21 + $0x10] sm:$0xff]  }
 0x850   : > { %5788 = vmatprep.subr.bf16.mxu0 %v5841_v38 }
 0x915   : > { %v2856_v49 = vpop.f32.mrb[64].mxu0  ;;  %v2905_v27 = vpop.f32.mrb[64].mxu1 }
 0x916   : > { %v2906_v35 = vadd.f32 %v2905_v27, %v2856_v49  ;;  %v2858_v0 = vpop.f32.mrb[65].mxu0  ;;  %v2907_v47 = vpop.f32.mrb[65].mxu1 }
 0x917   : > { %v2859_v26 = vpop.f32.mrb[66].mxu0  ;;  %v2908_v50 = vpop.f32.mrb[66].mxu1 }
 0x918   : > { %v2920_v53 = vadd.f32 %v2906_v35, %v6508_v11  ;;  %v2909_v16 = vadd.f32 %v2908_v50, %v2859_v26  ;;  %v2861_v61 = vpop.f32.mrb[67].mxu0  ;;  %v2910_v39 = vpop.f32.mrb[67].mxu1 }
 0x919   : > { %v5478_v61 = vld [vmem:[%s6549_s19] ss:$0 sm:$0xff] }
 0x91a   : > { %v2921_v62 = vadd.f32 %v2909_v16, %v6511_v58  ;;  %v2924_v52 = vadd.f32 %v2920_v53, %v6267_v22 }
 0x91c   : > { %v2930_v63 = vsel %vm1044_vm0, %v2924_v52, 0.0  ;;  %v2925_v31 = vadd.f32 %v2921_v62, %v6269_v44 }
 0x91d   : > { %v2913_v29 = vpop.f32.mrb[68].mxu1  ;;  %2931 = vadd.xlane.f32.xlu1 %v2930_v63  ;;  %v2864_v32 = vpop.f32.mrb[68].mxu0 }
 0x91e   : > { %v2914_v33 = vadd.f32 %v2913_v29, %v2864_v32  ;;  %v2866_v34 = vpop.f32.mrb[69].mxu0  ;;  %v2915_v36 = vpop.f32.mrb[69].mxu1  ;;  %v2933_v37 = vsel %vm1044_vm0, %v2925_v31, 0.0 }
 0x91f   : > { %v2916_v11 = vpop.f32.mrb[70].mxu1  ;;  %2934 = vadd.xlane.f32.xlu0 %v2933_v37  ;;  %v2867_v6 = vpop.f32.mrb[70].mxu0 }
 0x920   : > { %v2922_v7 = vadd.f32 %v2914_v33, %v6515_v25  ;;  %v2917_v58 = vadd.f32 %v2916_v11, %v2867_v6  ;;  %v2869_v10 = vpop.f32.mrb[71].mxu0  ;;  %v2918_v22 = vpop.f32.mrb[71].mxu1 }
 0x922   : > { %v2923_v13 = vadd.f32 %v2917_v58, %v6518_v4  ;;  %v2926_v44 = vadd.f32 %v2922_v7, %v6285_v28 }
 0x924   : > { %v2936_v12 = vsel %vm1044_vm0, %v2926_v44, 0.0  ;;  %v2927_v57 = vadd.f32 %v2923_v13, %v6283_v23 }
 0x925   : > { %2937 = vadd.xlane.f32.xlu1 %v2936_v12 }
 0x926   : > { %v2939_v41 = vsel %vm1044_vm0, %v2927_v57, 0.0 }
 0x927   : > { %2940 = vadd.xlane.f32.xlu0 %v2939_v41 }
 0x9aa   : > { %v2932_v48 = vpop.xlane.xlu1 %2931 }
 0x9ab   : > { %v2942_v17 = vmul.f32 0.03125, %v2932_v48 }
 0x9ac   : > { %v2935_v18 = vpop.xlane.xlu0 %2934 }
 0x9ad   : > { %v2946_v43 = vsub.f32 %v2924_v52, %v2942_v17  ;;  %v2943_v25 = vmul.f32 0.03125, %v2935_v18 }
 0x9af   : > { %v2947_v20 = vsub.f32 %v2925_v31, %v2943_v25  ;;  %v2950_v21 = vmul.f32 %v2946_v43, %v2946_v43  ;;  %v5479_v31 = vld [vmem:[%s6556_s5] ss:$0 sm:$0xff] }
 0x9b1   : > { %v2954_v24 = vsel %vm1044_vm0, %v2950_v21, 0.0  ;;  %v2951_v4 = vmul.f32 %v2947_v20, %v2947_v20 }
 0x9b2   : > { %2955 = vadd.xlane.f32.xlu1 %v2954_v24  ;;  %v2938_v28 = vpop.xlane.xlu1 %2937 }
 0x9b3   : > { %v2944_v19 = vmul.f32 0.03125, %v2938_v28  ;;  %v2957_v23 = vsel %vm1044_vm0, %v2951_v4, 0.0 }
 0x9b4   : > { %2958 = vadd.xlane.f32.xlu0 %v2957_v23  ;;  %v2941_v30 = vpop.xlane.xlu0 %2940 }
 0x9b5   : > { %v2948_v1 = vsub.f32 %v2926_v44, %v2944_v19  ;;  %v2945_v9 = vmul.f32 0.03125, %v2941_v30  ;;  %v5485_v44 = vld [vmem:[%s6134_s0 + $0x1] ss:$0 sm:$0xff]  ;;  %s5679_s0 = sshll.u32 %s6976_s28, 4 }
 0x9b7   : > { %v2949_v5 = vsub.f32 %v2927_v57, %v2945_v9  ;;  %v2952_v59 = vmul.f32 %v2948_v1, %v2948_v1 }
 0x9b9   : > { %v2960_v60 = vsel %vm1044_vm0, %v2952_v59, 0.0  ;;  %v2953_v2 = vmul.f32 %v2949_v5, %v2949_v5 }
 0x9ba   : > { %2961 = vadd.xlane.f32.xlu1 %v2960_v60 }
 0x9bb   : > { %v2963_v14 = vsel %vm1044_vm0, %v2953_v2, 0.0 }
 0x9bc   : > { %2964 = vadd.xlane.f32.xlu0 %v2963_v14 }
 0xa3f   : > { %v2956_v46 = vpop.xlane.xlu1 %2955 }
 0xa40   : > { %v2966_v42 = vmul.f32 0.03125, %v2956_v46  ;;  %v5842_v46 = vld [vmem:[%s6157_s21 + $0x18] sm:$0xff]  }
 0xa41   : > { %v2959_v40 = vpop.xlane.xlu0 %2958 }
 0xa42   : > { %v2970_v45 = vadd.f32 1e-05, %v2966_v42  ;;  %v2967_v49 = vmul.f32 0.03125, %v2959_v40 }
 0xa44   : > { %5877 = vrsqrt.f32 %v2970_v45  ;;  %v2971_v27 = vadd.f32 1e-05, %v2967_v49 }
 0xa46   : > { %5879 = vrsqrt.f32 %v2971_v27 }
 0xa47   : > { %v2962_v35 = vpop.xlane.xlu1 %2961 }
 0xa48   : > { %v2968_v0 = vmul.f32 0.03125, %v2962_v35 }
 0xa49   : > { %v2965_v47 = vpop.xlane.xlu0 %2964 }
 0xa4a   : > { %v2972_v26 = vadd.f32 1e-05, %v2968_v0  ;;  %v2969_v50 = vmul.f32 0.03125, %v2965_v47 }
 0xa4c   : > { %5881 = vrsqrt.f32 %v2972_v26  ;;  %v2973_v53 = vadd.f32 1e-05, %v2969_v50 }
 0xa4e   : > { %v5878_v16 = vpop.eup %5877  ;;  %5883 = vrsqrt.f32 %v2973_v53 }
 0xa4f   : > { %v2978_v39 = vmul.f32 %v5878_v16, %v2946_v43 }
 0xa50   : > { %v5880_v62 = vpop.eup %5879 }
 0xa51   : > { %v2979_v52 = vmul.f32 %v5880_v62, %v2947_v20  ;;  %v2988_v63 = vmul.f32 %v5478_v61, %v2978_v39 }
 0xa53   : > { %v2989_v29 = vmul.f32 %v5478_v61, %v2979_v52  ;;  %v6559_v32 = vadd.f32 %v5479_v31, %v2988_v63 }
 0xa55   : > { %v6561_v33 = vadd.f32 %v5479_v31, %v2989_v29 }
 0xa56   : > { %v5882_v34 = vpop.eup %5881 }
 0xa57   : > { %v2980_v36 = vmul.f32 %v5882_v34, %v2948_v1  ;;  %v3002_v37 = vpack.c.bf16 %v6561_v33, %v6559_v32 }
 0xa58   : > { %v5884_v11 = vpop.eup %5883 }
 0xa59   : > { %v2990_v6 = vmul.f32 %v5478_v61, %v2980_v36  ;;  %v2981_v7 = vmul.f32 %v5884_v11, %v2949_v5  ;;  %5764 = vmatprep.mubr.msk.bf16.mxu0 %vm1044_vm0, %v3002_v37 }
 0xa5b   : > { %v2991_v58 = vmul.f32 %v5478_v61, %v2981_v7  ;;  %v6566_v10 = vadd.f32 %v5479_v31, %v2990_v6 }
 0xa5d   : > { %v6568_v22 = vadd.f32 %v5479_v31, %v2991_v58 }
 0xa5f   : > { %v3003_v13 = vpack.c.bf16 %v6568_v22, %v6566_v10 }
 0xa61   : > { %5765 = vmatmul.mubr.msk.bf16.vlgmr.msra.gmra.mrb[72].mxu0 %vm1044_vm0, %v3003_v13 }
 0xa62   : > { %5789 = vmatpush3.bf16.msra.mxu0 %v5841_v38 }
 0xa63   : > { %5790 = vmatprep.subr.bf16.mxu0 %v5842_v46 }
 0xa66   : > { %5791 = vmatpush3.bf16.msra.mxu0 %v5842_v46 }
 0xb34   : > { %v5766_v12 = vpop.f32.mrb[72].mxu0 }
 0xb35   : > { %v3069_v57 = vpop.f32.mrb[73].mxu0  ;;  %v3078_v43 = vadd.f32 %v5766_v12, %v5485_v44 }
 0xb36   : > { %v3070_v41 = vadd.f32 %v5485_v44, %v3069_v57  ;;  %v5767_v48 = vpop.f32.mrb[74].mxu0 }
 0xb37   : > { %v3072_v17 = vpop.f32.mrb[75].mxu0  ;;  %v3081_v25 = vadd.f32 %v5767_v48, %v5485_v44  ;;  %v3086_v1 = vmul.f32 0.5, %v3078_v43 }
 0xb38   : > { %v3073_v18 = vadd.f32 %v5485_v44, %v3072_v17  ;;  %3092 = vrot.lane.b32.xlu1 %v3070_v41, %s6972_s3  ;;  %v3084_v20 = vmul.f32 0.5, %v3070_v41 }
 0xb39   : > { %v3087_v60 = vmul.f32 0.5, %v3081_v25 }
 0xb3a   : > { %3094 = vrot.lane.b32.xlu0 %v3073_v18, %s6972_s3  ;;  %v3085_v4 = vmul.f32 0.5, %v3073_v18 }
 0xb3c   : > { %3096 = vrot.lane.b32.xlu1 %v3078_v43, %s6972_s3 }
 0xb3e   : > { %3301 = vrot.lane.b32.xlu0 %v3070_v41, %s6973_s25 }
 0xb40   : > { %3098 = vrot.lane.b32.xlu1 %v3081_v25, %s6972_s3 }
 0xb42   : > { %3305 = vrot.lane.b32.xlu0 %v3078_v43, %s6973_s25 }
 0xb44   : > { %3303 = vrot.lane.b32.xlu1 %v3073_v18, %s6973_s25 }
 0xb48   : > { %3307 = vrot.lane.b32.xlu1 %v3081_v25, %s6973_s25 }
 0xbaa   : > { %v3093_v21 = vpop.permute.xlu1 %3092 }
 0xbab   : > { %v3104_v24 = vmul.f32 %v3093_v21, %v3084_v20  ;;  %v3106_v23 = vmul.f32 %v3093_v21, %v3085_v4 }
 0xbac   : > { %v3095_v28 = vpop.permute.xlu0 %3094 }
 0xbad   : > { %v3105_v19 = vmul.f32 %v3095_v28, %v3084_v20  ;;  %5776 = vmatprep.mubr.msk.f32.mxu1 %vm1044_vm0, %v3104_v24  ;;  %v3107_v9 = vmul.f32 %v3095_v28, %v3085_v4 }
 0xbae   : > { %v3097_v30 = vpop.permute.xlu1 %3096 }
 0xbaf   : > { %5777 = vmatmul.mubr.msk.f32.vlgmr.msra.gmra.mrb[72].mxu1 %vm1044_vm0, %v3105_v19  ;;  %v3108_v5 = vmul.f32 %v3097_v30, %v3086_v1  ;;  %v3110_v14 = vmul.f32 %v3097_v30, %v3087_v60 }
 0xbb0   : > { %5779 = vmatprep.mubr.msk.f32.mxu1 %vm1044_vm0, %v3106_v23 }
 0xbb2   : > { %v3099_v59 = vpop.permute.xlu1 %3098 }
 0xbb3   : > { %5780 = vmatmul.mubr.msk.f32.gmra.mrb[74].mxu1 %vm1044_vm0, %v3107_v9  ;;  %v3109_v2 = vmul.f32 %v3099_v59, %v3086_v1  ;;  %v3111_v15 = vmul.f32 %v3099_v59, %v3087_v60 }
 0xbb4   : > { %5782 = vmatprep.mubr.msk.f32.mxu1 %vm1044_vm0, %v3108_v5 }
 0xbb7   : > { %5783 = vmatmul.mubr.msk.f32.gmra.mrb[76].mxu1 %vm1044_vm0, %v3109_v2 }
 0xbb8   : > { %5785 = vmatprep.mubr.msk.f32.mxu1 %vm1044_vm0, %v3110_v14 }
 0xbbb   : > { %5786 = vmatmul.mubr.msk.f32.gmra.mrb[78].mxu1 %vm1044_vm0, %v3111_v15 }
 0xbbc   : > { %3669 = vmatprep.mubr.bf16.mxu1 %v5938_v55 }
 0xc82   : > { %v5778_v42 = vpop.f32.mrb[72].mxu1 }
 0xc83   : > { %v3242_v40 = vsel %vm1044_vm0, %v5778_v42, -inf  ;;  %v3202_v45 = vpop.f32.mrb[73].mxu1 }
 0xc84   : > { %v3241_v49 = vsel %vm1044_vm0, %v3202_v45, -inf }
 0xc85   : > { %v3243_v27 = vmax.f32 %v3241_v49, %v3242_v40 }
 0xc86   : > { %v5781_v35 = vpop.f32.mrb[74].mxu1 }
 0xc87   : > { %v3253_v0 = vsub.f32 %v3202_v45, %v3243_v27  ;;  %v3254_v47 = vsub.f32 %v5778_v42, %v3243_v27  ;;  %v3245_v26 = vsel %vm1044_vm0, %v5781_v35, -inf  ;;  %v3212_v50 = vpop.f32.mrb[75].mxu1 }
 0xc88   : > { %v3244_v53 = vsel %vm1044_vm0, %v3212_v50, -inf }
 0xc89   : > { %v3261_v16 = vmul.f32 1.442695, %v3253_v0  ;;  %v3263_v61 = vmul.f32 1.442695, %v3254_v47  ;;  %v3246_v39 = vmax.f32 %v3244_v53, %v3245_v26  ;;  %v3304_v0 = vpop.permute.xlu1 %3303 }
 0xc8a   : > { %v5784_v62 = vpop.f32.mrb[76].mxu1 }
 0xc8b   : > { %5885 = vpow2.f32 %v3261_v16  ;;  %v3255_v52 = vsub.f32 %v3212_v50, %v3246_v39  ;;  %v3256_v63 = vsub.f32 %v5781_v35, %v3246_v39  ;;  %v3248_v31 = vsel %vm1044_vm0, %v5784_v62, -inf  ;;  %v3222_v29 = vpop.f32.mrb[77].mxu1  ;;  %v3302_v35 = vpop.permute.xlu0 %3301 }
 0xc8c   : > { %5887 = vpow2.f32 %v3263_v61  ;;  %v3247_v34 = vsel %vm1044_vm0, %v3222_v29, -inf }
 0xc8d   : > { %v3265_v36 = vmul.f32 1.442695, %v3255_v52  ;;  %v3267_v37 = vmul.f32 1.442695, %v3256_v63  ;;  %v3249_v11 = vmax.f32 %v3247_v34, %v3248_v31 }
 0xc8e   : > { %v5787_v6 = vpop.f32.mrb[78].mxu1 }
 0xc8f   : > { %5889 = vpow2.f32 %v3265_v36  ;;  %v3257_v7 = vsub.f32 %v3222_v29, %v3249_v11  ;;  %v3258_v58 = vsub.f32 %v5784_v62, %v3249_v11  ;;  %v3251_v13 = vsel %vm1044_vm0, %v5787_v6, -inf  ;;  %v3232_v44 = vpop.f32.mrb[79].mxu1  ;;  %v3306_v11 = vpop.permute.xlu0 %3305 }
 0xc90   : > { %5891 = vpow2.f32 %v3267_v37  ;;  %v3250_v12 = vsel %vm1044_vm0, %v3232_v44, -inf }
 0xc91   : > { %v3269_v57 = vmul.f32 1.442695, %v3257_v7  ;;  %v3271_v41 = vmul.f32 1.442695, %v3258_v58  ;;  %v3252_v48 = vmax.f32 %v3250_v12, %v3251_v13 }
 0xc93   : > { %5893 = vpow2.f32 %v3269_v57  ;;  %v3259_v17 = vsub.f32 %v3232_v44, %v3252_v48  ;;  %v3260_v18 = vsub.f32 %v5787_v6, %v3252_v48  ;;  %v3308_v6 = vpop.permute.xlu1 %3307 }
 0xc94   : > { %5895 = vpow2.f32 %v3271_v41 }
 0xc95   : > { %v5886_v43 = vpop.eup %5885  ;;  %v3273_v25 = vmul.f32 1.442695, %v3259_v17  ;;  %v3275_v20 = vmul.f32 1.442695, %v3260_v18 }
 0xc96   : > { %v5888_v21 = vpop.eup %5887  ;;  %v3277_v24 = vsel %vm1044_vm0, %v5886_v43, 0.0 }
 0xc97   : > { %v3278_v4 = vsel %vm1044_vm0, %v5888_v21, 0.0  ;;  %5897 = vpow2.f32 %v3273_v25 }
 0xc98   : > { %v3279_v28 = vadd.f32 %v3278_v4, %v3277_v24  ;;  %5899 = vpow2.f32 %v3275_v20 }
 0xc99   : > { %v5890_v19 = vpop.eup %5889 }
 0xc9a   : > { %v5892_v23 = vpop.eup %5891  ;;  %5901 = vrcp.f32 %v3279_v28  ;;  %v3280_v30 = vsel %vm1044_vm0, %v5890_v19, 0.0  ;;  %v5503_v28 = vld [vmem:[%s6191_s24 + $0x1] ss:$0 sm:$0xff]  ;;  %s857_s24 = scalar_lea.vmem %s6951_s16, %s5679_s0 }
 0xc9b   : > { %v3281_v1 = vsel %vm1044_vm0, %v5892_v23, 0.0 }
 0xc9c   : > { %v3282_v9 = vadd.f32 %v3281_v1, %v3280_v30 }
 0xc9d   : > { %v5894_v5 = vpop.eup %5893 }
 0xc9e   : > { %v5896_v59 = vpop.eup %5895  ;;  %5903 = vrcp.f32 %v3282_v9  ;;  %v3283_v60 = vsel %vm1044_vm0, %v5894_v5, 0.0 }
 0xc9f   : > { %v3284_v2 = vsel %vm1044_vm0, %v5896_v59, 0.0 }
 0xca0   : > { %v3285_v14 = vadd.f32 %v3284_v2, %v3283_v60 }
 0xca1   : > { %v5898_v15 = vpop.eup %5897 }
 0xca2   : > { %v5900_v38 = vpop.eup %5899  ;;  %5905 = vrcp.f32 %v3285_v14  ;;  %v3286_v46 = vsel %vm1044_vm0, %v5898_v15, 0.0 }
 0xca3   : > { %v3287_v42 = vsel %vm1044_vm0, %v5900_v38, 0.0 }
 0xca4   : > { %v5902_v40 = vpop.eup %5901  ;;  %v3288_v45 = vadd.f32 %v3287_v42, %v3286_v46 }
 0xca5   : > { %v3293_v49 = vmul.f32 %v5902_v40, %v5886_v43  ;;  %v3294_v27 = vmul.f32 %v5902_v40, %v5888_v21 }
 0xca6   : > { %5907 = vrcp.f32 %v3288_v45 }
 0xca7   : > { %v3313_v47 = vmul.f32 %v3302_v35, %v3293_v49  ;;  %v3314_v26 = vmul.f32 %v3304_v0, %v3294_v27 }
 0xca8   : > { %v5904_v50 = vpop.eup %5903 }
 0xca9   : > { %v3295_v53 = vmul.f32 %v5904_v50, %v5890_v19  ;;  %v3296_v16 = vmul.f32 %v5904_v50, %v5892_v23  ;;  %v3321_v61 = vsel %vm1044_vm0, %v3313_v47, 0.0  ;;  %v3322_v39 = vsel %vm1044_vm0, %v3314_v26, 0.0 }
 0xcaa   : > { %v3323_v62 = vadd.f32 %v3322_v39, %v3321_v61 }
 0xcab   : > { %v3315_v52 = vmul.f32 %v3302_v35, %v3295_v53  ;;  %v3316_v63 = vmul.f32 %v3304_v0, %v3296_v16 }
 0xcac   : > { %v5906_v31 = vpop.eup %5905 }
 0xcad   : > { %v3297_v29 = vmul.f32 %v5906_v31, %v5894_v5  ;;  %v3298_v34 = vmul.f32 %v5906_v31, %v5896_v59  ;;  %v3324_v36 = vsel %vm1044_vm0, %v3315_v52, 0.0  ;;  %v3325_v37 = vsel %vm1044_vm0, %v3316_v63, 0.0 }
 0xcae   : > { %v3326_v7 = vadd.f32 %v3325_v37, %v3324_v36  ;;  %v5517_v36 = vld [vmem:[%s6228_s20 + $0x148] sm:$0xff]  ;;  %v5514_v37 = vld [vmem:[%s6228_s20 + $0x100] sm:$0xff] }
 0xcaf   : > { %v3317_v58 = vmul.f32 %v3306_v11, %v3297_v29  ;;  %v3318_v13 = vmul.f32 %v3308_v6, %v3298_v34  ;;  %v5515_v34 = vld [vmem:[%s6228_s20 + $0x108] sm:$0xff] }
 0xcb0   : > { %v5908_v44 = vpop.eup %5907  ;;  %v3333_v12 = vpack.c.bf16 %v3326_v7, %v3323_v62  ;;  %v5525_v7 = vcombine.low %v5515_v34, %v5517_v36 }
 0xcb1   : > { %v3299_v57 = vmul.f32 %v5908_v44, %v5898_v15  ;;  %v3300_v41 = vmul.f32 %v5908_v44, %v5900_v38  ;;  %v3327_v48 = vsel %vm1044_vm0, %v3317_v58, 0.0  ;;  %v3328_v17 = vsel %vm1044_vm0, %v3318_v13, 0.0  ;;  %v5519_v44 = vld [vmem:[%s6228_s20 + $0x188] sm:$0xff] }
 0xcb2   : > { %5792 = vmatprep.mubr.msk.bf16.mxu0 %vm1044_vm0, %v3333_v12  ;;  %v3329_v18 = vadd.f32 %v3328_v17, %v3327_v48  ;;  %v5521_v12 = vld [vmem:[%s6228_s20 + $0x1c8] sm:$0xff]  ;;  %v5520_v48 = vld [vmem:[%s6228_s20 + $0x1c0] sm:$0xff] }
 0xcb3   : > { %v3319_v43 = vmul.f32 %v3306_v11, %v3299_v57  ;;  %v3320_v25 = vmul.f32 %v3308_v6, %v3300_v41  ;;  %v5526_v11 = vcombine.high %v5515_v34, %v5517_v36  ;;  %v5516_v6 = vld [vmem:[%s6228_s20 + $0x140] sm:$0xff]  ;;  %v5530_v41 = vcombine.high %v5519_v44, %v5521_v12  ;;  %v5540_v34 = vld [vmem:[%s6245_s30 + $0x188] sm:$0xff] }
 0xcb4   : > { %v5523_v58 = vcombine.low %v5514_v37, %v5516_v6  ;;  %v5524_v13 = vcombine.high %v5514_v37, %v5516_v6  ;;  %v5518_v57 = vld [vmem:[%s6228_s20 + $0x180] sm:$0xff]  ;;  %v5529_v17 = vcombine.low %v5519_v44, %v5521_v12  ;;  %v5542_v37 = vld [vmem:[%s6245_s30 + $0x1c8] sm:$0xff]  ;;  %v6704_v44 = vld [vmem:[%s6228_s20 + $0x118] sm:$0xff] }
 0xcb5   : > { %v3330_v20 = vsel %vm1044_vm0, %v3319_v43, 0.0  ;;  %v3331_v21 = vsel %vm1044_vm0, %v3320_v25, 0.0  ;;  %3637 = vmatprep.subr.bf16.mxu1 %v5526_v11  ;;  %v5528_v43 = vcombine.high %v5518_v57, %v5520_v48  ;;  %v5535_v25 = vld [vmem:[%s6245_s30 + $0x100] sm:$0xff]  ;;  %v5549_v6 = vcombine.low %v5540_v34, %v5542_v37 }
 0xcb6   : > { %v3332_v24 = vadd.f32 %v3331_v21, %v3330_v20  ;;  %3638 = vmatpush1.bf16.msra.mxu1 %v5525_v7  ;;  %3584 = vmatprep.subr.bf16.mxu0 %v5524_v13  ;;  %v5537_v20 = vld [vmem:[%s6245_s30 + $0x140] sm:$0xff]  ;;  %v5536_v21 = vld [vmem:[%s6245_s30 + $0x108] sm:$0xff]  ;;  %v5550_v7 = vcombine.high %v5540_v34, %v5542_v37  ;;  %v6701_v13 = vld [vmem:[%s6228_s20 + $0x150] sm:$0xff] }
 0xcb7   : > { %3639 = vmatprep.subr.bf16.mxu1 %v5530_v41  ;;  %v6711_v41 = vld [vmem:[%s6228_s20 + $0x158] sm:$0xff] }
 0xcb8   : > { %v3334_v4 = vpack.c.bf16 %v3332_v24, %v3329_v18  ;;  %v5527_v18 = vcombine.low %v5518_v57, %v5520_v48  ;;  %v5543_v24 = vcombine.low %v5535_v25, %v5537_v20  ;;  %v5562_v48 = vcombine.low %v6704_v44, %v6711_v41 }
 0xcba   : > { %5793 = vmatmul.mubr.msk.bf16.vlgmr.msra.gmra.mrb[76].mxu0 %vm1044_vm0, %v3334_v4  ;;  %3640 = vmatpush1.bf16.msra.mxu1 %v5529_v17  ;;  %v5544_v4 = vcombine.high %v5535_v25, %v5537_v20  ;;  %v5563_v17 = vcombine.high %v6704_v44, %v6711_v41  ;;  %v5574_v44 = vld [vmem:[%s6245_s30 + $0x150] sm:$0xff] }
 0xcbb   : > { %3616 = vmatprep.mubr.bf16.mxu0 %v5938_v55  ;;  %3585 = vmatpush1.bf16.msra.mxu0 %v5523_v58  ;;  %v6698_v58 = vld [vmem:[%s6228_s20 + $0x110] sm:$0xff] }
 0xcbc   : > { %3586 = vmatprep.subr.bf16.mxu0 %v5528_v43  ;;  %v5560_v12 = vcombine.low %v6698_v58, %v6701_v13  ;;  %v5561_v57 = vcombine.high %v6698_v58, %v6701_v13  ;;  %v5572_v13 = vld [vmem:[%s6245_s30 + $0x110] sm:$0xff] }
 0xcbd   : > { %v5581_v41 = vcombine.high %v5572_v13, %v5574_v44 }
 0xcbf   : > { %3587 = vmatpush1.bf16.msra.mxu0 %v5527_v18  ;;  %v5522_v18 = vld [vmem:[%s6323_s1 + $0x10] sm:$0xf] }
 0xcc0   : > { %3763 = vmatprep.subr.bf16.mxu0 %v5544_v4  ;;  %v3521_v43 = vrot.slane %v5522_v18, %v6079_v8  ;;  %v3529_v25 = vrot.slane %v5522_v18, %v6326_v51  ;;  %v3525_v20 = vrot.slane %v5522_v18, %v6330_v54 }
 0xd8d   : > { %v5794_v19 = vpop.f32.mrb[76].mxu0 }
 0xd8e   : > { %v3400_v23 = vpop.f32.mrb[77].mxu0  ;;  %v3409_v30 = vadd.f32 %v5794_v19, %v5503_v28 }
 0xd8f   : > { %v3401_v1 = vadd.f32 %v5503_v28, %v3400_v23  ;;  %v5795_v9 = vpop.f32.mrb[78].mxu0 }
 0xd90   : > { %v3403_v5 = vpop.f32.mrb[79].mxu0  ;;  %v3412_v2 = vadd.f32 %v5795_v9, %v5503_v28  ;;  %v3417_v38 = vadd.f32 %v3409_v30, %v6566_v10 }
 0xd91   : > { %v3404_v59 = vadd.f32 %v5503_v28, %v3403_v5  ;;  %v3415_v60 = vadd.f32 %v3401_v1, %v6559_v32  ;;  %v5538_v28 = vld [vmem:[%s6245_s30 + $0x148] sm:$0xff] }
 0xd92   : > { %v3429_v42 = vsel %vm1044_vm0, %v3417_v38, 0.0  ;;  %v3418_v40 = vadd.f32 %v3412_v2, %v6568_v22  ;;  %v5545_v19 = vcombine.low %v5536_v21, %v5538_v28  ;;  %v5546_v23 = vcombine.high %v5536_v21, %v5538_v28 }
 0xd93   : > { %v3423_v14 = vsel %vm1044_vm0, %v3415_v60, 0.0  ;;  %v3416_v15 = vadd.f32 %v3404_v59, %v6561_v33  ;;  %v3533_v21 = vrot.slane %v5522_v18, %v6333_v56 }
 0xd94   : > { %3424 = vadd.xlane.f32.xlu0 %v3423_v14  ;;  %v3432_v45 = vsel %vm1044_vm0, %v3418_v40, 0.0  ;;  %3812 = vmatprep.subr.bf16.mxu1 %v5546_v23 }
 0xd95   : > { %v3426_v46 = vsel %vm1044_vm0, %v3416_v15, 0.0 }
 0xd96   : > { %3427 = vadd.xlane.f32.xlu1 %v3426_v46 }
 0xd98   : > { %3430 = vadd.xlane.f32.xlu0 %v3429_v42 }
 0xd9c   : > { %3433 = vadd.xlane.f32.xlu0 %v3432_v45  ;;  %v5510_v45 = vld [vmem:[%s6255_s22 + $0x1] ss:$0 sm:$0xff] }
 0xe21   : > { %v3425_v32 = vpop.xlane.xlu0 %3424 }
 0xe22   : > { %v3435_v49 = vmul.f32 0.03125, %v3425_v32 }
 0xe23   : > { %v3428_v27 = vpop.xlane.xlu1 %3427 }
 0xe24   : > { %v6629_v35 = vsub.f32 %v3415_v60, %v3435_v49  ;;  %v3436_v33 = vmul.f32 0.03125, %v3428_v27 }
 0xe25   : > { %v3431_v0 = vpop.xlane.xlu0 %3430 }
 0xe26   : > { %v6631_v10 = vsub.f32 %v3416_v15, %v3436_v33  ;;  %v3437_v47 = vmul.f32 0.03125, %v3431_v0  ;;  %v3443_v26 = vmul.f32 %v6629_v35, %v6629_v35 }
 0xe28   : > { %v6635_v50 = vsub.f32 %v3417_v38, %v3437_v47  ;;  %v3447_v22 = vsel %vm1044_vm0, %v3443_v26, 0.0  ;;  %v3444_v53 = vmul.f32 %v6631_v10, %v6631_v10  ;;  %v5511_v47 = vld [vmem:[%s6262_s4 + $0x1] ss:$0 sm:$0xff] }
 0xe29   : > { %3448 = vadd.xlane.f32.xlu1 %v3447_v22  ;;  %v3434_v16 = vpop.xlane.xlu0 %3433 }
 0xe2a   : > { %v3438_v61 = vmul.f32 0.03125, %v3434_v16  ;;  %v3450_v39 = vsel %vm1044_vm0, %v3444_v53, 0.0  ;;  %v3445_v62 = vmul.f32 %v6635_v50, %v6635_v50 }
 0xe2b   : > { %3451 = vadd.xlane.f32.xlu0 %v3450_v39 }
 0xe2c   : > { %v6643_v52 = vsub.f32 %v3418_v40, %v3438_v61  ;;  %v3453_v63 = vsel %vm1044_vm0, %v3445_v62, 0.0 }
 0xe2d   : > { %3454 = vadd.xlane.f32.xlu1 %v3453_v63 }
 0xe2e   : > { %v3446_v31 = vmul.f32 %v6643_v52, %v6643_v52 }
 0xe30   : > { %v3456_v29 = vsel %vm1044_vm0, %v3446_v31, 0.0  ;;  %v5539_v31 = vld [vmem:[%s6245_s30 + $0x180] sm:$0xff] }
 0xe31   : > { %3457 = vadd.xlane.f32.xlu0 %v3456_v29  ;;  %v5541_v29 = vld [vmem:[%s6245_s30 + $0x1c0] sm:$0xff] }
 0xe32   : > { %v5548_v36 = vcombine.high %v5539_v31, %v5541_v29  ;;  %v5547_v11 = vcombine.low %v5539_v31, %v5541_v29 }
 0xeb6   : > { %v3449_v30 = vpop.xlane.xlu1 %3448 }
 0xeb7   : > { %v3459_v1 = vmul.f32 0.03125, %v3449_v30 }
 0xeb8   : > { %v3452_v9 = vpop.xlane.xlu0 %3451 }
 0xeb9   : > { %v3463_v5 = vadd.f32 1e-05, %v3459_v1  ;;  %v3460_v59 = vmul.f32 0.03125, %v3452_v9 }
 0xeba   : > { %v3455_v60 = vpop.xlane.xlu1 %3454 }
 0xebb   : > { %5909 = vrsqrt.f32 %v3463_v5  ;;  %v3464_v2 = vadd.f32 1e-05, %v3460_v59  ;;  %v3461_v14 = vmul.f32 0.03125, %v3455_v60 }
 0xebd   : > { %5911 = vrsqrt.f32 %v3464_v2  ;;  %v3465_v15 = vadd.f32 1e-05, %v3461_v14 }
 0xebe   : > { %v3458_v38 = vpop.xlane.xlu0 %3457 }
 0xebf   : > { %5913 = vrsqrt.f32 %v3465_v15  ;;  %v3462_v46 = vmul.f32 0.03125, %v3458_v38 }
 0xec1   : > { %v3466_v42 = vadd.f32 1e-05, %v3462_v46 }
 0xec3   : > { %5915 = vrsqrt.f32 %v3466_v42 }
 0xec5   : > { %v5910_v40 = vpop.eup %5909 }
 0xec6   : > { %v3471_v32 = vmul.f32 %v5910_v40, %v6629_v35 }
 0xec7   : > { %v5912_v49 = vpop.eup %5911 }
 0xec8   : > { %v3481_v27 = vmul.f32 %v5510_v45, %v3471_v32  ;;  %v3472_v33 = vmul.f32 %v5912_v49, %v6631_v10  ;;  %v5555_v49 = vld [vmem:[%s6228_s20 + $0x190] sm:$0xff] }
 0xec9   : > { %v5914_v0 = vpop.eup %5913 }
 0xeca   : > { %v3482_v26 = vmul.f32 %v5510_v45, %v3472_v33  ;;  %v6665_v22 = vadd.f32 %v5511_v47, %v3481_v27  ;;  %v3473_v16 = vmul.f32 %v5914_v0, %v6635_v50  ;;  %v5557_v27 = vld [vmem:[%s6228_s20 + $0x1d0] sm:$0xff] }
 0xecc   : > { %v6667_v53 = vadd.f32 %v5511_v47, %v3482_v26  ;;  %v3483_v10 = vmul.f32 %v5510_v45, %v3473_v16  ;;  %v5556_v16 = vld [vmem:[%s6228_s20 + $0x198] sm:$0xff] }
 0xecd   : > { %v5916_v61 = vpop.eup %5915 }
 0xece   : > { %v6672_v39 = vpack.c.bf16 %v6667_v53, %v6665_v22  ;;  %v3474_v35 = vmul.f32 %v5916_v61, %v6643_v52  ;;  %v6683_v63 = vadd.f32 %v5511_v47, %v3483_v10  ;;  %v5558_v61 = vld [vmem:[%s6228_s20 + $0x1d8] sm:$0xff] }
 0xed0   : > { %v3484_v62 = vmul.f32 %v5510_v45, %v3474_v35  ;;  %5531 = vmatmul.mubr.msk.bf16.vlgmr.msra.gmra.mrb[80].mxu0 %vm1044_vm0, %v6672_v39  ;;  %5533 = vmatmul.mubr.msk.bf16.vlgmr.msra.gmra.mrb[80].mxu1 %vm1044_vm0, %v6672_v39 }
 0xed1   : > { %3626 = vmatprep.mubr.bf16.mxu0 %v5938_v55  ;;  %3679 = vmatprep.mubr.bf16.mxu1 %v5938_v55 }
 0xed2   : > { %v6681_v50 = vadd.f32 %v5511_v47, %v3484_v62  ;;  %3764 = vmatpush1.bf16.xpose.msra.mxu0 %v5543_v24  ;;  %3813 = vmatpush1.bf16.xpose.msra.mxu1 %v5545_v19 }
 0xed3   : > { %3765 = vmatprep.subr.bf16.mxu0 %v5548_v36  ;;  %3814 = vmatprep.subr.bf16.mxu1 %v5550_v7  ;;  %v5565_v7 = vcombine.high %v5555_v49, %v5557_v27 }
 0xed4   : > { %v6687_v52 = vpack.c.bf16 %v6681_v50, %v6683_v63 }
 0xed8   : > { %5532 = vmatmul.mubr.msk.bf16.gmra.mrb[84].mxu0 %vm1044_vm0, %v6687_v52  ;;  %5534 = vmatmul.mubr.msk.bf16.gmra.mrb[84].mxu1 %vm1044_vm0, %v6687_v52 }
 0xeda   : > { %3766 = vmatpush1.bf16.xpose.msra.mxu0 %v5547_v11  ;;  %3815 = vmatpush1.bf16.xpose.msra.mxu1 %v5549_v6 }
 0xedb   : > { %3935 = vmatprep.subr.bf16.mxu0 %v5561_v57  ;;  %3988 = vmatprep.subr.bf16.mxu1 %v5563_v17  ;;  %v5567_v57 = vcombine.high %v5556_v16, %v5558_v61 }
 0xfa3   : > { %v3618_v24 = vpop.f32.mrb[80].mxu0  ;;  %v3671_v4 = vpop.f32.mrb[80].mxu1 }
 0xfa4   : > { %v3619_v28 = vadd.f32 %v3618_v24, %v3521_v43  ;;  %v3672_v19 = vadd.f32 %v3671_v4, %v3529_v25  ;;  %v3620_v23 = vpop.f32.mrb[81].mxu0  ;;  %v3673_v30 = vpop.f32.mrb[81].mxu1 }
 0xfa5   : > { %v3621_v1 = vadd.f32 %v3620_v23, %v3525_v20  ;;  %v3674_v9 = vadd.f32 %v3673_v30, %v3533_v21  ;;  %v3622_v5 = vpop.f32.mrb[82].mxu0  ;;  %v3675_v59 = vpop.f32.mrb[82].mxu1 }
 0xfa6   : > { %v3623_v60 = vadd.f32 %v3622_v5, %v3521_v43  ;;  %v3676_v2 = vadd.f32 %v3675_v59, %v3529_v25  ;;  %v3624_v14 = vpop.f32.mrb[83].mxu0  ;;  %v3677_v15 = vpop.f32.mrb[83].mxu1  ;;  %v3690_v42 = vmax.f32 %v3619_v28, 0.0  ;;  %v3692_v40 = vmax.f32 %v3672_v19, 0.0 }
 0xfa7   : > { %v3625_v38 = vadd.f32 %v3624_v14, %v3525_v20  ;;  %v3678_v46 = vadd.f32 %v3677_v15, %v3533_v21  ;;  %v3691_v33 = vmax.f32 %v3621_v1, 0.0  ;;  %v3693_v0 = vmax.f32 %v3674_v9, 0.0 }
 0xfa8   : > { %v3694_v45 = vmax.f32 %v3623_v60, 0.0  ;;  %v3696_v32 = vmax.f32 %v3676_v2, 0.0  ;;  %v5564_v1 = vcombine.low %v5555_v49, %v5557_v27  ;;  %v5566_v59 = vcombine.low %v5556_v16, %v5558_v61  ;;  %v5576_v49 = vld [vmem:[%s6245_s30 + $0x190] sm:$0xff] }
 0xfa9   : > { %v3695_v47 = vmax.f32 %v3625_v38, 0.0  ;;  %v3697_v26 = vmax.f32 %v3678_v46, 0.0  ;;  %v5578_v27 = vld [vmem:[%s6245_s30 + $0x1d0] sm:$0xff] }
 0xfaa   : > { %v3706_v35 = vpack.c.bf16 %v3694_v45, %v3690_v42  ;;  %v3708_v10 = vpack.c.bf16 %v3696_v32, %v3692_v40  ;;  %v5580_v40 = vcombine.low %v5572_v13, %v5574_v44 }
 0xfab   : > { %v3707_v62 = vpack.c.bf16 %v3695_v47, %v3691_v33  ;;  %v3709_v31 = vpack.c.bf16 %v3697_v26, %v3693_v0  ;;  %v3628_v29 = vpop.f32.mrb[84].mxu0  ;;  %v3681_v34 = vpop.f32.mrb[84].mxu1  ;;  %v5577_v33 = vld [vmem:[%s6245_s30 + $0x198] sm:$0xff]  ;;  %v5585_v0 = vcombine.high %v5576_v49, %v5578_v27  ;;  %v5584_v26 = vcombine.low %v5576_v49, %v5578_v27 }
 0xfac   : > { %v3629_v36 = vadd.f32 %v3628_v29, %v3521_v43  ;;  %v3682_v37 = vadd.f32 %v3681_v34, %v3529_v25  ;;  %v3630_v11 = vpop.f32.mrb[85].mxu0  ;;  %v3683_v6 = vpop.f32.mrb[85].mxu1  ;;  %v5579_v47 = vld [vmem:[%s6245_s30 + $0x1d8] sm:$0xff]  ;;  %v6766_v34 = vld [vmem:[%s6228_s20 + $0x168] sm:$0xff] }
 0xfad   : > { %v3631_v17 = vadd.f32 %v3630_v11, %v3525_v20  ;;  %v3684_v18 = vadd.f32 %v3683_v6, %v3533_v21  ;;  %v3632_v24 = vpop.f32.mrb[86].mxu0  ;;  %v3685_v4 = vpop.f32.mrb[86].mxu1  ;;  %3795 = vmatprep.mubr.bf16.mxu0 %v3707_v62  ;;  %3844 = vmatprep.mubr.bf16.mxu1 %v3709_v31  ;;  %v5586_v16 = vcombine.low %v5577_v33, %v5579_v47  ;;  %v6759_v62 = vld [vmem:[%s6228_s20 + $0x128] sm:$0xff] }
 0xfae   : > { %v3633_v28 = vadd.f32 %v3632_v24, %v3521_v43  ;;  %v3686_v19 = vadd.f32 %v3685_v4, %v3529_v25  ;;  %v3634_v23 = vpop.f32.mrb[87].mxu0  ;;  %v3687_v30 = vpop.f32.mrb[87].mxu1  ;;  %3796 = vmatmul.mubr.bf16.vlgmr.msra.gmra.mrb[88].mxu0 %v3706_v35  ;;  %3845 = vmatmul.mubr.bf16.vlgmr.msra.gmra.mrb[88].mxu1 %v3708_v10  ;;  %v3698_v60 = vmax.f32 %v3629_v36, 0.0  ;;  %v3700_v2 = vmax.f32 %v3682_v37, 0.0  ;;  %v6753_v35 = vld [vmem:[%s6228_s20 + $0x120] sm:$0xff] }
 0xfaf   : > { %v3635_v9 = vadd.f32 %v3634_v23, %v3525_v20  ;;  %v3688_v5 = vadd.f32 %v3687_v30, %v3533_v21  ;;  %3936 = vmatpush1.bf16.msra.mxu0 %v5560_v12  ;;  %3989 = vmatpush1.bf16.msra.mxu1 %v5562_v48  ;;  %v3699_v14 = vmax.f32 %v3631_v17, 0.0  ;;  %v3701_v15 = vmax.f32 %v3684_v18, 0.0  ;;  %v5573_v12 = vld [vmem:[%s6245_s30 + $0x118] sm:$0xff]  ;;  %v6756_v10 = vld [vmem:[%s6228_s20 + $0x160] sm:$0xff] }
 0xfb0   : > { %v3702_v43 = vmax.f32 %v3633_v28, 0.0  ;;  %v3704_v25 = vmax.f32 %v3686_v19, 0.0  ;;  %3937 = vmatprep.subr.bf16.mxu0 %v5565_v7  ;;  %3990 = vmatprep.subr.bf16.mxu1 %v5567_v57  ;;  %v5575_v48 = vld [vmem:[%s6245_s30 + $0x158] sm:$0xff]  ;;  %v5587_v61 = vcombine.high %v5577_v33, %v5579_v47  ;;  %v5597_v31 = vcombine.low %v6753_v35, %v6756_v10 }
 0xfb1   : > { %v3703_v38 = vmax.f32 %v3635_v9, 0.0  ;;  %v3705_v20 = vmax.f32 %v3688_v5, 0.0  ;;  %v5582_v45 = vcombine.low %v5573_v12, %v5575_v48  ;;  %v5583_v32 = vcombine.high %v5573_v12, %v5575_v48 }
 0xfb2   : > { %v3710_v21 = vpack.c.bf16 %v3702_v43, %v3698_v60  ;;  %v3712_v46 = vpack.c.bf16 %v3704_v25, %v3700_v2  ;;  %v5598_v29 = vcombine.high %v6753_v35, %v6756_v10  ;;  %v5599_v36 = vcombine.low %v6759_v62, %v6766_v34  ;;  %v5559_v2 = vld [vmem:[%s6323_s1 + $0x14] sm:$0xf]  ;;  %v5609_v10 = vld [vmem:[%s6245_s30 + $0x120] sm:$0xff] }
 0xfb3   : > { %v3711_v42 = vpack.c.bf16 %v3703_v38, %v3699_v14  ;;  %v3713_v58 = vpack.c.bf16 %v3705_v20, %v3701_v15  ;;  %3938 = vmatpush1.bf16.msra.mxu0 %v5564_v1  ;;  %3991 = vmatpush1.bf16.msra.mxu1 %v5566_v59  ;;  %v5600_v37 = vcombine.high %v6759_v62, %v6766_v34  ;;  %v5611_v62 = vld [vmem:[%s6245_s30 + $0x160] sm:$0xff] }
 0xfb4   : > { %4113 = vmatprep.subr.bf16.mxu0 %v5581_v41  ;;  %4162 = vmatprep.subr.bf16.mxu1 %v5583_v32  ;;  %v3878_v15 = vrot.slane %v5559_v2, %v6079_v8  ;;  %v3886_v38 = vrot.slane %v5559_v2, %v6326_v51  ;;  %v3882_v20 = vrot.slane %v5559_v2, %v6330_v54 }
 0xfb5   : > { %3803 = vmatprep.mubr.bf16.mxu0 %v3711_v42  ;;  %3852 = vmatprep.mubr.bf16.mxu1 %v3713_v58  ;;  %v5618_v34 = vcombine.high %v5609_v10, %v5611_v62 }
 0xfb6   : > { %3804 = vmatmul.mubr.bf16.gmra.mrb[92].mxu0 %v3710_v21  ;;  %3853 = vmatmul.mubr.bf16.gmra.mrb[92].mxu1 %v3712_v46  ;;  %v3890_v21 = vrot.slane %v5559_v2, %v6333_v56 }
 0xfb7   : > { %3967 = vmatprep.mubr.bf16.mxu0 %v5938_v55  ;;  %4020 = vmatprep.mubr.bf16.mxu1 %v5938_v55 }
 0xfbe   : > { %5568 = vmatmul.mubr.msk.bf16.vlgmr.msra.gmra.mrb[96].mxu0 %vm1044_vm0, %v6672_v39  ;;  %5570 = vmatmul.mubr.msk.bf16.vlgmr.msra.gmra.mrb[96].mxu1 %vm1044_vm0, %v6672_v39 }
 0xfbf   : > { %3977 = vmatprep.mubr.bf16.mxu0 %v5938_v55  ;;  %4030 = vmatprep.mubr.bf16.mxu1 %v5938_v55 }
 0xfc0   : > { %4114 = vmatpush1.bf16.xpose.msra.mxu0 %v5580_v40  ;;  %4163 = vmatpush1.bf16.xpose.msra.mxu1 %v5582_v45 }
 0xfc1   : > { %4115 = vmatprep.subr.bf16.mxu0 %v5585_v0  ;;  %4164 = vmatprep.subr.bf16.mxu1 %v5587_v61 }
 0xfc6   : > { %5569 = vmatmul.mubr.msk.bf16.gmra.mrb[100].mxu0 %vm1044_vm0, %v6687_v52  ;;  %5571 = vmatmul.mubr.msk.bf16.gmra.mrb[100].mxu1 %vm1044_vm0, %v6687_v52 }
 0xfc8   : > { %4116 = vmatpush1.bf16.xpose.msra.mxu0 %v5584_v26  ;;  %4165 = vmatpush1.bf16.xpose.msra.mxu1 %v5586_v16 }
 0xfc9   : > { %4285 = vmatprep.subr.bf16.mxu0 %v5598_v29  ;;  %4338 = vmatprep.subr.bf16.mxu1 %v5600_v37  ;;  %v5592_v37 = vld [vmem:[%s6228_s20 + $0x1a0] sm:$0xff] }
0x1081   : > { %v3797_v11 = vpop.f32.mrb[88].mxu0  ;;  %v3846_v6 = vpop.f32.mrb[88].mxu1 }
0x1082   : > { %v6772_v7 = vadd.f32 %v3846_v6, %v3797_v11  ;;  %v3799_v57 = vpop.f32.mrb[89].mxu0  ;;  %v3848_v17 = vpop.f32.mrb[89].mxu1  ;;  %v5594_v11 = vld [vmem:[%s6228_s20 + $0x1e0] sm:$0xff] }
0x1083   : > { %v3800_v18 = vpop.f32.mrb[90].mxu0  ;;  %v3849_v24 = vpop.f32.mrb[90].mxu1 }
0x1084   : > { %v6774_v4 = vadd.f32 %v3849_v24, %v3800_v18  ;;  %v3802_v28 = vpop.f32.mrb[91].mxu0  ;;  %v3851_v19 = vpop.f32.mrb[91].mxu1  ;;  %v5593_v24 = vld [vmem:[%s6228_s20 + $0x1a8] sm:$0xff] }
0x1085   : > { %v5595_v28 = vld [vmem:[%s6228_s20 + $0x1e8] sm:$0xff] }
0x1089   : > { %v3805_v23 = vpop.f32.mrb[92].mxu0  ;;  %v3854_v30 = vpop.f32.mrb[92].mxu1 }
0x108a   : > { %v6776_v1 = vadd.f32 %v3854_v30, %v3805_v23  ;;  %v3807_v9 = vpop.f32.mrb[93].mxu0  ;;  %v3856_v5 = vpop.f32.mrb[93].mxu1 }
0x108b   : > { %v3808_v59 = vpop.f32.mrb[94].mxu0  ;;  %v3857_v60 = vpop.f32.mrb[94].mxu1 }
0x108c   : > { %v6779_v43 = vadd.f32 %v3857_v60, %v3808_v59  ;;  %v3810_v25 = vpop.f32.mrb[95].mxu0  ;;  %v3859_v14 = vpop.f32.mrb[95].mxu1 }
0x1091   : > { %v3969_v46 = vpop.f32.mrb[96].mxu0  ;;  %v4022_v42 = vpop.f32.mrb[96].mxu1 }
0x1092   : > { %v3970_v58 = vadd.f32 %v3969_v46, %v3878_v15  ;;  %v4023_v13 = vadd.f32 %v4022_v42, %v3886_v38  ;;  %v3971_v44 = vpop.f32.mrb[97].mxu0  ;;  %v4024_v12 = vpop.f32.mrb[97].mxu1  ;;  %v5602_v46 = vcombine.high %v5592_v37, %v5594_v11  ;;  %v5604_v42 = vcombine.high %v5593_v24, %v5595_v28 }
0x1093   : > { %v3972_v41 = vadd.f32 %v3971_v44, %v3882_v20  ;;  %v4025_v48 = vadd.f32 %v4024_v12, %v3890_v21  ;;  %v3973_v40 = vpop.f32.mrb[98].mxu0  ;;  %v4026_v45 = vpop.f32.mrb[98].mxu1 }
0x1094   : > { %v3974_v32 = vadd.f32 %v3973_v40, %v3878_v15  ;;  %v4027_v49 = vadd.f32 %v4026_v45, %v3886_v38  ;;  %v3975_v27 = vpop.f32.mrb[99].mxu0  ;;  %v4028_v33 = vpop.f32.mrb[99].mxu1  ;;  %v4041_v26 = vmax.f32 %v3970_v58, 0.0  ;;  %v4043_v16 = vmax.f32 %v4023_v13, 0.0 }
0x1095   : > { %v3976_v0 = vadd.f32 %v3975_v27, %v3882_v20  ;;  %v4029_v47 = vadd.f32 %v4028_v33, %v3890_v21  ;;  %v4042_v6 = vmax.f32 %v3972_v41, 0.0  ;;  %v4044_v57 = vmax.f32 %v4025_v48, 0.0 }
0x1096   : > { %v4045_v61 = vmax.f32 %v3974_v32, 0.0  ;;  %v4047_v29 = vmax.f32 %v4027_v49, 0.0  ;;  %v5601_v32 = vcombine.low %v5592_v37, %v5594_v11  ;;  %v5603_v33 = vcombine.low %v5593_v24, %v5595_v28  ;;  %v5614_v24 = vld [vmem:[%s6245_s30 + $0x1a8] sm:$0xff] }
0x1097   : > { %v4046_v17 = vmax.f32 %v3976_v0, 0.0  ;;  %v4048_v18 = vmax.f32 %v4029_v47, 0.0  ;;  %v5617_v11 = vcombine.low %v5609_v10, %v5611_v62 }
0x1098   : > { %v4057_v19 = vpack.c.bf16 %v4045_v61, %v4041_v26  ;;  %v4059_v23 = vpack.c.bf16 %v4047_v29, %v4043_v16 }
0x1099   : > { %v4058_v30 = vpack.c.bf16 %v4046_v17, %v4042_v6  ;;  %v4060_v9 = vpack.c.bf16 %v4048_v18, %v4044_v57  ;;  %v3979_v5 = vpop.f32.mrb[100].mxu0  ;;  %v4032_v59 = vpop.f32.mrb[100].mxu1  ;;  %v5613_v17 = vld [vmem:[%s6245_s30 + $0x1a0] sm:$0xff] }
0x109a   : > { %v3980_v60 = vadd.f32 %v3979_v5, %v3878_v15  ;;  %v4033_v2 = vadd.f32 %v4032_v59, %v3886_v38  ;;  %v3981_v25 = vpop.f32.mrb[101].mxu0  ;;  %v4034_v14 = vpop.f32.mrb[101].mxu1  ;;  %v5615_v18 = vld [vmem:[%s6245_s30 + $0x1e0] sm:$0xff]  ;;  %v6816_v5 = vld [vmem:[%s6228_s20 + $0x130] sm:$0xff] }
0x109b   : > { %v3982_v58 = vadd.f32 %v3981_v25, %v3882_v20  ;;  %v4035_v13 = vadd.f32 %v4034_v14, %v3890_v21  ;;  %v3983_v44 = vpop.f32.mrb[102].mxu0  ;;  %v4036_v12 = vpop.f32.mrb[102].mxu1  ;;  %4145 = vmatprep.mubr.bf16.mxu0 %v4058_v30  ;;  %4194 = vmatprep.mubr.bf16.mxu1 %v4060_v9  ;;  %v5622_v28 = vcombine.high %v5613_v17, %v5615_v18  ;;  %v6819_v59 = vld [vmem:[%s6228_s20 + $0x170] sm:$0xff]  ;;  %v6829_v14 = vld [vmem:[%s6228_s20 + $0x178] sm:$0xff] }
0x109c   : > { %v3984_v41 = vadd.f32 %v3983_v44, %v3878_v15  ;;  %v4037_v48 = vadd.f32 %v4036_v12, %v3886_v38  ;;  %v3985_v40 = vpop.f32.mrb[103].mxu0  ;;  %v4038_v45 = vpop.f32.mrb[103].mxu1  ;;  %4146 = vmatmul.mubr.bf16.vlgmr.msra.gmra.mrb[104].mxu0 %v4057_v19  ;;  %4195 = vmatmul.mubr.bf16.vlgmr.msra.gmra.mrb[104].mxu1 %v4059_v23  ;;  %v4049_v0 = vmax.f32 %v3980_v60, 0.0  ;;  %v4051_v47 = vmax.f32 %v4033_v2, 0.0  ;;  %v5616_v19 = vld [vmem:[%s6245_s30 + $0x1e8] sm:$0xff]  ;;  %v6822_v60 = vld [vmem:[%s6228_s20 + $0x138] sm:$0xff] }
0x109d   : > { %v3986_v49 = vadd.f32 %v3985_v40, %v3882_v20  ;;  %v4039_v27 = vadd.f32 %v4038_v45, %v3890_v21  ;;  %4286 = vmatpush1.bf16.msra.mxu0 %v5597_v31  ;;  %4339 = vmatpush1.bf16.msra.mxu1 %v5599_v36  ;;  %v4050_v26 = vmax.f32 %v3982_v58, 0.0  ;;  %v4052_v16 = vmax.f32 %v4035_v13, 0.0  ;;  %v5610_v31 = vld [vmem:[%s6245_s30 + $0x128] sm:$0xff]  ;;  %v5513_v58 = vld [vmem:[%s6456_s27 + $0x1] ss:$0 sm:$0xff]  ;;  %s865_s27 = scalar_lea.vmem %s6953_s18, %s6068_s2 }
0x109e   : > { %v4053_v15 = vmax.f32 %v3984_v41, 0.0  ;;  %v4055_v38 = vmax.f32 %v4037_v48, 0.0  ;;  %4287 = vmatprep.subr.bf16.mxu0 %v5602_v46  ;;  %4340 = vmatprep.subr.bf16.mxu1 %v5604_v42  ;;  %v5612_v36 = vld [vmem:[%s6245_s30 + $0x168] sm:$0xff]  ;;  %v5621_v23 = vcombine.low %v5613_v17, %v5615_v18  ;;  %v5623_v30 = vcombine.low %v5614_v24, %v5616_v19 }
0x109f   : > { %v4054_v61 = vmax.f32 %v3986_v49, 0.0  ;;  %v4056_v20 = vmax.f32 %v4039_v27, 0.0  ;;  %v5619_v6 = vcombine.low %v5610_v31, %v5612_v36  ;;  %v5620_v57 = vcombine.high %v5610_v31, %v5612_v36 }
0x10a0   : > { %v4061_v21 = vpack.c.bf16 %v4053_v15, %v4049_v0  ;;  %v4063_v29 = vpack.c.bf16 %v4055_v38, %v4051_v47  ;;  %v5624_v9 = vcombine.high %v5614_v24, %v5616_v19  ;;  %v5634_v2 = vcombine.low %v6816_v5, %v6819_v59 }
0x10a1   : > { %v4062_v37 = vpack.c.bf16 %v4054_v61, %v4050_v26  ;;  %v4064_v35 = vpack.c.bf16 %v4056_v20, %v4052_v16  ;;  %4288 = vmatpush1.bf16.msra.mxu0 %v5601_v32  ;;  %4341 = vmatpush1.bf16.msra.mxu1 %v5603_v33  ;;  %v5635_v25 = vcombine.high %v6816_v5, %v6819_v59  ;;  %v5646_v59 = vld [vmem:[%s6245_s30 + $0x130] sm:$0xff] }
0x10a2   : > { %4463 = vmatprep.subr.bf16.mxu0 %v5618_v34  ;;  %4512 = vmatprep.subr.bf16.mxu1 %v5620_v57  ;;  %v5636_v46 = vcombine.low %v6822_v60, %v6829_v14  ;;  %v5637_v42 = vcombine.high %v6822_v60, %v6829_v14  ;;  %v3861_v12 = vadd.f32 %v5513_v58, %v6772_v7  ;;  %v5648_v60 = vld [vmem:[%s6245_s30 + $0x170] sm:$0xff] }
0x10a3   : > { %4153 = vmatprep.mubr.bf16.mxu0 %v4062_v37  ;;  %4202 = vmatprep.mubr.bf16.mxu1 %v4064_v35  ;;  %v3862_v49 = vadd.f32 %v5513_v58, %v6774_v4  ;;  %v3863_v16 = vadd.f32 %v5513_v58, %v6776_v1  ;;  %v5596_v37 = vld [vmem:[%s6323_s1 + $0x18] sm:$0xf]  ;;  %v3864_v35 = vadd.f32 %v5513_v58, %v6779_v43 }
0x10a4   : > { %4154 = vmatmul.mubr.bf16.gmra.mrb[108].mxu0 %v4061_v21  ;;  %4203 = vmatmul.mubr.bf16.gmra.mrb[108].mxu1 %v4063_v29  ;;  %v4228_v36 = vrot.slane %v5596_v37, %v6079_v8  ;;  %v4232_v1 = vrot.slane %v5596_v37, %v6330_v54  ;;  %v5655_v14 = vcombine.high %v5646_v59, %v5648_v60 }
0x10a5   : > { %4317 = vmatprep.mubr.bf16.mxu0 %v5938_v55  ;;  %4370 = vmatprep.mubr.bf16.mxu1 %v5938_v55 }
0x10ac   : > { %5605 = vmatmul.mubr.msk.bf16.vlgmr.msra.gmra.mrb[112].mxu0 %vm1044_vm0, %v6672_v39  ;;  %5607 = vmatmul.mubr.msk.bf16.vlgmr.msra.gmra.mrb[112].mxu1 %vm1044_vm0, %v6672_v39 }
0x10ad   : > { %4327 = vmatprep.mubr.bf16.mxu0 %v5938_v55  ;;  %4380 = vmatprep.mubr.bf16.mxu1 %v5938_v55 }
0x10ae   : > { %4464 = vmatpush1.bf16.xpose.msra.mxu0 %v5617_v11  ;;  %4513 = vmatpush1.bf16.xpose.msra.mxu1 %v5619_v6  ;;  %v4236_v11 = vrot.slane %v5596_v37, %v6326_v51  ;;  %v4240_v6 = vrot.slane %v5596_v37, %v6333_v56 }
0x10af   : > { %4465 = vmatprep.subr.bf16.mxu0 %v5622_v28  ;;  %4514 = vmatprep.subr.bf16.mxu1 %v5624_v9 }
0x10b4   : > { %5606 = vmatmul.mubr.msk.bf16.gmra.mrb[116].mxu0 %vm1044_vm0, %v6687_v52  ;;  %5608 = vmatmul.mubr.msk.bf16.gmra.mrb[116].mxu1 %vm1044_vm0, %v6687_v52 }
0x10b6   : > { %4466 = vmatpush1.bf16.xpose.msra.mxu0 %v5621_v23  ;;  %4515 = vmatpush1.bf16.xpose.msra.mxu1 %v5623_v30 }
0x10b7   : > { %4635 = vmatprep.subr.bf16.mxu0 %v5635_v25  ;;  %4688 = vmatprep.subr.bf16.mxu1 %v5637_v42 }
0x116f   : > { %v4147_v13 = vpop.f32.mrb[104].mxu0  ;;  %v4196_v44 = vpop.f32.mrb[104].mxu1 }
0x1170   : > { %v4197_v41 = vadd.f32 %v4196_v44, %v4147_v13  ;;  %v4149_v48 = vpop.f32.mrb[105].mxu0  ;;  %v4198_v40 = vpop.f32.mrb[105].mxu1 }
0x1171   : > { %v4150_v45 = vpop.f32.mrb[106].mxu0  ;;  %v4199_v32 = vpop.f32.mrb[106].mxu1 }
0x1172   : > { %v6838_v27 = vadd.f32 %v4197_v41, %v3861_v12  ;;  %v4200_v33 = vadd.f32 %v4199_v32, %v4150_v45  ;;  %v4152_v0 = vpop.f32.mrb[107].mxu0  ;;  %v4201_v47 = vpop.f32.mrb[107].mxu1  ;;  %v5629_v32 = vld [vmem:[%s6228_s20 + $0x1b0] sm:$0xff] }
0x1174   : > { %v6840_v15 = vadd.f32 %v4200_v33, %v3862_v49  ;;  %v5631_v49 = vld [vmem:[%s6228_s20 + $0x1f0] sm:$0xff] }
0x1177   : > { %v4155_v38 = vpop.f32.mrb[108].mxu0  ;;  %v4204_v26 = vpop.f32.mrb[108].mxu1 }
0x1178   : > { %v4205_v7 = vadd.f32 %v4204_v26, %v4155_v38  ;;  %v4157_v61 = vpop.f32.mrb[109].mxu0  ;;  %v4206_v20 = vpop.f32.mrb[109].mxu1  ;;  %v5630_v26 = vld [vmem:[%s6228_s20 + $0x1b8] sm:$0xff] }
0x1179   : > { %v4158_v21 = vpop.f32.mrb[110].mxu0  ;;  %v4207_v29 = vpop.f32.mrb[110].mxu1 }
0x117a   : > { %v6845_v4 = vadd.f32 %v4205_v7, %v3863_v16  ;;  %v4208_v10 = vadd.f32 %v4207_v29, %v4158_v21  ;;  %v4160_v62 = vpop.f32.mrb[111].mxu0  ;;  %v4209_v31 = vpop.f32.mrb[111].mxu1  ;;  %v5632_v16 = vld [vmem:[%s6228_s20 + $0x1f8] sm:$0xff] }
0x117c   : > { %v6847_v34 = vadd.f32 %v4208_v10, %v3864_v35 }
0x117f   : > { %v4319_v57 = vpop.f32.mrb[112].mxu0  ;;  %v4372_v17 = vpop.f32.mrb[112].mxu1 }
0x1180   : > { %v4320_v18 = vadd.f32 %v4319_v57, %v4228_v36  ;;  %v4373_v24 = vadd.f32 %v4372_v17, %v4236_v11  ;;  %v4321_v43 = vpop.f32.mrb[113].mxu0  ;;  %v4374_v28 = vpop.f32.mrb[113].mxu1  ;;  %v5639_v57 = vcombine.high %v5629_v32, %v5631_v49  ;;  %v5641_v17 = vcombine.high %v5630_v26, %v5632_v16 }
0x1181   : > { %v4322_v19 = vadd.f32 %v4321_v43, %v4232_v1  ;;  %v4375_v23 = vadd.f32 %v4374_v28, %v4240_v6  ;;  %v4323_v30 = vpop.f32.mrb[114].mxu0  ;;  %v4376_v9 = vpop.f32.mrb[114].mxu1 }
0x1182   : > { %v4324_v25 = vadd.f32 %v4323_v30, %v4228_v36  ;;  %v4377_v42 = vadd.f32 %v4376_v9, %v4236_v11  ;;  %v4325_v58 = vpop.f32.mrb[115].mxu0  ;;  %v4378_v13 = vpop.f32.mrb[115].mxu1  ;;  %v4391_v41 = vmax.f32 %v4320_v18, 0.0  ;;  %v4393_v48 = vmax.f32 %v4373_v24, 0.0 }
0x1183   : > { %v4326_v44 = vadd.f32 %v4325_v58, %v4232_v1  ;;  %v4379_v12 = vadd.f32 %v4378_v13, %v4240_v6  ;;  %v4392_v33 = vmax.f32 %v4322_v19, 0.0  ;;  %v4394_v0 = vmax.f32 %v4375_v23, 0.0 }
0x1184   : > { %v4395_v40 = vmax.f32 %v4324_v25, 0.0  ;;  %v4397_v45 = vmax.f32 %v4377_v42, 0.0  ;;  %v5638_v25 = vcombine.low %v5629_v32, %v5631_v49  ;;  %v5640_v13 = vcombine.low %v5630_v26, %v5632_v16  ;;  %v5653_v26 = vld [vmem:[%s6245_s30 + $0x1f8] sm:$0xff] }
0x1185   : > { %v4396_v47 = vmax.f32 %v4326_v44, 0.0  ;;  %v4398_v38 = vmax.f32 %v4379_v12, 0.0 }
0x1186   : > { %v4407_v7 = vpack.c.bf16 %v4395_v40, %v4391_v41  ;;  %v4409_v61 = vpack.c.bf16 %v4397_v45, %v4393_v48 }
0x1187   : > { %v4408_v20 = vpack.c.bf16 %v4396_v47, %v4392_v33  ;;  %v4410_v21 = vpack.c.bf16 %v4398_v38, %v4394_v0  ;;  %v4329_v29 = vpop.f32.mrb[116].mxu0  ;;  %v4382_v37 = vpop.f32.mrb[116].mxu1  ;;  %v5652_v0 = vld [vmem:[%s6245_s30 + $0x1f0] sm:$0xff]  ;;  %v5651_v47 = vld [vmem:[%s6245_s30 + $0x1b8] sm:$0xff] }
0x1188   : > { %v4330_v35 = vadd.f32 %v4329_v29, %v4228_v36  ;;  %v4383_v10 = vadd.f32 %v4382_v37, %v4236_v11  ;;  %v4331_v62 = vpop.f32.mrb[117].mxu0  ;;  %v4384_v31 = vpop.f32.mrb[117].mxu1 }
0x1189   : > { %v4332_v18 = vadd.f32 %v4331_v62, %v4232_v1  ;;  %v4385_v24 = vadd.f32 %v4384_v31, %v4240_v6  ;;  %v4333_v43 = vpop.f32.mrb[118].mxu0  ;;  %v4386_v28 = vpop.f32.mrb[118].mxu1  ;;  %4495 = vmatprep.mubr.bf16.mxu0 %v4408_v20  ;;  %4544 = vmatprep.mubr.bf16.mxu1 %v4410_v21 }
0x118a   : > { %v4334_v19 = vadd.f32 %v4333_v43, %v4228_v36  ;;  %v4387_v23 = vadd.f32 %v4386_v28, %v4236_v11  ;;  %v4335_v30 = vpop.f32.mrb[119].mxu0  ;;  %v4388_v9 = vpop.f32.mrb[119].mxu1  ;;  %4496 = vmatmul.mubr.bf16.vlgmr.msra.gmra.mrb[120].mxu0 %v4407_v7  ;;  %4545 = vmatmul.mubr.bf16.vlgmr.msra.gmra.mrb[120].mxu1 %v4409_v61  ;;  %v4399_v44 = vmax.f32 %v4330_v35, 0.0  ;;  %v4401_v12 = vmax.f32 %v4383_v10, 0.0 }
0x118b   : > { %v4336_v42 = vadd.f32 %v4335_v30, %v4232_v1  ;;  %v4389_v58 = vadd.f32 %v4388_v9, %v4240_v6  ;;  %4636 = vmatpush1.bf16.msra.mxu0 %v5634_v2  ;;  %4689 = vmatpush1.bf16.msra.mxu1 %v5636_v46  ;;  %v4400_v41 = vmax.f32 %v4332_v18, 0.0  ;;  %v4402_v48 = vmax.f32 %v4385_v24, 0.0  ;;  %v5647_v2 = vld [vmem:[%s6245_s30 + $0x138] sm:$0xff] }
0x118c   : > { %v4403_v36 = vmax.f32 %v4334_v19, 0.0  ;;  %v4405_v11 = vmax.f32 %v4387_v23, 0.0  ;;  %4637 = vmatprep.subr.bf16.mxu0 %v5639_v57  ;;  %4690 = vmatprep.subr.bf16.mxu1 %v5641_v17  ;;  %v5649_v46 = vld [vmem:[%s6245_s30 + $0x178] sm:$0xff]  ;;  %v5661_v7 = vcombine.high %v5651_v47, %v5653_v26 }
0x118d   : > { %v4404_v40 = vmax.f32 %v4336_v42, 0.0  ;;  %v4406_v1 = vmax.f32 %v4389_v58, 0.0  ;;  %v5656_v49 = vcombine.low %v5647_v2, %v5649_v46  ;;  %v5657_v33 = vcombine.high %v5647_v2, %v5649_v46 }
0x118e   : > { %v4411_v6 = vpack.c.bf16 %v4403_v36, %v4399_v44  ;;  %v4413_v45 = vpack.c.bf16 %v4405_v11, %v4401_v12 }
0x118f   : > { %v4412_v32 = vpack.c.bf16 %v4404_v40, %v4400_v41  ;;  %v4414_v5 = vpack.c.bf16 %v4406_v1, %v4402_v48  ;;  %4638 = vmatpush1.bf16.msra.mxu0 %v5638_v25  ;;  %4691 = vmatpush1.bf16.msra.mxu1 %v5640_v13  ;;  %v5633_v25 = vld [vmem:[%s6323_s1 + $0x1c] sm:$0xf] }
0x1190   : > { %4813 = vmatprep.subr.bf16.mxu0 %v5655_v14  ;;  %4862 = vmatprep.subr.bf16.mxu1 %v5657_v33  ;;  %v4586_v12 = vrot.slane %v5633_v25, %v6326_v51  ;;  %v4582_v36 = vrot.slane %v5633_v25, %v6330_v54  ;;  %v4590_v11 = vrot.slane %v5633_v25, %v6333_v56 }
0x1191   : > { %4503 = vmatprep.mubr.bf16.mxu0 %v4412_v32  ;;  %4552 = vmatprep.mubr.bf16.mxu1 %v4414_v5 }
0x1192   : > { %4504 = vmatmul.mubr.bf16.gmra.mrb[124].mxu0 %v4411_v6  ;;  %4553 = vmatmul.mubr.bf16.gmra.mrb[124].mxu1 %v4413_v45 }
0x1193   : > { %4667 = vmatprep.mubr.bf16.mxu0 %v5938_v55  ;;  %4720 = vmatprep.mubr.bf16.mxu1 %v5938_v55 }
0x119a   : > { %5642 = vmatmul.mubr.msk.bf16.vlgmr.msra.gmra.mrb[128].mxu0 %vm1044_vm0, %v6672_v39  ;;  %5644 = vmatmul.mubr.msk.bf16.vlgmr.msra.gmra.mrb[128].mxu1 %vm1044_vm0, %v6672_v39  ;;  %v5654_v39 = vcombine.low %v5646_v59, %v5648_v60 }
0x119b   : > { %4677 = vmatprep.mubr.bf16.mxu0 %v5938_v55  ;;  %4730 = vmatprep.mubr.bf16.mxu1 %v5938_v55  ;;  %v5650_v55 = vld [vmem:[%s6245_s30 + $0x1b0] sm:$0xff]  ;;  %s860_s30 = scalar_lea.vmem %s6952_s17, %s6976_s28 }
0x119c   : > { %4814 = vmatpush1.bf16.xpose.msra.mxu0 %v5654_v39  ;;  %4863 = vmatpush1.bf16.xpose.msra.mxu1 %v5656_v49  ;;  %v5659_v38 = vcombine.high %v5650_v55, %v5652_v0  ;;  %v5658_v16 = vcombine.low %v5650_v55, %v5652_v0 }
0x119d   : > { %4864 = vmatprep.subr.bf16.mxu1 %v5661_v7 }
0x119e   : > { %4815 = vmatprep.subr.bf16.mxu0 %v5659_v38 }
0x11a2   : > { %5643 = vmatmul.mubr.msk.bf16.gmra.mrb[132].mxu0 %vm1044_vm0, %v6687_v52  ;;  %5645 = vmatmul.mubr.msk.bf16.gmra.mrb[132].mxu1 %vm1044_vm0, %v6687_v52  ;;  %v5660_v52 = vcombine.low %v5651_v47, %v5653_v26 }
0x11a4   : > { %4816 = vmatpush1.bf16.xpose.msra.mxu0 %v5658_v16  ;;  %4865 = vmatpush1.bf16.xpose.msra.mxu1 %v5660_v52 }
0x125d   : > { %v4497_v61 = vpop.f32.mrb[120].mxu0  ;;  %v4546_v20 = vpop.f32.mrb[120].mxu1 }
0x125e   : > { %v4547_v21 = vadd.f32 %v4546_v20, %v4497_v61  ;;  %v4499_v29 = vpop.f32.mrb[121].mxu0  ;;  %v4548_v37 = vpop.f32.mrb[121].mxu1 }
0x125f   : > { %v4500_v35 = vpop.f32.mrb[122].mxu0  ;;  %v4549_v10 = vpop.f32.mrb[122].mxu1 }
0x1260   : > { %v6884_v62 = vadd.f32 %v4547_v21, %v6838_v27  ;;  %v4550_v31 = vadd.f32 %v4549_v10, %v4500_v35  ;;  %v4502_v57 = vpop.f32.mrb[123].mxu0  ;;  %v4551_v17 = vpop.f32.mrb[123].mxu1 }
0x1262   : > { %v6887_v18 = vadd.f32 %v4550_v31, %v6840_v15  ;;  %v4578_v15 = vrot.slane %v5633_v25, %v6079_v8 }
0x1265   : > { %v4505_v24 = vpop.f32.mrb[124].mxu0  ;;  %v4554_v43 = vpop.f32.mrb[124].mxu1 }
0x1266   : > { %v4555_v28 = vadd.f32 %v4554_v43, %v4505_v24  ;;  %v4507_v19 = vpop.f32.mrb[125].mxu0  ;;  %v4556_v23 = vpop.f32.mrb[125].mxu1 }
0x1267   : > { %v4508_v30 = vpop.f32.mrb[126].mxu0  ;;  %v4557_v9 = vpop.f32.mrb[126].mxu1 }
0x1268   : > { %v6891_v42 = vadd.f32 %v4555_v28, %v6845_v4  ;;  %v4558_v58 = vadd.f32 %v4557_v9, %v4508_v30  ;;  %v4510_v27 = vpop.f32.mrb[127].mxu0  ;;  %v4559_v13 = vpop.f32.mrb[127].mxu1 }
0x126a   : > { %v6894_v44 = vadd.f32 %v4558_v58, %v6847_v34 }
0x126d   : > { %v4669_v41 = vpop.f32.mrb[128].mxu0  ;;  %v4722_v48 = vpop.f32.mrb[128].mxu1 }
0x126e   : > { %v4670_v40 = vadd.f32 %v4669_v41, %v4578_v15  ;;  %v4723_v1 = vadd.f32 %v4722_v48, %v4586_v12  ;;  %v4671_v4 = vpop.f32.mrb[129].mxu0  ;;  %v4724_v6 = vpop.f32.mrb[129].mxu1 }
0x126f   : > { %v4672_v45 = vadd.f32 %v4671_v4, %v4582_v36  ;;  %v4725_v32 = vadd.f32 %v4724_v6, %v4590_v11  ;;  %v4673_v5 = vpop.f32.mrb[130].mxu0  ;;  %v4726_v59 = vpop.f32.mrb[130].mxu1 }
0x1270   : > { %v4674_v34 = vadd.f32 %v4673_v5, %v4578_v15  ;;  %v4727_v60 = vadd.f32 %v4726_v59, %v4586_v12  ;;  %v4675_v2 = vpop.f32.mrb[131].mxu0  ;;  %v4728_v8 = vpop.f32.mrb[131].mxu1  ;;  %v4741_v46 = vmax.f32 %v4670_v40, 0.0  ;;  %v4743_v54 = vmax.f32 %v4723_v1, 0.0 }
0x1271   : > { %v4676_v14 = vadd.f32 %v4675_v2, %v4582_v36  ;;  %v4729_v51 = vadd.f32 %v4728_v8, %v4590_v11  ;;  %v4742_v49 = vmax.f32 %v4672_v45, 0.0  ;;  %v4744_v33 = vmax.f32 %v4725_v32, 0.0 }
0x1272   : > { %v4745_v39 = vmax.f32 %v4674_v34, 0.0  ;;  %v4747_v56 = vmax.f32 %v4727_v60, 0.0 }
0x1273   : > { %v4746_v55 = vmax.f32 %v4676_v14, 0.0  ;;  %v4748_v0 = vmax.f32 %v4729_v51, 0.0 }
0x1274   : > { %v4757_v47 = vpack.c.bf16 %v4745_v39, %v4741_v46  ;;  %v4759_v38 = vpack.c.bf16 %v4747_v56, %v4743_v54 }
0x1275   : > { %v4758_v26 = vpack.c.bf16 %v4746_v55, %v4742_v49  ;;  %v4760_v16 = vpack.c.bf16 %v4748_v0, %v4744_v33  ;;  %v4679_v52 = vpop.f32.mrb[132].mxu0  ;;  %v4732_v7 = vpop.f32.mrb[132].mxu1 }
0x1276   : > { %v4680_v61 = vadd.f32 %v4679_v52, %v4578_v15  ;;  %v4733_v20 = vadd.f32 %v4732_v7, %v4586_v12  ;;  %v4681_v21 = vpop.f32.mrb[133].mxu0  ;;  %v4734_v29 = vpop.f32.mrb[133].mxu1 }
0x1277   : > { %v4682_v37 = vadd.f32 %v4681_v21, %v4582_v36  ;;  %v4735_v35 = vadd.f32 %v4734_v29, %v4590_v11  ;;  %v4683_v10 = vpop.f32.mrb[134].mxu0  ;;  %v4736_v31 = vpop.f32.mrb[134].mxu1  ;;  %4845 = vmatprep.mubr.bf16.mxu0 %v4758_v26  ;;  %4894 = vmatprep.mubr.bf16.mxu1 %v4760_v16 }
0x1278   : > { %v4684_v57 = vadd.f32 %v4683_v10, %v4578_v15  ;;  %v4737_v17 = vadd.f32 %v4736_v31, %v4586_v12  ;;  %v4685_v24 = vpop.f32.mrb[135].mxu0  ;;  %v4738_v43 = vpop.f32.mrb[135].mxu1  ;;  %4846 = vmatmul.mubr.bf16.vlgmr.msra.gmra.mrb[136].mxu0 %v4757_v47  ;;  %4895 = vmatmul.mubr.bf16.vlgmr.msra.gmra.mrb[136].mxu1 %v4759_v38  ;;  %v4749_v23 = vmax.f32 %v4680_v61, 0.0  ;;  %v4751_v30 = vmax.f32 %v4733_v20, 0.0 }
0x1279   : > { %v4686_v28 = vadd.f32 %v4685_v24, %v4582_v36  ;;  %v4739_v19 = vadd.f32 %v4738_v43, %v4590_v11  ;;  %v4750_v58 = vmax.f32 %v4682_v37, 0.0  ;;  %v4752_v27 = vmax.f32 %v4735_v35, 0.0 }
0x127a   : > { %v4753_v9 = vmax.f32 %v4684_v57, 0.0  ;;  %v4755_v25 = vmax.f32 %v4737_v17, 0.0 }
0x127b   : > { %v4754_v13 = vmax.f32 %v4686_v28, 0.0  ;;  %v4756_v41 = vmax.f32 %v4739_v19, 0.0 }
0x127c   : > { %v4761_v48 = vpack.c.bf16 %v4753_v9, %v4749_v23  ;;  %v4763_v40 = vpack.c.bf16 %v4755_v25, %v4751_v30  ;;  %v5843_v30 = vld [vmem:[%s857_s24] sm:$0xff]   ;;  %v5939_v9 = vmov 0.0   ;;  %v5844_v25 = vld [vmem:[%s857_s24 + $0x8] sm:$0xff]  }
0x127d   : > { %v4762_v1 = vpack.c.bf16 %v4754_v13, %v4750_v58  ;;  %v4764_v4 = vpack.c.bf16 %v4756_v41, %v4752_v27  ;;  %5796 = vmatprep.subr.bf16.mxu0 %v5939_v9 }
0x127e   : > { %5797 = vmatpush3.bf16.msra.mxu0 %v5843_v30 }
0x127f   : > { %4853 = vmatprep.mubr.bf16.mxu0 %v4762_v1  ;;  %4902 = vmatprep.mubr.bf16.mxu1 %v4764_v4 }
0x1280   : > { %4854 = vmatmul.mubr.bf16.gmra.mrb[140].mxu0 %v4761_v48  ;;  %4903 = vmatmul.mubr.bf16.gmra.mrb[140].mxu1 %v4763_v40 }
0x1281   : > { %5798 = vmatprep.subr.bf16.mxu0 %v5939_v9  ;;  %5800 = vmatprep.mubr.msk.bf16.mxu0 %vm5940_vm1, %v5939_v9 }
0x1282   : > { %5799 = vmatpush3.bf16.msra.mxu0 %v5844_v25 }
0x134b   : > { %v4847_v15 = vpop.f32.mrb[136].mxu0  ;;  %v4896_v12 = vpop.f32.mrb[136].mxu1 }
0x134c   : > { %v4897_v36 = vadd.f32 %v4896_v12, %v4847_v15  ;;  %v4849_v11 = vpop.f32.mrb[137].mxu0  ;;  %v4898_v6 = vpop.f32.mrb[137].mxu1 }
0x134d   : > { %v4850_v45 = vpop.f32.mrb[138].mxu0  ;;  %v4899_v32 = vpop.f32.mrb[138].mxu1 }
0x134e   : > { %v4911_v5 = vadd.f32 %v4897_v36, %v6884_v62  ;;  %v4900_v59 = vadd.f32 %v4899_v32, %v4850_v45  ;;  %v4852_v34 = vpop.f32.mrb[139].mxu0  ;;  %v4901_v60 = vpop.f32.mrb[139].mxu1  ;;  %v5664_v45 = vld [vmem:[%s6549_s19 + $0x1] ss:$0 sm:$0xff] }
0x134f   : > { %v5665_v34 = vld [vmem:[%s6556_s5 + $0x1] ss:$0 sm:$0xff] }
0x1350   : > { %v4912_v2 = vadd.f32 %v4900_v59, %v6887_v18  ;;  %v4915_v49 = vadd.f32 %v4911_v5, %v6665_v22 }
0x1352   : > { %v4916_v8 = vadd.f32 %v4912_v2, %v6667_v53  ;;  %v4923_v53 = vsel %vm1044_vm0, %v4915_v49, 0.0 }
0x1353   : > { %v4855_v14 = vpop.f32.mrb[140].mxu0  ;;  %v4904_v51 = vpop.f32.mrb[140].mxu1 }
0x1354   : > { %v4905_v46 = vadd.f32 %v4904_v51, %v4855_v14  ;;  %v4857_v54 = vpop.f32.mrb[141].mxu0  ;;  %v4906_v39 = vpop.f32.mrb[141].mxu1  ;;  %v4926_v56 = vsel %vm1044_vm0, %v4916_v8, 0.0 }
0x1355   : > { %v4907_v33 = vpop.f32.mrb[142].mxu1  ;;  %4927 = vadd.xlane.f32.xlu1 %v4926_v56  ;;  %v4858_v55 = vpop.f32.mrb[142].mxu0 }
0x1356   : > { %v4913_v62 = vadd.f32 %v4905_v46, %v6891_v42  ;;  %v4908_v0 = vadd.f32 %v4907_v33, %v4858_v55  ;;  %v4860_v47 = vpop.f32.mrb[143].mxu0  ;;  %v4909_v38 = vpop.f32.mrb[143].mxu1 }
0x1358   : > { %v4914_v18 = vadd.f32 %v4908_v0, %v6894_v44  ;;  %v4917_v26 = vadd.f32 %v4913_v62, %v6683_v63 }
0x1359   : > { %4924 = vadd.xlane.f32.xlu1 %v4923_v53 }
0x135a   : > { %v4929_v16 = vsel %vm1044_vm0, %v4917_v26, 0.0  ;;  %v4918_v52 = vadd.f32 %v4914_v18, %v6681_v50 }
0x135b   : > { %4930 = vadd.xlane.f32.xlu0 %v4929_v16 }
0x135c   : > { %v4932_v22 = vsel %vm1044_vm0, %v4918_v52, 0.0 }
0x135f   : > { %4933 = vadd.xlane.f32.xlu0 %v4932_v22 }
0x13e2   : > { %v4928_v7 = vpop.xlane.xlu1 %4927 }
0x13e3   : > { %v4936_v42 = vmul.f32 0.03125, %v4928_v7 }
0x13e5   : > { %v4940_v61 = vsub.f32 %v4916_v8, %v4936_v42 }
0x13e6   : > { %v4925_v20 = vpop.xlane.xlu1 %4924 }
0x13e7   : > { %v4935_v21 = vmul.f32 0.03125, %v4925_v20  ;;  %v4944_v29 = vmul.f32 %v4940_v61, %v4940_v61 }
0x13e8   : > { %v4931_v44 = vpop.xlane.xlu0 %4930 }
0x13e9   : > { %v4939_v37 = vsub.f32 %v4915_v49, %v4935_v21  ;;  %v4937_v35 = vmul.f32 0.03125, %v4931_v44  ;;  %v4950_v63 = vsel %vm1044_vm0, %v4944_v29, 0.0  ;;  %v5666_v29 = vld [vmem:[%s860_s30] ss:$0 sm:$0xff] }
0x13ea   : > { %4951 = vadd.xlane.f32.xlu1 %v4950_v63  ;;  %v5941_v63 = vmov 1983009808  }
0x13eb   : > { %v4941_v10 = vsub.f32 %v4917_v26, %v4937_v35  ;;  %v4943_v31 = vmul.f32 %v4939_v37, %v4939_v37 }
0x13ec   : > { %v4934_v50 = vpop.xlane.xlu0 %4933 }
0x13ed   : > { %v4938_v57 = vmul.f32 0.03125, %v4934_v50  ;;  %v4947_v17 = vsel %vm1044_vm0, %v4943_v31, 0.0  ;;  %v4945_v24 = vmul.f32 %v4941_v10, %v4941_v10 }
0x13ee   : > { %4948 = vadd.xlane.f32.xlu1 %v4947_v17 }
0x13ef   : > { %v4942_v43 = vsub.f32 %v4918_v52, %v4938_v57  ;;  %v4953_v28 = vsel %vm1044_vm0, %v4945_v24, 0.0 }
0x13f0   : > { %4954 = vadd.xlane.f32.xlu0 %v4953_v28 }
0x13f1   : > { %v4946_v19 = vmul.f32 %v4942_v43, %v4942_v43 }
0x13f3   : > { %v4956_v23 = vsel %vm1044_vm0, %v4946_v19, 0.0 }
0x13f4   : > { %4957 = vadd.xlane.f32.xlu0 %v4956_v23 }
0x1477   : > { %v4952_v58 = vpop.xlane.xlu1 %4951 }
0x1478   : > { %v4960_v27 = vmul.f32 0.03125, %v4952_v58 }
0x147a   : > { %v4964_v13 = vadd.f32 1e-05, %v4960_v27 }
0x147b   : > { %v4949_v41 = vpop.xlane.xlu1 %4948 }
0x147c   : > { %5917 = vrsqrt.f32 %v4964_v13  ;;  %v4959_v48 = vmul.f32 0.03125, %v4949_v41 }
0x147d   : > { %v4955_v40 = vpop.xlane.xlu0 %4954 }
0x147e   : > { %v4963_v1 = vadd.f32 1e-05, %v4959_v48  ;;  %v4961_v4 = vmul.f32 0.03125, %v4955_v40 }
0x1480   : > { %5919 = vrsqrt.f32 %v4963_v1  ;;  %v4965_v15 = vadd.f32 1e-05, %v4961_v4 }
0x1481   : > { %v4958_v12 = vpop.xlane.xlu0 %4957 }
0x1482   : > { %5921 = vrsqrt.f32 %v4965_v15  ;;  %v4962_v36 = vmul.f32 0.03125, %v4958_v12 }
0x1484   : > { %v4966_v11 = vadd.f32 1e-05, %v4962_v36 }
0x1486   : > { %v5918_v6 = vpop.eup %5917  ;;  %5923 = vrsqrt.f32 %v4966_v11 }
0x1487   : > { %v4972_v32 = vmul.f32 %v5918_v6, %v4940_v61 }
0x1489   : > { %v4982_v5 = vmul.f32 %v5664_v45, %v4972_v32 }
0x148a   : > { %v5920_v59 = vpop.eup %5919 }
0x148b   : > { %v4971_v60 = vmul.f32 %v5920_v59, %v4939_v37  ;;  %v4992_v8 = vadd.f32 %v5665_v34, %v4982_v5 }
0x148c   : > { %v5922_v2 = vpop.eup %5921 }
0x148d   : > { %v4981_v14 = vmul.f32 %v5664_v45, %v4971_v60  ;;  %v4973_v51 = vmul.f32 %v5922_v2, %v4941_v10  ;;  %v4996_v56 = vpack.c.bf16 %v4992_v8, %v4992_v8  ;;  %v5086_v10 = vunpack.c.l.s4 %v5941_v63 }
0x148f   : > { %v4991_v46 = vadd.f32 %v5665_v34, %v4981_v14  ;;  %v4983_v54 = vmul.f32 %v5664_v45, %v4973_v51  ;;  %v5015_v47 = vunpack.c.l.b16 %v4996_v56  ;;  %v5087_v57 = vunpack.c.0.s8 %v5086_v10 }
0x1490   : > { %v5924_v39 = vpop.eup %5923 }
0x1491   : > { %v4993_v49 = vadd.f32 %v5665_v34, %v4983_v54  ;;  %v4974_v33 = vmul.f32 %v5924_v39, %v4942_v43  ;;  %v4995_v55 = vpack.c.bf16 %v4991_v46, %v4991_v46  ;;  %v5018_v52 = vrot.slane %v5015_v47, 7 }
0x1492   : > { %v5090_v17 = vsub.s32 %v5087_v57, %v6047_v3 }
0x1493   : > { %v4997_v62 = vpack.c.bf16 %v4993_v49, %v4993_v49  ;;  %v4984_v0 = vmul.f32 %v5664_v45, %v4974_v33  ;;  %v5014_v53 = vunpack.c.l.b16 %v4995_v55 }
0x1495   : > { %v5016_v38 = vunpack.c.l.b16 %v4997_v62  ;;  %v4994_v18 = vadd.f32 %v5665_v34, %v4984_v0  ;;  %v5020_v7 = vsel %vm5019_vm2, %v5018_v52, %v5014_v53 }
0x1497   : > { %v4998_v26 = vpack.c.bf16 %v4994_v18, %v4994_v18  ;;  %v5021_v16 = vrot.slane %v5016_v38, 6 }
0x1499   : > { %v5017_v22 = vunpack.c.l.b16 %v4998_v26  ;;  %v5023_v61 = vsel %vm5022_vm3, %v5021_v16, %v5020_v7 }
0x149b   : > { %v5024_v42 = vrot.slane %v5017_v22, 5 }
0x149d   : > { %v5026_v20 = vsel %vm5025_vm4, %v5024_v42, %v5023_v61 }
0x149e   : > { %v5027_v21 = vpack.c.b16 %v5026_v20, %v5026_v20 }
0x14a0   : > { %5801 = vmatmul.mubr.msk.bf16.vlgmr.msra.gmra.mrb[144].mxu0 %vm1044_vm0, %v5027_v21 }
0x1573   : > { %v5077_v44 = vpop.f32.mrb[144].mxu0 }
0x1574   : > { %v5078_v37 = vadd.f32 %v5666_v29, %v5077_v44  ;;  %v5802_v35 = vpop.f32.mrb[145].mxu0 }
0x1575   : > { %v5080_v31 = vpop.f32.mrb[146].mxu0 }
0x1576   : > { %5925 = vtanh.f32 %v5078_v37  ;;  %v5803_v50 = vpop.f32.mrb[147].mxu0 }
0x1580   : > { %v5926_v24 = vpop.eup %5925 }
0x1581   : > { %v5091_v43 = vrot.slane %v5926_v24, %v5090_v17 }
0x1583   : > { %v5092_v28 = vcombine.high %v5091_v43, %v5091_v43  ;;  %5096 = vst.msk [vmem:[%s865_s27] sm:$0x3] %vm5095_vm5, %v5091_v43 }
0x1585   : > { %5097 = vst.msk [vmem:[%s865_s27 + $0x2] sm:$0x3] %vm5095_vm5, %v5092_v28 }
0x1586 PF: > { %s6974_s28 = sld [smem:[#allocation2_spill]] }
0x158c   : > { %s28_s27 = sadd.s32 1, %s6974_s28  }
0x158d   : > { %p25_p4 = scmp.ge.s32.totalorder %s28_s27, 4  }
0x158f   :  { %27 = sbr.rel (!%p25_p4) target bundleno = 7 (0x7), region = 182 }

</bundles_post_ra>
